<compile_context>
chip_gen: v6e
topology: v6e:2x2x1
jax: 0.10.0
libtpu: 0.0.40
codegen_flags: <defaults>
</compile_context>

<pallas_src>
import functools

import jax
import jax.numpy as jnp
from jax.experimental import pallas as pl
from jax.experimental.pallas import tpu as pltpu

SOS_token = 1

VOCAB = 64          # real vocabulary size
VOCAB_PAD = 128     # lane-dense padded vocab (pad columns biased to -1e30)
HIDDEN = 32
SEQ_LEN = 8
MAX_LENGTH = 6
N_LAYERS = 1        # decoder.n_layers
NEG_BIG = -1e30


# -----------------------------------------------------------------------------
# Fused kernel: encoder GRU sweep + greedy attention-decoder loop.
# -----------------------------------------------------------------------------
def _make_greedy_kernel(seq_len, max_length):
    H = HIDDEN
    V = VOCAB

    def kernel(seq_ref, enc_pack_ref, dec_pack_ref, wc_pack_ref, out_pack_ref,
               tok_out_ref, score_out_ref):
        # Hoisted iota constants (JAX does not CSE broadcasts inside loops).
        vocab_lane = jax.lax.broadcasted_iota(jnp.int32, (1, V), 1)
        out_lane = jax.lax.broadcasted_iota(jnp.int32, (1, VOCAB_PAD), 1)
        step_lane = jax.lax.broadcasted_iota(jnp.int32, (1, max_length), 1)
        row_iota = jax.lax.broadcasted_iota(jnp.int32, (seq_len, 1), 0)

        # --------------------------- encoder ---------------------------
        # enc_pack rows: [0:V)   emb @ Wih + b_ih  (gi gather table)
        #                [V:V+H) Whh^T
        #                [V+H]   b_hh
        h = jnp.zeros((1, H), jnp.float32)
        enc = jnp.zeros((seq_len, H), jnp.float32)
        for t in range(seq_len):                               # static unroll
            tok_t = seq_ref[t]                                 # SMEM scalar read
            gi = enc_pack_ref[pl.ds(tok_t, 1), :]              # (1,3H) row gather, b_ih folded
            gh = (jnp.dot(h, enc_pack_ref[pl.ds(V, H), :],
                          preferred_element_type=jnp.float32)
                  + enc_pack_ref[pl.ds(V + H, 1), :])          # (1,3H)
            r = jax.nn.sigmoid(gi[:, 0:H] + gh[:, 0:H])
            z = jax.nn.sigmoid(gi[:, H:2 * H] + gh[:, H:2 * H])
            n = jnp.tanh(gi[:, 2 * H:3 * H] + r * gh[:, 2 * H:3 * H])
            h = (1.0 - z) * n + z * h
            enc = jnp.where(row_iota == t, h, enc)             # select-accumulate row t
        enc_t = enc.T                                          # (H, T), one-time XLU transpose

        # ------------------------ greedy decode ------------------------
        # dec_pack: rows [0:H)   hidden part, cols = [Whr | Whz | 0 | Whn]
        #           rows [H:H+V) onehot part, cols = [Wir+bir | Wiz+biz | Win+bin | 0]
        #           row  [H+V]   bias row          = [bhr | bhz | 0 | bhn]
        tok = jnp.full((1, 1), SOS_token, jnp.int32)           # decoder_input = SOS
        hidden = h                                             # encoder_hidden[:n_layers]
        toks = jnp.zeros((1, max_length), jnp.int32)
        scores = jnp.zeros((1, max_length), jnp.float32)

        for i in range(max_length):                            # static unroll
            # embedding + both GRU gate matmuls fused into ONE MXU op
            onehot = (vocab_lane == tok).astype(jnp.float32)   # (1, V)
            x_cat = jnp.concatenate([hidden, onehot], axis=1)  # (1, H+V)
            g = (jnp.dot(x_cat, dec_pack_ref[pl.ds(0, H + V), :],
                         preferred_element_type=jnp.float32)
                 + dec_pack_ref[pl.ds(H + V, 1), :])           # (1, 4H) = one vreg
            r = jax.nn.sigmoid(g[:, 0:H])                      # i_r+h_r already summed
            z = jax.nn.sigmoid(g[:, H:2 * H])                  # i_z+h_z already summed
            n = jnp.tanh(g[:, 2 * H:3 * H] + r * g[:, 3 * H:4 * H])
            h_new = (1.0 - z) * n + z * hidden

            # concat-projection split: h_new half issues now, overlaps attention
            pre_h = (jnp.dot(h_new, wc_pack_ref[pl.ds(0, H), :],
                             preferred_element_type=jnp.float32)
                     + wc_pack_ref[pl.ds(2 * H, 1), :])        # (1, H)

            # Luong "dot" attention; normalization deferred past context matmul
            e = jnp.dot(h_new, enc_t, preferred_element_type=jnp.float32)  # (1, T)
            a = jnp.exp(e - jnp.max(e, axis=1, keepdims=True))
            ctx = jnp.dot(a, enc, preferred_element_type=jnp.float32)      # (1, H) unnormalized
            context = ctx * pl.reciprocal(
                jnp.sum(a, axis=1, keepdims=True), approx=False)           # exact on argmax path

            concat_out = jnp.tanh(
                pre_h + jnp.dot(context, wc_pack_ref[pl.ds(H, H), :],
                                preferred_element_type=jnp.float32))       # (1, H)
            logits = (jnp.dot(concat_out, out_pack_ref[pl.ds(0, H), :],
                              preferred_element_type=jnp.float32)
                      + out_pack_ref[pl.ds(H, 1), :])                      # (1, 128)

            # argmax over logits == argmax over softmax probs; pad lanes hold -1e30
            m = jnp.max(logits, axis=1, keepdims=True)                     # (1, 1)
            idx = jnp.min(jnp.where(logits == m, out_lane, VOCAB_PAD),
                          axis=1, keepdims=True).astype(jnp.int32)         # first argmax
            # max softmax prob = 1 / sum(exp(logits - max)); pad lanes -> exp -> 0
            denom = jnp.sum(jnp.exp(logits - m), axis=1, keepdims=True)
            score = pl.reciprocal(denom, approx=True)   # reported score only (not fed back)

            toks = jnp.where(step_lane == i, idx, toks)
            scores = jnp.where(step_lane == i, score, scores)
            tok, hidden = idx, h_new                           # feed back argmax

        tok_out_ref[...] = toks
        score_out_ref[...] = scores

    return kernel


# -----------------------------------------------------------------------------
# Parameter init (deterministic)
# -----------------------------------------------------------------------------
def init_params(key):
    ks = jax.random.split(key, 12)
    s = 0.1
    embedding = jax.random.normal(ks[0], (VOCAB, HIDDEN), jnp.float32) * s
    enc = {
        "wih_t": jax.random.normal(ks[1], (HIDDEN, 3 * HIDDEN), jnp.float32) * s,
        "whh_t": jax.random.normal(ks[2], (HIDDEN, 3 * HIDDEN), jnp.float32) * s,
        "bih": jax.random.normal(ks[3], (1, 3 * HIDDEN), jnp.float32) * s,
        "bhh": jax.random.normal(ks[4], (1, 3 * HIDDEN), jnp.float32) * s,
    }
    wout_real = jax.random.normal(ks[10], (HIDDEN, VOCAB), jnp.float32) * s
    wout_pad = jnp.zeros((HIDDEN, VOCAB_PAD), jnp.float32).at[:, :VOCAB].set(wout_real)
    bout_pad = jnp.full((1, VOCAB_PAD), NEG_BIG, jnp.float32).at[:, :VOCAB].set(0.0)
    dec = {
        "wih_t": jax.random.normal(ks[5], (HIDDEN, 3 * HIDDEN), jnp.float32) * s,
        "whh_t": jax.random.normal(ks[6], (HIDDEN, 3 * HIDDEN), jnp.float32) * s,
        "bih": jax.random.normal(ks[7], (1, 3 * HIDDEN), jnp.float32) * s,
        "bhh": jax.random.normal(ks[8], (1, 3 * HIDDEN), jnp.float32) * s,
        "wc_t": jax.random.normal(ks[9], (2 * HIDDEN, HIDDEN), jnp.float32) * s,
        "bc": jnp.zeros((1, HIDDEN), jnp.float32),
        "wout_t": wout_pad,   # lane-dense padded projection
        "bout": bout_pad,     # -1e30 on pad columns so they never win argmax
    }
    return embedding, enc, dec


# -----------------------------------------------------------------------------
# Jitted greedy-search driver: pre-fuse embedding, pack weights into 4 buffers,
# single pallas_call (one dispatch).
# -----------------------------------------------------------------------------
@functools.partial(jax.jit, static_argnums=(2, 3))
def greedy_search(input_seq, input_length, max_length, batch_size,
                  embedding, enc_params, dec_params):
    # TODO(synk): `codes` and `input_length`-based masking from the reference
    # encoder are undefined in the provided source; attention spans all SEQ_LEN.
    del input_length, batch_size  # batch = 1
    H = HIDDEN
    seq_len = input_seq.shape[0]

    # --- encoder pack (V+H+1, 3H): emb-fused gi table, Whh, b_hh ---
    e_gi_tbl = jnp.dot(embedding, enc_params["wih_t"]) + enc_params["bih"]   # (V, 3H)
    enc_pack = jnp.concatenate(
        [e_gi_tbl, enc_params["whh_t"], enc_params["bhh"]], axis=0)

    # --- decoder GRU pack (H+V+1, 4H): block-structured single-matmul GRU ---
    ew = jnp.dot(embedding, dec_params["wih_t"]) + dec_params["bih"]         # (V, 3H)
    whh = dec_params["whh_t"]                                                # (H, 3H)
    bhh = dec_params["bhh"]                                                  # (1, 3H)
    zHH = jnp.zeros((H, H), jnp.float32)
    zVH = jnp.zeros((VOCAB, H), jnp.float32)
    z1H = jnp.zeros((1, H), jnp.float32)
    top = jnp.concatenate([whh[:, 0:H], whh[:, H:2 * H], zHH, whh[:, 2 * H:3 * H]], axis=1)
    bot = jnp.concatenate([ew[:, 0:H], ew[:, H:2 * H], ew[:, 2 * H:3 * H], zVH], axis=1)
    brow = jnp.concatenate([bhh[:, 0:H], bhh[:, H:2 * H], z1H, bhh[:, 2 * H:3 * H]], axis=1)
    dec_pack = jnp.concatenate([top, bot, brow], axis=0)                     # (H+V+1, 4H)

    # --- concat-projection pack (2H+1, H): Wc_h, Wc_c, b_c ---
    wc_pack = jnp.concatenate(
        [dec_params["wc_t"][0:H, :], dec_params["wc_t"][H:2 * H, :], dec_params["bc"]],
        axis=0)

    # --- output projection pack (H+1, 128): Wout (lane-padded), b_out ---
    out_pack = jnp.concatenate([dec_params["wout_t"], dec_params["bout"]], axis=0)

    kernel = _make_greedy_kernel(seq_len, max_length)
    toks, scores = pl.pallas_call(
        kernel,
        out_shape=(jax.ShapeDtypeStruct((1, max_length), jnp.int32),
                   jax.ShapeDtypeStruct((1, max_length), jnp.float32)),
        in_specs=[pl.BlockSpec(memory_space=pltpu.MemorySpace.SMEM),     # token ids
                  pl.BlockSpec(memory_space=pltpu.MemorySpace.VMEM),     # enc_pack
                  pl.BlockSpec(memory_space=pltpu.MemorySpace.VMEM),     # dec_pack
                  pl.BlockSpec(memory_space=pltpu.MemorySpace.VMEM),     # wc_pack
                  pl.BlockSpec(memory_space=pltpu.MemorySpace.VMEM)],    # out_pack
        out_specs=(pl.BlockSpec(memory_space=pltpu.MemorySpace.VMEM),
                   pl.BlockSpec(memory_space=pltpu.MemorySpace.VMEM)),
    )(input_seq.reshape(seq_len).astype(jnp.int32),
      enc_pack, dec_pack, wc_pack, out_pack)
    return toks[0], scores[0]


if __name__ == "__main__":
    key = jax.random.PRNGKey(0)
    k_param, k_seq = jax.random.split(key)
    embedding, enc_params, dec_params = init_params(k_param)

    input_seq = jax.random.randint(k_seq, (SEQ_LEN, 1), 0, VOCAB, dtype=jnp.int32)
    input_length = jnp.array([SEQ_LEN], dtype=jnp.int32)

    all_tokens, all_scores = greedy_search(
        input_seq, input_length, MAX_LENGTH, 1,
        embedding, enc_params, dec_params)

    jax.block_until_ready((all_tokens, all_scores))
    assert all_tokens.shape == (MAX_LENGTH,) and all_tokens.dtype == jnp.int32
    assert all_scores.shape == (MAX_LENGTH,) and all_scores.dtype == jnp.float32
    # padded (>= VOCAB) lanes must never win the argmax
    assert bool(jnp.all((all_tokens >= 0) & (all_tokens < VOCAB)))
    # scores are softmax max-probabilities, must lie in (0, 1]
    assert bool(jnp.all((all_scores > 0.0) & (all_scores <= 1.0)))
    print("KERNEL_OK")
</pallas_src>

<mosaic_0001>
module attributes {stable_mosaic.version = 11 : i64} {
  func.func @kernel(%arg0: memref<8xi32, #tpu.memory_space<smem>>, %arg1: memref<97x96xf32, #tpu.memory_space<vmem>>, %arg2: memref<97x128xf32, #tpu.memory_space<vmem>>, %arg3: memref<65x32xf32, #tpu.memory_space<vmem>>, %arg4: memref<33x128xf32, #tpu.memory_space<vmem>>, %arg5: memref<1x6xi32, #tpu.memory_space<vmem>>, %arg6: memref<1x6xf32, #tpu.memory_space<vmem>>) attributes {dimension_semantics = [], scalar_prefetch = 0 : i64, scratch_operands = 0 : i64, tpu.core_type = #tpu.core_type<tc>} {
    %0 = tpu.iota {dimensions = array<i32: 1>} : vector<1x64xi32>
    %1 = tpu.iota {dimensions = array<i32: 1>} : vector<1x128xi32>
    %2 = tpu.iota {dimensions = array<i32: 1>} : vector<1x6xi32>
    %3 = tpu.iota {dimensions = array<i32: 0>} : vector<8x1xi32>
    %cst = arith.constant 0.000000e+00 : f32
    %4 = vector.broadcast %cst : f32 to vector<1x32xf32>
    %cst_0 = arith.constant 0.000000e+00 : f32
    %5 = vector.broadcast %cst_0 : f32 to vector<8x32xf32>
    %c0 = arith.constant 0 : index
    %6 = memref.load %arg0[%c0] : memref<8xi32, #tpu.memory_space<smem>>
    %7 = arith.index_cast %6 : i32 to index
    %c0_1 = arith.constant 0 : index
    %8 = vector.load %arg1[%7, %c0_1] : memref<97x96xf32, #tpu.memory_space<vmem>>, vector<1x96xf32>
    %c64 = arith.constant 64 : index
    %c0_2 = arith.constant 0 : index
    %9 = vector.load %arg1[%c64, %c0_2] : memref<97x96xf32, #tpu.memory_space<vmem>>, vector<32x96xf32>
    %cst_3 = arith.constant dense<0.000000e+00> : vector<1x96xf32>
    %10 = tpu.matmul %4, %9, %cst_3 {dimension_numbers = #tpu.dot_dimension_numbers<[1], [0], [0], [1], [0, 0, 1, 1], [], []>} : vector<1x32xf32>, vector<32x96xf32>, vector<1x96xf32> -> vector<1x96xf32>
    %c96 = arith.constant 96 : index
    %c0_4 = arith.constant 0 : index
    %11 = vector.load %arg1[%c96, %c0_4] : memref<97x96xf32, #tpu.memory_space<vmem>>, vector<1x96xf32>
    %12 = arith.addf %10, %11 : vector<1x96xf32>
    %13 = vector.extract_strided_slice %8 {offsets = [0, 0], sizes = [1, 32], strides = [1, 1]} : vector<1x96xf32> to vector<1x32xf32>
    %14 = vector.extract_strided_slice %12 {offsets = [0, 0], sizes = [1, 32], strides = [1, 1]} : vector<1x96xf32> to vector<1x32xf32>
    %15 = arith.addf %13, %14 : vector<1x32xf32>
    %16 = arith.negf %15 : vector<1x32xf32>
    %17 = math.exp %16 : vector<1x32xf32>
    %cst_5 = arith.constant 1.000000e+00 : f32
    %18 = vector.broadcast %cst_5 : f32 to vector<1x32xf32>
    %19 = arith.addf %18, %17 : vector<1x32xf32>
    %20 = arith.divf %18, %19 : vector<1x32xf32>
    %21 = vector.extract_strided_slice %8 {offsets = [0, 32], sizes = [1, 32], strides = [1, 1]} : vector<1x96xf32> to vector<1x32xf32>
    %22 = vector.extract_strided_slice %12 {offsets = [0, 32], sizes = [1, 32], strides = [1, 1]} : vector<1x96xf32> to vector<1x32xf32>
    %23 = arith.addf %21, %22 : vector<1x32xf32>
    %24 = arith.negf %23 : vector<1x32xf32>
    %25 = math.exp %24 : vector<1x32xf32>
    %cst_6 = arith.constant 1.000000e+00 : f32
    %26 = vector.broadcast %cst_6 : f32 to vector<1x32xf32>
    %27 = arith.addf %26, %25 : vector<1x32xf32>
    %28 = arith.divf %26, %27 : vector<1x32xf32>
    %29 = vector.extract_strided_slice %8 {offsets = [0, 64], sizes = [1, 32], strides = [1, 1]} : vector<1x96xf32> to vector<1x32xf32>
    %30 = vector.extract_strided_slice %12 {offsets = [0, 64], sizes = [1, 32], strides = [1, 1]} : vector<1x96xf32> to vector<1x32xf32>
    %31 = arith.mulf %20, %30 : vector<1x32xf32>
    %32 = arith.addf %29, %31 : vector<1x32xf32>
    %33 = math.tanh %32 : vector<1x32xf32>
    %cst_7 = arith.constant 1.000000e+00 : f32
    %34 = vector.broadcast %cst_7 : f32 to vector<1x32xf32>
    %35 = arith.subf %34, %28 : vector<1x32xf32>
    %36 = arith.mulf %35, %33 : vector<1x32xf32>
    %37 = arith.mulf %28, %4 : vector<1x32xf32>
    %38 = arith.addf %36, %37 : vector<1x32xf32>
    %c0_i32 = arith.constant 0 : i32
    %39 = vector.broadcast %c0_i32 : i32 to vector<8x1xi32>
    %40 = arith.cmpi eq, %3, %39 : vector<8x1xi32>
    %41 = vector.shape_cast %40 : vector<8x1xi1> to vector<8x1xi1>
    %42 = vector.broadcast %41 : vector<8x1xi1> to vector<8x32xi1>
    %43 = vector.shape_cast %38 : vector<1x32xf32> to vector<1x32xf32>
    %44 = vector.broadcast %43 : vector<1x32xf32> to vector<8x32xf32>
    %45 = arith.select %42, %44, %5 : vector<8x32xi1>, vector<8x32xf32>
    %c1 = arith.constant 1 : index
    %46 = memref.load %arg0[%c1] : memref<8xi32, #tpu.memory_space<smem>>
    %47 = arith.index_cast %46 : i32 to index
    %c0_8 = arith.constant 0 : index
    %48 = vector.load %arg1[%47, %c0_8] : memref<97x96xf32, #tpu.memory_space<vmem>>, vector<1x96xf32>
    %c64_9 = arith.constant 64 : index
    %c0_10 = arith.constant 0 : index
    %49 = vector.load %arg1[%c64_9, %c0_10] : memref<97x96xf32, #tpu.memory_space<vmem>>, vector<32x96xf32>
    %cst_11 = arith.constant dense<0.000000e+00> : vector<1x96xf32>
    %50 = tpu.matmul %38, %49, %cst_11 {dimension_numbers = #tpu.dot_dimension_numbers<[1], [0], [0], [1], [0, 0, 1, 1], [], []>} : vector<1x32xf32>, vector<32x96xf32>, vector<1x96xf32> -> vector<1x96xf32>
    %c96_12 = arith.constant 96 : index
    %c0_13 = arith.constant 0 : index
    %51 = vector.load %arg1[%c96_12, %c0_13] : memref<97x96xf32, #tpu.memory_space<vmem>>, vector<1x96xf32>
    %52 = arith.addf %50, %51 : vector<1x96xf32>
    %53 = vector.extract_strided_slice %48 {offsets = [0, 0], sizes = [1, 32], strides = [1, 1]} : vector<1x96xf32> to vector<1x32xf32>
    %54 = vector.extract_strided_slice %52 {offsets = [0, 0], sizes = [1, 32], strides = [1, 1]} : vector<1x96xf32> to vector<1x32xf32>
    %55 = arith.addf %53, %54 : vector<1x32xf32>
    %56 = arith.negf %55 : vector<1x32xf32>
    %57 = math.exp %56 : vector<1x32xf32>
    %cst_14 = arith.constant 1.000000e+00 : f32
    %58 = vector.broadcast %cst_14 : f32 to vector<1x32xf32>
    %59 = arith.addf %58, %57 : vector<1x32xf32>
    %60 = arith.divf %58, %59 : vector<1x32xf32>
    %61 = vector.extract_strided_slice %48 {offsets = [0, 32], sizes = [1, 32], strides = [1, 1]} : vector<1x96xf32> to vector<1x32xf32>
    %62 = vector.extract_strided_slice %52 {offsets = [0, 32], sizes = [1, 32], strides = [1, 1]} : vector<1x96xf32> to vector<1x32xf32>
    %63 = arith.addf %61, %62 : vector<1x32xf32>
    %64 = arith.negf %63 : vector<1x32xf32>
    %65 = math.exp %64 : vector<1x32xf32>
    %cst_15 = arith.constant 1.000000e+00 : f32
    %66 = vector.broadcast %cst_15 : f32 to vector<1x32xf32>
    %67 = arith.addf %66, %65 : vector<1x32xf32>
    %68 = arith.divf %66, %67 : vector<1x32xf32>
    %69 = vector.extract_strided_slice %48 {offsets = [0, 64], sizes = [1, 32], strides = [1, 1]} : vector<1x96xf32> to vector<1x32xf32>
    %70 = vector.extract_strided_slice %52 {offsets = [0, 64], sizes = [1, 32], strides = [1, 1]} : vector<1x96xf32> to vector<1x32xf32>
    %71 = arith.mulf %60, %70 : vector<1x32xf32>
    %72 = arith.addf %69, %71 : vector<1x32xf32>
    %73 = math.tanh %72 : vector<1x32xf32>
    %cst_16 = arith.constant 1.000000e+00 : f32
    %74 = vector.broadcast %cst_16 : f32 to vector<1x32xf32>
    %75 = arith.subf %74, %68 : vector<1x32xf32>
    %76 = arith.mulf %75, %73 : vector<1x32xf32>
    %77 = arith.mulf %68, %38 : vector<1x32xf32>
    %78 = arith.addf %76, %77 : vector<1x32xf32>
    %c1_i32 = arith.constant 1 : i32
    %79 = vector.broadcast %c1_i32 : i32 to vector<8x1xi32>
    %80 = arith.cmpi eq, %3, %79 : vector<8x1xi32>
    %81 = vector.shape_cast %80 : vector<8x1xi1> to vector<8x1xi1>
    %82 = vector.broadcast %81 : vector<8x1xi1> to vector<8x32xi1>
    %83 = vector.shape_cast %78 : vector<1x32xf32> to vector<1x32xf32>
    %84 = vector.broadcast %83 : vector<1x32xf32> to vector<8x32xf32>
    %85 = arith.select %82, %84, %45 : vector<8x32xi1>, vector<8x32xf32>
    %c2 = arith.constant 2 : index
    %86 = memref.load %arg0[%c2] : memref<8xi32, #tpu.memory_space<smem>>
    %87 = arith.index_cast %86 : i32 to index
    %c0_17 = arith.constant 0 : index
    %88 = vector.load %arg1[%87, %c0_17] : memref<97x96xf32, #tpu.memory_space<vmem>>, vector<1x96xf32>
    %c64_18 = arith.constant 64 : index
    %c0_19 = arith.constant 0 : index
    %89 = vector.load %arg1[%c64_18, %c0_19] : memref<97x96xf32, #tpu.memory_space<vmem>>, vector<32x96xf32>
    %cst_20 = arith.constant dense<0.000000e+00> : vector<1x96xf32>
    %90 = tpu.matmul %78, %89, %cst_20 {dimension_numbers = #tpu.dot_dimension_numbers<[1], [0], [0], [1], [0, 0, 1, 1], [], []>} : vector<1x32xf32>, vector<32x96xf32>, vector<1x96xf32> -> vector<1x96xf32>
    %c96_21 = arith.constant 96 : index
    %c0_22 = arith.constant 0 : index
    %91 = vector.load %arg1[%c96_21, %c0_22] : memref<97x96xf32, #tpu.memory_space<vmem>>, vector<1x96xf32>
    %92 = arith.addf %90, %91 : vector<1x96xf32>
    %93 = vector.extract_strided_slice %88 {offsets = [0, 0], sizes = [1, 32], strides = [1, 1]} : vector<1x96xf32> to vector<1x32xf32>
    %94 = vector.extract_strided_slice %92 {offsets = [0, 0], sizes = [1, 32], strides = [1, 1]} : vector<1x96xf32> to vector<1x32xf32>
    %95 = arith.addf %93, %94 : vector<1x32xf32>
    %96 = arith.negf %95 : vector<1x32xf32>
    %97 = math.exp %96 : vector<1x32xf32>
    %cst_23 = arith.constant 1.000000e+00 : f32
    %98 = vector.broadcast %cst_23 : f32 to vector<1x32xf32>
    %99 = arith.addf %98, %97 : vector<1x32xf32>
    %100 = arith.divf %98, %99 : vector<1x32xf32>
    %101 = vector.extract_strided_slice %88 {offsets = [0, 32], sizes = [1, 32], strides = [1, 1]} : vector<1x96xf32> to vector<1x32xf32>
    %102 = vector.extract_strided_slice %92 {offsets = [0, 32], sizes = [1, 32], strides = [1, 1]} : vector<1x96xf32> to vector<1x32xf32>
    %103 = arith.addf %101, %102 : vector<1x32xf32>
    %104 = arith.negf %103 : vector<1x32xf32>
    %105 = math.exp %104 : vector<1x32xf32>
    %cst_24 = arith.constant 1.000000e+00 : f32
    %106 = vector.broadcast %cst_24 : f32 to vector<1x32xf32>
    %107 = arith.addf %106, %105 : vector<1x32xf32>
    %108 = arith.divf %106, %107 : vector<1x32xf32>
    %109 = vector.extract_strided_slice %88 {offsets = [0, 64], sizes = [1, 32], strides = [1, 1]} : vector<1x96xf32> to vector<1x32xf32>
    %110 = vector.extract_strided_slice %92 {offsets = [0, 64], sizes = [1, 32], strides = [1, 1]} : vector<1x96xf32> to vector<1x32xf32>
    %111 = arith.mulf %100, %110 : vector<1x32xf32>
    %112 = arith.addf %109, %111 : vector<1x32xf32>
    %113 = math.tanh %112 : vector<1x32xf32>
    %cst_25 = arith.constant 1.000000e+00 : f32
    %114 = vector.broadcast %cst_25 : f32 to vector<1x32xf32>
    %115 = arith.subf %114, %108 : vector<1x32xf32>
    %116 = arith.mulf %115, %113 : vector<1x32xf32>
    %117 = arith.mulf %108, %78 : vector<1x32xf32>
    %118 = arith.addf %116, %117 : vector<1x32xf32>
    %c2_i32 = arith.constant 2 : i32
    %119 = vector.broadcast %c2_i32 : i32 to vector<8x1xi32>
    %120 = arith.cmpi eq, %3, %119 : vector<8x1xi32>
    %121 = vector.shape_cast %120 : vector<8x1xi1> to vector<8x1xi1>
    %122 = vector.broadcast %121 : vector<8x1xi1> to vector<8x32xi1>
    %123 = vector.shape_cast %118 : vector<1x32xf32> to vector<1x32xf32>
    %124 = vector.broadcast %123 : vector<1x32xf32> to vector<8x32xf32>
    %125 = arith.select %122, %124, %85 : vector<8x32xi1>, vector<8x32xf32>
    %c3 = arith.constant 3 : index
    %126 = memref.load %arg0[%c3] : memref<8xi32, #tpu.memory_space<smem>>
    %127 = arith.index_cast %126 : i32 to index
    %c0_26 = arith.constant 0 : index
    %128 = vector.load %arg1[%127, %c0_26] : memref<97x96xf32, #tpu.memory_space<vmem>>, vector<1x96xf32>
    %c64_27 = arith.constant 64 : index
    %c0_28 = arith.constant 0 : index
    %129 = vector.load %arg1[%c64_27, %c0_28] : memref<97x96xf32, #tpu.memory_space<vmem>>, vector<32x96xf32>
    %cst_29 = arith.constant dense<0.000000e+00> : vector<1x96xf32>
    %130 = tpu.matmul %118, %129, %cst_29 {dimension_numbers = #tpu.dot_dimension_numbers<[1], [0], [0], [1], [0, 0, 1, 1], [], []>} : vector<1x32xf32>, vector<32x96xf32>, vector<1x96xf32> -> vector<1x96xf32>
    %c96_30 = arith.constant 96 : index
    %c0_31 = arith.constant 0 : index
    %131 = vector.load %arg1[%c96_30, %c0_31] : memref<97x96xf32, #tpu.memory_space<vmem>>, vector<1x96xf32>
    %132 = arith.addf %130, %131 : vector<1x96xf32>
    %133 = vector.extract_strided_slice %128 {offsets = [0, 0], sizes = [1, 32], strides = [1, 1]} : vector<1x96xf32> to vector<1x32xf32>
    %134 = vector.extract_strided_slice %132 {offsets = [0, 0], sizes = [1, 32], strides = [1, 1]} : vector<1x96xf32> to vector<1x32xf32>
    %135 = arith.addf %133, %134 : vector<1x32xf32>
    %136 = arith.negf %135 : vector<1x32xf32>
    %137 = math.exp %136 : vector<1x32xf32>
    %cst_32 = arith.constant 1.000000e+00 : f32
    %138 = vector.broadcast %cst_32 : f32 to vector<1x32xf32>
    %139 = arith.addf %138, %137 : vector<1x32xf32>
    %140 = arith.divf %138, %139 : vector<1x32xf32>
    %141 = vector.extract_strided_slice %128 {offsets = [0, 32], sizes = [1, 32], strides = [1, 1]} : vector<1x96xf32> to vector<1x32xf32>
    %142 = vector.extract_strided_slice %132 {offsets = [0, 32], sizes = [1, 32], strides = [1, 1]} : vector<1x96xf32> to vector<1x32xf32>
    %143 = arith.addf %141, %142 : vector<1x32xf32>
    %144 = arith.negf %143 : vector<1x32xf32>
    %145 = math.exp %144 : vector<1x32xf32>
    %cst_33 = arith.constant 1.000000e+00 : f32
    %146 = vector.broadcast %cst_33 : f32 to vector<1x32xf32>
    %147 = arith.addf %146, %145 : vector<1x32xf32>
    %148 = arith.divf %146, %147 : vector<1x32xf32>
    %149 = vector.extract_strided_slice %128 {offsets = [0, 64], sizes = [1, 32], strides = [1, 1]} : vector<1x96xf32> to vector<1x32xf32>
    %150 = vector.extract_strided_slice %132 {offsets = [0, 64], sizes = [1, 32], strides = [1, 1]} : vector<1x96xf32> to vector<1x32xf32>
    %151 = arith.mulf %140, %150 : vector<1x32xf32>
    %152 = arith.addf %149, %151 : vector<1x32xf32>
    %153 = math.tanh %152 : vector<1x32xf32>
    %cst_34 = arith.constant 1.000000e+00 : f32
    %154 = vector.broadcast %cst_34 : f32 to vector<1x32xf32>
    %155 = arith.subf %154, %148 : vector<1x32xf32>
    %156 = arith.mulf %155, %153 : vector<1x32xf32>
    %157 = arith.mulf %148, %118 : vector<1x32xf32>
    %158 = arith.addf %156, %157 : vector<1x32xf32>
    %c3_i32 = arith.constant 3 : i32
    %159 = vector.broadcast %c3_i32 : i32 to vector<8x1xi32>
    %160 = arith.cmpi eq, %3, %159 : vector<8x1xi32>
    %161 = vector.shape_cast %160 : vector<8x1xi1> to vector<8x1xi1>
    %162 = vector.broadcast %161 : vector<8x1xi1> to vector<8x32xi1>
    %163 = vector.shape_cast %158 : vector<1x32xf32> to vector<1x32xf32>
    %164 = vector.broadcast %163 : vector<1x32xf32> to vector<8x32xf32>
    %165 = arith.select %162, %164, %125 : vector<8x32xi1>, vector<8x32xf32>
    %c4 = arith.constant 4 : index
    %166 = memref.load %arg0[%c4] : memref<8xi32, #tpu.memory_space<smem>>
    %167 = arith.index_cast %166 : i32 to index
    %c0_35 = arith.constant 0 : index
    %168 = vector.load %arg1[%167, %c0_35] : memref<97x96xf32, #tpu.memory_space<vmem>>, vector<1x96xf32>
    %c64_36 = arith.constant 64 : index
    %c0_37 = arith.constant 0 : index
    %169 = vector.load %arg1[%c64_36, %c0_37] : memref<97x96xf32, #tpu.memory_space<vmem>>, vector<32x96xf32>
    %cst_38 = arith.constant dense<0.000000e+00> : vector<1x96xf32>
    %170 = tpu.matmul %158, %169, %cst_38 {dimension_numbers = #tpu.dot_dimension_numbers<[1], [0], [0], [1], [0, 0, 1, 1], [], []>} : vector<1x32xf32>, vector<32x96xf32>, vector<1x96xf32> -> vector<1x96xf32>
    %c96_39 = arith.constant 96 : index
    %c0_40 = arith.constant 0 : index
    %171 = vector.load %arg1[%c96_39, %c0_40] : memref<97x96xf32, #tpu.memory_space<vmem>>, vector<1x96xf32>
    %172 = arith.addf %170, %171 : vector<1x96xf32>
    %173 = vector.extract_strided_slice %168 {offsets = [0, 0], sizes = [1, 32], strides = [1, 1]} : vector<1x96xf32> to vector<1x32xf32>
    %174 = vector.extract_strided_slice %172 {offsets = [0, 0], sizes = [1, 32], strides = [1, 1]} : vector<1x96xf32> to vector<1x32xf32>
    %175 = arith.addf %173, %174 : vector<1x32xf32>
    %176 = arith.negf %175 : vector<1x32xf32>
    %177 = math.exp %176 : vector<1x32xf32>
    %cst_41 = arith.constant 1.000000e+00 : f32
    %178 = vector.broadcast %cst_41 : f32 to vector<1x32xf32>
    %179 = arith.addf %178, %177 : vector<1x32xf32>
    %180 = arith.divf %178, %179 : vector<1x32xf32>
    %181 = vector.extract_strided_slice %168 {offsets = [0, 32], sizes = [1, 32], strides = [1, 1]} : vector<1x96xf32> to vector<1x32xf32>
    %182 = vector.extract_strided_slice %172 {offsets = [0, 32], sizes = [1, 32], strides = [1, 1]} : vector<1x96xf32> to vector<1x32xf32>
    %183 = arith.addf %181, %182 : vector<1x32xf32>
    %184 = arith.negf %183 : vector<1x32xf32>
    %185 = math.exp %184 : vector<1x32xf32>
    %cst_42 = arith.constant 1.000000e+00 : f32
    %186 = vector.broadcast %cst_42 : f32 to vector<1x32xf32>
    %187 = arith.addf %186, %185 : vector<1x32xf32>
    %188 = arith.divf %186, %187 : vector<1x32xf32>
    %189 = vector.extract_strided_slice %168 {offsets = [0, 64], sizes = [1, 32], strides = [1, 1]} : vector<1x96xf32> to vector<1x32xf32>
    %190 = vector.extract_strided_slice %172 {offsets = [0, 64], sizes = [1, 32], strides = [1, 1]} : vector<1x96xf32> to vector<1x32xf32>
    %191 = arith.mulf %180, %190 : vector<1x32xf32>
    %192 = arith.addf %189, %191 : vector<1x32xf32>
    %193 = math.tanh %192 : vector<1x32xf32>
    %cst_43 = arith.constant 1.000000e+00 : f32
    %194 = vector.broadcast %cst_43 : f32 to vector<1x32xf32>
    %195 = arith.subf %194, %188 : vector<1x32xf32>
    %196 = arith.mulf %195, %193 : vector<1x32xf32>
    %197 = arith.mulf %188, %158 : vector<1x32xf32>
    %198 = arith.addf %196, %197 : vector<1x32xf32>
    %c4_i32 = arith.constant 4 : i32
    %199 = vector.broadcast %c4_i32 : i32 to vector<8x1xi32>
    %200 = arith.cmpi eq, %3, %199 : vector<8x1xi32>
    %201 = vector.shape_cast %200 : vector<8x1xi1> to vector<8x1xi1>
    %202 = vector.broadcast %201 : vector<8x1xi1> to vector<8x32xi1>
    %203 = vector.shape_cast %198 : vector<1x32xf32> to vector<1x32xf32>
    %204 = vector.broadcast %203 : vector<1x32xf32> to vector<8x32xf32>
    %205 = arith.select %202, %204, %165 : vector<8x32xi1>, vector<8x32xf32>
    %c5 = arith.constant 5 : index
    %206 = memref.load %arg0[%c5] : memref<8xi32, #tpu.memory_space<smem>>
    %207 = arith.index_cast %206 : i32 to index
    %c0_44 = arith.constant 0 : index
    %208 = vector.load %arg1[%207, %c0_44] : memref<97x96xf32, #tpu.memory_space<vmem>>, vector<1x96xf32>
    %c64_45 = arith.constant 64 : index
    %c0_46 = arith.constant 0 : index
    %209 = vector.load %arg1[%c64_45, %c0_46] : memref<97x96xf32, #tpu.memory_space<vmem>>, vector<32x96xf32>
    %cst_47 = arith.constant dense<0.000000e+00> : vector<1x96xf32>
    %210 = tpu.matmul %198, %209, %cst_47 {dimension_numbers = #tpu.dot_dimension_numbers<[1], [0], [0], [1], [0, 0, 1, 1], [], []>} : vector<1x32xf32>, vector<32x96xf32>, vector<1x96xf32> -> vector<1x96xf32>
    %c96_48 = arith.constant 96 : index
    %c0_49 = arith.constant 0 : index
    %211 = vector.load %arg1[%c96_48, %c0_49] : memref<97x96xf32, #tpu.memory_space<vmem>>, vector<1x96xf32>
    %212 = arith.addf %210, %211 : vector<1x96xf32>
    %213 = vector.extract_strided_slice %208 {offsets = [0, 0], sizes = [1, 32], strides = [1, 1]} : vector<1x96xf32> to vector<1x32xf32>
    %214 = vector.extract_strided_slice %212 {offsets = [0, 0], sizes = [1, 32], strides = [1, 1]} : vector<1x96xf32> to vector<1x32xf32>
    %215 = arith.addf %213, %214 : vector<1x32xf32>
    %216 = arith.negf %215 : vector<1x32xf32>
    %217 = math.exp %216 : vector<1x32xf32>
    %cst_50 = arith.constant 1.000000e+00 : f32
    %218 = vector.broadcast %cst_50 : f32 to vector<1x32xf32>
    %219 = arith.addf %218, %217 : vector<1x32xf32>
    %220 = arith.divf %218, %219 : vector<1x32xf32>
    %221 = vector.extract_strided_slice %208 {offsets = [0, 32], sizes = [1, 32], strides = [1, 1]} : vector<1x96xf32> to vector<1x32xf32>
    %222 = vector.extract_strided_slice %212 {offsets = [0, 32], sizes = [1, 32], strides = [1, 1]} : vector<1x96xf32> to vector<1x32xf32>
    %223 = arith.addf %221, %222 : vector<1x32xf32>
    %224 = arith.negf %223 : vector<1x32xf32>
    %225 = math.exp %224 : vector<1x32xf32>
    %cst_51 = arith.constant 1.000000e+00 : f32
    %226 = vector.broadcast %cst_51 : f32 to vector<1x32xf32>
    %227 = arith.addf %226, %225 : vector<1x32xf32>
    %228 = arith.divf %226, %227 : vector<1x32xf32>
    %229 = vector.extract_strided_slice %208 {offsets = [0, 64], sizes = [1, 32], strides = [1, 1]} : vector<1x96xf32> to vector<1x32xf32>
    %230 = vector.extract_strided_slice %212 {offsets = [0, 64], sizes = [1, 32], strides = [1, 1]} : vector<1x96xf32> to vector<1x32xf32>
    %231 = arith.mulf %220, %230 : vector<1x32xf32>
    %232 = arith.addf %229, %231 : vector<1x32xf32>
    %233 = math.tanh %232 : vector<1x32xf32>
    %cst_52 = arith.constant 1.000000e+00 : f32
    %234 = vector.broadcast %cst_52 : f32 to vector<1x32xf32>
    %235 = arith.subf %234, %228 : vector<1x32xf32>
    %236 = arith.mulf %235, %233 : vector<1x32xf32>
    %237 = arith.mulf %228, %198 : vector<1x32xf32>
    %238 = arith.addf %236, %237 : vector<1x32xf32>
    %c5_i32 = arith.constant 5 : i32
    %239 = vector.broadcast %c5_i32 : i32 to vector<8x1xi32>
    %240 = arith.cmpi eq, %3, %239 : vector<8x1xi32>
    %241 = vector.shape_cast %240 : vector<8x1xi1> to vector<8x1xi1>
    %242 = vector.broadcast %241 : vector<8x1xi1> to vector<8x32xi1>
    %243 = vector.shape_cast %238 : vector<1x32xf32> to vector<1x32xf32>
    %244 = vector.broadcast %243 : vector<1x32xf32> to vector<8x32xf32>
    %245 = arith.select %242, %244, %205 : vector<8x32xi1>, vector<8x32xf32>
    %c6 = arith.constant 6 : index
    %246 = memref.load %arg0[%c6] : memref<8xi32, #tpu.memory_space<smem>>
    %247 = arith.index_cast %246 : i32 to index
    %c0_53 = arith.constant 0 : index
    %248 = vector.load %arg1[%247, %c0_53] : memref<97x96xf32, #tpu.memory_space<vmem>>, vector<1x96xf32>
    %c64_54 = arith.constant 64 : index
    %c0_55 = arith.constant 0 : index
    %249 = vector.load %arg1[%c64_54, %c0_55] : memref<97x96xf32, #tpu.memory_space<vmem>>, vector<32x96xf32>
    %cst_56 = arith.constant dense<0.000000e+00> : vector<1x96xf32>
    %250 = tpu.matmul %238, %249, %cst_56 {dimension_numbers = #tpu.dot_dimension_numbers<[1], [0], [0], [1], [0, 0, 1, 1], [], []>} : vector<1x32xf32>, vector<32x96xf32>, vector<1x96xf32> -> vector<1x96xf32>
    %c96_57 = arith.constant 96 : index
    %c0_58 = arith.constant 0 : index
    %251 = vector.load %arg1[%c96_57, %c0_58] : memref<97x96xf32, #tpu.memory_space<vmem>>, vector<1x96xf32>
    %252 = arith.addf %250, %251 : vector<1x96xf32>
    %253 = vector.extract_strided_slice %248 {offsets = [0, 0], sizes = [1, 32], strides = [1, 1]} : vector<1x96xf32> to vector<1x32xf32>
    %254 = vector.extract_strided_slice %252 {offsets = [0, 0], sizes = [1, 32], strides = [1, 1]} : vector<1x96xf32> to vector<1x32xf32>
    %255 = arith.addf %253, %254 : vector<1x32xf32>
    %256 = arith.negf %255 : vector<1x32xf32>
    %257 = math.exp %256 : vector<1x32xf32>
    %cst_59 = arith.constant 1.000000e+00 : f32
    %258 = vector.broadcast %cst_59 : f32 to vector<1x32xf32>
    %259 = arith.addf %258, %257 : vector<1x32xf32>
    %260 = arith.divf %258, %259 : vector<1x32xf32>
    %261 = vector.extract_strided_slice %248 {offsets = [0, 32], sizes = [1, 32], strides = [1, 1]} : vector<1x96xf32> to vector<1x32xf32>
    %262 = vector.extract_strided_slice %252 {offsets = [0, 32], sizes = [1, 32], strides = [1, 1]} : vector<1x96xf32> to vector<1x32xf32>
    %263 = arith.addf %261, %262 : vector<1x32xf32>
    %264 = arith.negf %263 : vector<1x32xf32>
    %265 = math.exp %264 : vector<1x32xf32>
    %cst_60 = arith.constant 1.000000e+00 : f32
    %266 = vector.broadcast %cst_60 : f32 to vector<1x32xf32>
    %267 = arith.addf %266, %265 : vector<1x32xf32>
    %268 = arith.divf %266, %267 : vector<1x32xf32>
    %269 = vector.extract_strided_slice %248 {offsets = [0, 64], sizes = [1, 32], strides = [1, 1]} : vector<1x96xf32> to vector<1x32xf32>
    %270 = vector.extract_strided_slice %252 {offsets = [0, 64], sizes = [1, 32], strides = [1, 1]} : vector<1x96xf32> to vector<1x32xf32>
    %271 = arith.mulf %260, %270 : vector<1x32xf32>
    %272 = arith.addf %269, %271 : vector<1x32xf32>
    %273 = math.tanh %272 : vector<1x32xf32>
    %cst_61 = arith.constant 1.000000e+00 : f32
    %274 = vector.broadcast %cst_61 : f32 to vector<1x32xf32>
    %275 = arith.subf %274, %268 : vector<1x32xf32>
    %276 = arith.mulf %275, %273 : vector<1x32xf32>
    %277 = arith.mulf %268, %238 : vector<1x32xf32>
    %278 = arith.addf %276, %277 : vector<1x32xf32>
    %c6_i32 = arith.constant 6 : i32
    %279 = vector.broadcast %c6_i32 : i32 to vector<8x1xi32>
    %280 = arith.cmpi eq, %3, %279 : vector<8x1xi32>
    %281 = vector.shape_cast %280 : vector<8x1xi1> to vector<8x1xi1>
    %282 = vector.broadcast %281 : vector<8x1xi1> to vector<8x32xi1>
    %283 = vector.shape_cast %278 : vector<1x32xf32> to vector<1x32xf32>
    %284 = vector.broadcast %283 : vector<1x32xf32> to vector<8x32xf32>
    %285 = arith.select %282, %284, %245 : vector<8x32xi1>, vector<8x32xf32>
    %c7 = arith.constant 7 : index
    %286 = memref.load %arg0[%c7] : memref<8xi32, #tpu.memory_space<smem>>
    %287 = arith.index_cast %286 : i32 to index
    %c0_62 = arith.constant 0 : index
    %288 = vector.load %arg1[%287, %c0_62] : memref<97x96xf32, #tpu.memory_space<vmem>>, vector<1x96xf32>
    %c64_63 = arith.constant 64 : index
    %c0_64 = arith.constant 0 : index
    %289 = vector.load %arg1[%c64_63, %c0_64] : memref<97x96xf32, #tpu.memory_space<vmem>>, vector<32x96xf32>
    %cst_65 = arith.constant dense<0.000000e+00> : vector<1x96xf32>
    %290 = tpu.matmul %278, %289, %cst_65 {dimension_numbers = #tpu.dot_dimension_numbers<[1], [0], [0], [1], [0, 0, 1, 1], [], []>} : vector<1x32xf32>, vector<32x96xf32>, vector<1x96xf32> -> vector<1x96xf32>
    %c96_66 = arith.constant 96 : index
    %c0_67 = arith.constant 0 : index
    %291 = vector.load %arg1[%c96_66, %c0_67] : memref<97x96xf32, #tpu.memory_space<vmem>>, vector<1x96xf32>
    %292 = arith.addf %290, %291 : vector<1x96xf32>
    %293 = vector.extract_strided_slice %288 {offsets = [0, 0], sizes = [1, 32], strides = [1, 1]} : vector<1x96xf32> to vector<1x32xf32>
    %294 = vector.extract_strided_slice %292 {offsets = [0, 0], sizes = [1, 32], strides = [1, 1]} : vector<1x96xf32> to vector<1x32xf32>
    %295 = arith.addf %293, %294 : vector<1x32xf32>
    %296 = arith.negf %295 : vector<1x32xf32>
    %297 = math.exp %296 : vector<1x32xf32>
    %cst_68 = arith.constant 1.000000e+00 : f32
    %298 = vector.broadcast %cst_68 : f32 to vector<1x32xf32>
    %299 = arith.addf %298, %297 : vector<1x32xf32>
    %300 = arith.divf %298, %299 : vector<1x32xf32>
    %301 = vector.extract_strided_slice %288 {offsets = [0, 32], sizes = [1, 32], strides = [1, 1]} : vector<1x96xf32> to vector<1x32xf32>
    %302 = vector.extract_strided_slice %292 {offsets = [0, 32], sizes = [1, 32], strides = [1, 1]} : vector<1x96xf32> to vector<1x32xf32>
    %303 = arith.addf %301, %302 : vector<1x32xf32>
    %304 = arith.negf %303 : vector<1x32xf32>
    %305 = math.exp %304 : vector<1x32xf32>
    %cst_69 = arith.constant 1.000000e+00 : f32
    %306 = vector.broadcast %cst_69 : f32 to vector<1x32xf32>
    %307 = arith.addf %306, %305 : vector<1x32xf32>
    %308 = arith.divf %306, %307 : vector<1x32xf32>
    %309 = vector.extract_strided_slice %288 {offsets = [0, 64], sizes = [1, 32], strides = [1, 1]} : vector<1x96xf32> to vector<1x32xf32>
    %310 = vector.extract_strided_slice %292 {offsets = [0, 64], sizes = [1, 32], strides = [1, 1]} : vector<1x96xf32> to vector<1x32xf32>
    %311 = arith.mulf %300, %310 : vector<1x32xf32>
    %312 = arith.addf %309, %311 : vector<1x32xf32>
    %313 = math.tanh %312 : vector<1x32xf32>
    %cst_70 = arith.constant 1.000000e+00 : f32
    %314 = vector.broadcast %cst_70 : f32 to vector<1x32xf32>
    %315 = arith.subf %314, %308 : vector<1x32xf32>
    %316 = arith.mulf %315, %313 : vector<1x32xf32>
    %317 = arith.mulf %308, %278 : vector<1x32xf32>
    %318 = arith.addf %316, %317 : vector<1x32xf32>
    %c7_i32 = arith.constant 7 : i32
    %319 = vector.broadcast %c7_i32 : i32 to vector<8x1xi32>
    %320 = arith.cmpi eq, %3, %319 : vector<8x1xi32>
    %321 = vector.shape_cast %320 : vector<8x1xi1> to vector<8x1xi1>
    %322 = vector.broadcast %321 : vector<8x1xi1> to vector<8x32xi1>
    %323 = vector.shape_cast %318 : vector<1x32xf32> to vector<1x32xf32>
    %324 = vector.broadcast %323 : vector<1x32xf32> to vector<8x32xf32>
    %325 = arith.select %322, %324, %285 : vector<8x32xi1>, vector<8x32xf32>
    %326 = tpu.transpose %325, [1, 0] : vector<8x32xf32> -> vector<32x8xf32>
    %c1_i32_71 = arith.constant 1 : i32
    %327 = vector.broadcast %c1_i32_71 : i32 to vector<1x1xi32>
    %c0_i32_72 = arith.constant 0 : i32
    %328 = vector.broadcast %c0_i32_72 : i32 to vector<1x6xi32>
    %cst_73 = arith.constant 0.000000e+00 : f32
    %329 = vector.broadcast %cst_73 : f32 to vector<1x6xf32>
    %330 = vector.broadcast %327 : vector<1x1xi32> to vector<1x64xi32>
    %331 = arith.cmpi eq, %0, %330 : vector<1x64xi32>
    %332 = arith.extui %331 : vector<1x64xi1> to vector<1x64xi32>
    %333 = arith.sitofp %332 : vector<1x64xi32> to vector<1x64xf32>
    %334 = tpu.concatenate %318, %333 in 1 : vector<1x32xf32>, vector<1x64xf32> -> vector<1x96xf32>
    %c0_74 = arith.constant 0 : index
    %c0_75 = arith.constant 0 : index
    %335 = vector.load %arg2[%c0_74, %c0_75] : memref<97x128xf32, #tpu.memory_space<vmem>>, vector<96x128xf32>
    %cst_76 = arith.constant dense<0.000000e+00> : vector<1x128xf32>
    %336 = tpu.matmul %334, %335, %cst_76 {dimension_numbers = #tpu.dot_dimension_numbers<[1], [0], [0], [1], [0, 0, 1, 1], [], []>} : vector<1x96xf32>, vector<96x128xf32>, vector<1x128xf32> -> vector<1x128xf32>
    %c96_77 = arith.constant 96 : index
    %c0_78 = arith.constant 0 : index
    %337 = vector.load %arg2[%c96_77, %c0_78] : memref<97x128xf32, #tpu.memory_space<vmem>>, vector<1x128xf32>
    %338 = arith.addf %336, %337 : vector<1x128xf32>
    %339 = vector.extract_strided_slice %338 {offsets = [0, 0], sizes = [1, 32], strides = [1, 1]} : vector<1x128xf32> to vector<1x32xf32>
    %340 = arith.negf %339 : vector<1x32xf32>
    %341 = math.exp %340 : vector<1x32xf32>
    %cst_79 = arith.constant 1.000000e+00 : f32
    %342 = vector.broadcast %cst_79 : f32 to vector<1x32xf32>
    %343 = arith.addf %342, %341 : vector<1x32xf32>
    %344 = arith.divf %342, %343 : vector<1x32xf32>
    %345 = vector.extract_strided_slice %338 {offsets = [0, 32], sizes = [1, 32], strides = [1, 1]} : vector<1x128xf32> to vector<1x32xf32>
    %346 = arith.negf %345 : vector<1x32xf32>
    %347 = math.exp %346 : vector<1x32xf32>
    %cst_80 = arith.constant 1.000000e+00 : f32
    %348 = vector.broadcast %cst_80 : f32 to vector<1x32xf32>
    %349 = arith.addf %348, %347 : vector<1x32xf32>
    %350 = arith.divf %348, %349 : vector<1x32xf32>
    %351 = vector.extract_strided_slice %338 {offsets = [0, 64], sizes = [1, 32], strides = [1, 1]} : vector<1x128xf32> to vector<1x32xf32>
    %352 = vector.extract_strided_slice %338 {offsets = [0, 96], sizes = [1, 32], strides = [1, 1]} : vector<1x128xf32> to vector<1x32xf32>
    %353 = arith.mulf %344, %352 : vector<1x32xf32>
    %354 = arith.addf %351, %353 : vector<1x32xf32>
    %355 = math.tanh %354 : vector<1x32xf32>
    %cst_81 = arith.constant 1.000000e+00 : f32
    %356 = vector.broadcast %cst_81 : f32 to vector<1x32xf32>
    %357 = arith.subf %356, %350 : vector<1x32xf32>
    %358 = arith.mulf %357, %355 : vector<1x32xf32>
    %359 = arith.mulf %350, %318 : vector<1x32xf32>
    %360 = arith.addf %358, %359 : vector<1x32xf32>
    %c0_82 = arith.constant 0 : index
    %c0_83 = arith.constant 0 : index
    %361 = vector.load %arg3[%c0_82, %c0_83] : memref<65x32xf32, #tpu.memory_space<vmem>>, vector<32x32xf32>
    %cst_84 = arith.constant dense<0.000000e+00> : vector<1x32xf32>
    %362 = tpu.matmul %360, %361, %cst_84 {dimension_numbers = #tpu.dot_dimension_numbers<[1], [0], [0], [1], [0, 0, 1, 1], [], []>} : vector<1x32xf32>, vector<32x32xf32>, vector<1x32xf32> -> vector<1x32xf32>
    %c64_85 = arith.constant 64 : index
    %c0_86 = arith.constant 0 : index
    %363 = vector.load %arg3[%c64_85, %c0_86] : memref<65x32xf32, #tpu.memory_space<vmem>>, vector<1x32xf32>
    %364 = arith.addf %362, %363 : vector<1x32xf32>
    %cst_87 = arith.constant dense<0.000000e+00> : vector<1x8xf32>
    %365 = tpu.matmul %360, %326, %cst_87 {dimension_numbers = #tpu.dot_dimension_numbers<[1], [0], [0], [1], [0, 0, 1, 1], [], []>} : vector<1x32xf32>, vector<32x8xf32>, vector<1x8xf32> -> vector<1x8xf32>
    %cst_88 = arith.constant dense<0xFF800000> : vector<1xf32>
    %366 = vector.multi_reduction <maximumf>, %365, %cst_88 [1] : vector<1x8xf32> to vector<1xf32>
    %367 = vector.shape_cast %366 : vector<1xf32> to vector<1x1xf32>
    %368 = vector.broadcast %367 : vector<1x1xf32> to vector<1x8xf32>
    %369 = arith.subf %365, %368 : vector<1x8xf32>
    %370 = math.exp %369 : vector<1x8xf32>
    %cst_89 = arith.constant dense<0.000000e+00> : vector<1x32xf32>
    %371 = tpu.matmul %370, %325, %cst_89 {dimension_numbers = #tpu.dot_dimension_numbers<[1], [0], [0], [1], [0, 0, 1, 1], [], []>} : vector<1x8xf32>, vector<8x32xf32>, vector<1x32xf32> -> vector<1x32xf32>
    %cst_90 = arith.constant dense<0.000000e+00> : vector<1xf32>
    %372 = vector.multi_reduction <add>, %370, %cst_90 [1] : vector<1x8xf32> to vector<1xf32>
    %373 = vector.shape_cast %372 : vector<1xf32> to vector<1x1xf32>
    %374 = tpu.reciprocal %373 : vector<1x1xf32> -> vector<1x1xf32>
    %375 = vector.broadcast %374 : vector<1x1xf32> to vector<1x32xf32>
    %376 = arith.mulf %371, %375 : vector<1x32xf32>
    %c32 = arith.constant 32 : index
    %c0_91 = arith.constant 0 : index
    %377 = vector.load %arg3[%c32, %c0_91] : memref<65x32xf32, #tpu.memory_space<vmem>>, vector<32x32xf32>
    %cst_92 = arith.constant dense<0.000000e+00> : vector<1x32xf32>
    %378 = tpu.matmul %376, %377, %cst_92 {dimension_numbers = #tpu.dot_dimension_numbers<[1], [0], [0], [1], [0, 0, 1, 1], [], []>} : vector<1x32xf32>, vector<32x32xf32>, vector<1x32xf32> -> vector<1x32xf32>
    %379 = arith.addf %364, %378 : vector<1x32xf32>
    %380 = math.tanh %379 : vector<1x32xf32>
    %c0_93 = arith.constant 0 : index
    %c0_94 = arith.constant 0 : index
    %381 = vector.load %arg4[%c0_93, %c0_94] : memref<33x128xf32, #tpu.memory_space<vmem>>, vector<32x128xf32>
    %cst_95 = arith.constant dense<0.000000e+00> : vector<1x128xf32>
    %382 = tpu.matmul %380, %381, %cst_95 {dimension_numbers = #tpu.dot_dimension_numbers<[1], [0], [0], [1], [0, 0, 1, 1], [], []>} : vector<1x32xf32>, vector<32x128xf32>, vector<1x128xf32> -> vector<1x128xf32>
    %c32_96 = arith.constant 32 : index
    %c0_97 = arith.constant 0 : index
    %383 = vector.load %arg4[%c32_96, %c0_97] : memref<33x128xf32, #tpu.memory_space<vmem>>, vector<1x128xf32>
    %384 = arith.addf %382, %383 : vector<1x128xf32>
    %cst_98 = arith.constant dense<0xFF800000> : vector<1xf32>
    %385 = vector.multi_reduction <maximumf>, %384, %cst_98 [1] : vector<1x128xf32> to vector<1xf32>
    %386 = vector.shape_cast %385 : vector<1xf32> to vector<1x1xf32>
    %387 = vector.broadcast %386 : vector<1x1xf32> to vector<1x128xf32>
    %388 = arith.cmpf oeq, %384, %387 : vector<1x128xf32>
    %c128_i32 = arith.constant 128 : i32
    %389 = vector.broadcast %c128_i32 : i32 to vector<1x128xi32>
    %390 = arith.select %388, %1, %389 : vector<1x128xi1>, vector<1x128xi32>
    %cst_99 = arith.constant dense<2147483647> : vector<1xi32>
    %391 = vector.multi_reduction <minsi>, %390, %cst_99 [1] : vector<1x128xi32> to vector<1xi32>
    %392 = vector.shape_cast %391 : vector<1xi32> to vector<1x1xi32>
    %393 = vector.broadcast %386 : vector<1x1xf32> to vector<1x128xf32>
    %394 = arith.subf %384, %393 : vector<1x128xf32>
    %395 = math.exp %394 : vector<1x128xf32>
    %cst_100 = arith.constant dense<0.000000e+00> : vector<1xf32>
    %396 = vector.multi_reduction <add>, %395, %cst_100 [1] : vector<1x128xf32> to vector<1xf32>
    %397 = vector.shape_cast %396 : vector<1xf32> to vector<1x1xf32>
    %398 = tpu.reciprocal %397 {approx = true} : vector<1x1xf32> -> vector<1x1xf32>
    %c0_i32_101 = arith.constant 0 : i32
    %399 = vector.broadcast %c0_i32_101 : i32 to vector<1x6xi32>
    %400 = arith.cmpi eq, %2, %399 : vector<1x6xi32>
    %401 = vector.shape_cast %392 : vector<1x1xi32> to vector<1x1xi32>
    %402 = vector.broadcast %401 : vector<1x1xi32> to vector<1x6xi32>
    %403 = arith.select %400, %402, %328 : vector<1x6xi1>, vector<1x6xi32>
    %c0_i32_102 = arith.constant 0 : i32
    %404 = vector.broadcast %c0_i32_102 : i32 to vector<1x6xi32>
    %405 = arith.cmpi eq, %2, %404 : vector<1x6xi32>
    %406 = vector.shape_cast %398 : vector<1x1xf32> to vector<1x1xf32>
    %407 = vector.broadcast %406 : vector<1x1xf32> to vector<1x6xf32>
    %408 = arith.select %405, %407, %329 : vector<1x6xi1>, vector<1x6xf32>
    %409 = vector.broadcast %392 : vector<1x1xi32> to vector<1x64xi32>
    %410 = arith.cmpi eq, %0, %409 : vector<1x64xi32>
    %411 = arith.extui %410 : vector<1x64xi1> to vector<1x64xi32>
    %412 = arith.sitofp %411 : vector<1x64xi32> to vector<1x64xf32>
    %413 = tpu.concatenate %360, %412 in 1 : vector<1x32xf32>, vector<1x64xf32> -> vector<1x96xf32>
    %c0_103 = arith.constant 0 : index
    %c0_104 = arith.constant 0 : index
    %414 = vector.load %arg2[%c0_103, %c0_104] : memref<97x128xf32, #tpu.memory_space<vmem>>, vector<96x128xf32>
    %cst_105 = arith.constant dense<0.000000e+00> : vector<1x128xf32>
    %415 = tpu.matmul %413, %414, %cst_105 {dimension_numbers = #tpu.dot_dimension_numbers<[1], [0], [0], [1], [0, 0, 1, 1], [], []>} : vector<1x96xf32>, vector<96x128xf32>, vector<1x128xf32> -> vector<1x128xf32>
    %c96_106 = arith.constant 96 : index
    %c0_107 = arith.constant 0 : index
    %416 = vector.load %arg2[%c96_106, %c0_107] : memref<97x128xf32, #tpu.memory_space<vmem>>, vector<1x128xf32>
    %417 = arith.addf %415, %416 : vector<1x128xf32>
    %418 = vector.extract_strided_slice %417 {offsets = [0, 0], sizes = [1, 32], strides = [1, 1]} : vector<1x128xf32> to vector<1x32xf32>
    %419 = arith.negf %418 : vector<1x32xf32>
    %420 = math.exp %419 : vector<1x32xf32>
    %cst_108 = arith.constant 1.000000e+00 : f32
    %421 = vector.broadcast %cst_108 : f32 to vector<1x32xf32>
    %422 = arith.addf %421, %420 : vector<1x32xf32>
    %423 = arith.divf %421, %422 : vector<1x32xf32>
    %424 = vector.extract_strided_slice %417 {offsets = [0, 32], sizes = [1, 32], strides = [1, 1]} : vector<1x128xf32> to vector<1x32xf32>
    %425 = arith.negf %424 : vector<1x32xf32>
    %426 = math.exp %425 : vector<1x32xf32>
    %cst_109 = arith.constant 1.000000e+00 : f32
    %427 = vector.broadcast %cst_109 : f32 to vector<1x32xf32>
    %428 = arith.addf %427, %426 : vector<1x32xf32>
    %429 = arith.divf %427, %428 : vector<1x32xf32>
    %430 = vector.extract_strided_slice %417 {offsets = [0, 64], sizes = [1, 32], strides = [1, 1]} : vector<1x128xf32> to vector<1x32xf32>
    %431 = vector.extract_strided_slice %417 {offsets = [0, 96], sizes = [1, 32], strides = [1, 1]} : vector<1x128xf32> to vector<1x32xf32>
    %432 = arith.mulf %423, %431 : vector<1x32xf32>
    %433 = arith.addf %430, %432 : vector<1x32xf32>
    %434 = math.tanh %433 : vector<1x32xf32>
    %cst_110 = arith.constant 1.000000e+00 : f32
    %435 = vector.broadcast %cst_110 : f32 to vector<1x32xf32>
    %436 = arith.subf %435, %429 : vector<1x32xf32>
    %437 = arith.mulf %436, %434 : vector<1x32xf32>
    %438 = arith.mulf %429, %360 : vector<1x32xf32>
    %439 = arith.addf %437, %438 : vector<1x32xf32>
    %c0_111 = arith.constant 0 : index
    %c0_112 = arith.constant 0 : index
    %440 = vector.load %arg3[%c0_111, %c0_112] : memref<65x32xf32, #tpu.memory_space<vmem>>, vector<32x32xf32>
    %cst_113 = arith.constant dense<0.000000e+00> : vector<1x32xf32>
    %441 = tpu.matmul %439, %440, %cst_113 {dimension_numbers = #tpu.dot_dimension_numbers<[1], [0], [0], [1], [0, 0, 1, 1], [], []>} : vector<1x32xf32>, vector<32x32xf32>, vector<1x32xf32> -> vector<1x32xf32>
    %c64_114 = arith.constant 64 : index
    %c0_115 = arith.constant 0 : index
    %442 = vector.load %arg3[%c64_114, %c0_115] : memref<65x32xf32, #tpu.memory_space<vmem>>, vector<1x32xf32>
    %443 = arith.addf %441, %442 : vector<1x32xf32>
    %cst_116 = arith.constant dense<0.000000e+00> : vector<1x8xf32>
    %444 = tpu.matmul %439, %326, %cst_116 {dimension_numbers = #tpu.dot_dimension_numbers<[1], [0], [0], [1], [0, 0, 1, 1], [], []>} : vector<1x32xf32>, vector<32x8xf32>, vector<1x8xf32> -> vector<1x8xf32>
    %cst_117 = arith.constant dense<0xFF800000> : vector<1xf32>
    %445 = vector.multi_reduction <maximumf>, %444, %cst_117 [1] : vector<1x8xf32> to vector<1xf32>
    %446 = vector.shape_cast %445 : vector<1xf32> to vector<1x1xf32>
    %447 = vector.broadcast %446 : vector<1x1xf32> to vector<1x8xf32>
    %448 = arith.subf %444, %447 : vector<1x8xf32>
    %449 = math.exp %448 : vector<1x8xf32>
    %cst_118 = arith.constant dense<0.000000e+00> : vector<1x32xf32>
    %450 = tpu.matmul %449, %325, %cst_118 {dimension_numbers = #tpu.dot_dimension_numbers<[1], [0], [0], [1], [0, 0, 1, 1], [], []>} : vector<1x8xf32>, vector<8x32xf32>, vector<1x32xf32> -> vector<1x32xf32>
    %cst_119 = arith.constant dense<0.000000e+00> : vector<1xf32>
    %451 = vector.multi_reduction <add>, %449, %cst_119 [1] : vector<1x8xf32> to vector<1xf32>
    %452 = vector.shape_cast %451 : vector<1xf32> to vector<1x1xf32>
    %453 = tpu.reciprocal %452 : vector<1x1xf32> -> vector<1x1xf32>
    %454 = vector.broadcast %453 : vector<1x1xf32> to vector<1x32xf32>
    %455 = arith.mulf %450, %454 : vector<1x32xf32>
    %c32_120 = arith.constant 32 : index
    %c0_121 = arith.constant 0 : index
    %456 = vector.load %arg3[%c32_120, %c0_121] : memref<65x32xf32, #tpu.memory_space<vmem>>, vector<32x32xf32>
    %cst_122 = arith.constant dense<0.000000e+00> : vector<1x32xf32>
    %457 = tpu.matmul %455, %456, %cst_122 {dimension_numbers = #tpu.dot_dimension_numbers<[1], [0], [0], [1], [0, 0, 1, 1], [], []>} : vector<1x32xf32>, vector<32x32xf32>, vector<1x32xf32> -> vector<1x32xf32>
    %458 = arith.addf %443, %457 : vector<1x32xf32>
    %459 = math.tanh %458 : vector<1x32xf32>
    %c0_123 = arith.constant 0 : index
    %c0_124 = arith.constant 0 : index
    %460 = vector.load %arg4[%c0_123, %c0_124] : memref<33x128xf32, #tpu.memory_space<vmem>>, vector<32x128xf32>
    %cst_125 = arith.constant dense<0.000000e+00> : vector<1x128xf32>
    %461 = tpu.matmul %459, %460, %cst_125 {dimension_numbers = #tpu.dot_dimension_numbers<[1], [0], [0], [1], [0, 0, 1, 1], [], []>} : vector<1x32xf32>, vector<32x128xf32>, vector<1x128xf32> -> vector<1x128xf32>
    %c32_126 = arith.constant 32 : index
    %c0_127 = arith.constant 0 : index
    %462 = vector.load %arg4[%c32_126, %c0_127] : memref<33x128xf32, #tpu.memory_space<vmem>>, vector<1x128xf32>
    %463 = arith.addf %461, %462 : vector<1x128xf32>
    %cst_128 = arith.constant dense<0xFF800000> : vector<1xf32>
    %464 = vector.multi_reduction <maximumf>, %463, %cst_128 [1] : vector<1x128xf32> to vector<1xf32>
    %465 = vector.shape_cast %464 : vector<1xf32> to vector<1x1xf32>
    %466 = vector.broadcast %465 : vector<1x1xf32> to vector<1x128xf32>
    %467 = arith.cmpf oeq, %463, %466 : vector<1x128xf32>
    %c128_i32_129 = arith.constant 128 : i32
    %468 = vector.broadcast %c128_i32_129 : i32 to vector<1x128xi32>
    %469 = arith.select %467, %1, %468 : vector<1x128xi1>, vector<1x128xi32>
    %cst_130 = arith.constant dense<2147483647> : vector<1xi32>
    %470 = vector.multi_reduction <minsi>, %469, %cst_130 [1] : vector<1x128xi32> to vector<1xi32>
    %471 = vector.shape_cast %470 : vector<1xi32> to vector<1x1xi32>
    %472 = vector.broadcast %465 : vector<1x1xf32> to vector<1x128xf32>
    %473 = arith.subf %463, %472 : vector<1x128xf32>
    %474 = math.exp %473 : vector<1x128xf32>
    %cst_131 = arith.constant dense<0.000000e+00> : vector<1xf32>
    %475 = vector.multi_reduction <add>, %474, %cst_131 [1] : vector<1x128xf32> to vector<1xf32>
    %476 = vector.shape_cast %475 : vector<1xf32> to vector<1x1xf32>
    %477 = tpu.reciprocal %476 {approx = true} : vector<1x1xf32> -> vector<1x1xf32>
    %c1_i32_132 = arith.constant 1 : i32
    %478 = vector.broadcast %c1_i32_132 : i32 to vector<1x6xi32>
    %479 = arith.cmpi eq, %2, %478 : vector<1x6xi32>
    %480 = vector.shape_cast %471 : vector<1x1xi32> to vector<1x1xi32>
    %481 = vector.broadcast %480 : vector<1x1xi32> to vector<1x6xi32>
    %482 = arith.select %479, %481, %403 : vector<1x6xi1>, vector<1x6xi32>
    %c1_i32_133 = arith.constant 1 : i32
    %483 = vector.broadcast %c1_i32_133 : i32 to vector<1x6xi32>
    %484 = arith.cmpi eq, %2, %483 : vector<1x6xi32>
    %485 = vector.shape_cast %477 : vector<1x1xf32> to vector<1x1xf32>
    %486 = vector.broadcast %485 : vector<1x1xf32> to vector<1x6xf32>
    %487 = arith.select %484, %486, %408 : vector<1x6xi1>, vector<1x6xf32>
    %488 = vector.broadcast %471 : vector<1x1xi32> to vector<1x64xi32>
    %489 = arith.cmpi eq, %0, %488 : vector<1x64xi32>
    %490 = arith.extui %489 : vector<1x64xi1> to vector<1x64xi32>
    %491 = arith.sitofp %490 : vector<1x64xi32> to vector<1x64xf32>
    %492 = tpu.concatenate %439, %491 in 1 : vector<1x32xf32>, vector<1x64xf32> -> vector<1x96xf32>
    %c0_134 = arith.constant 0 : index
    %c0_135 = arith.constant 0 : index
    %493 = vector.load %arg2[%c0_134, %c0_135] : memref<97x128xf32, #tpu.memory_space<vmem>>, vector<96x128xf32>
    %cst_136 = arith.constant dense<0.000000e+00> : vector<1x128xf32>
    %494 = tpu.matmul %492, %493, %cst_136 {dimension_numbers = #tpu.dot_dimension_numbers<[1], [0], [0], [1], [0, 0, 1, 1], [], []>} : vector<1x96xf32>, vector<96x128xf32>, vector<1x128xf32> -> vector<1x128xf32>
    %c96_137 = arith.constant 96 : index
    %c0_138 = arith.constant 0 : index
    %495 = vector.load %arg2[%c96_137, %c0_138] : memref<97x128xf32, #tpu.memory_space<vmem>>, vector<1x128xf32>
    %496 = arith.addf %494, %495 : vector<1x128xf32>
    %497 = vector.extract_strided_slice %496 {offsets = [0, 0], sizes = [1, 32], strides = [1, 1]} : vector<1x128xf32> to vector<1x32xf32>
    %498 = arith.negf %497 : vector<1x32xf32>
    %499 = math.exp %498 : vector<1x32xf32>
    %cst_139 = arith.constant 1.000000e+00 : f32
    %500 = vector.broadcast %cst_139 : f32 to vector<1x32xf32>
    %501 = arith.addf %500, %499 : vector<1x32xf32>
    %502 = arith.divf %500, %501 : vector<1x32xf32>
    %503 = vector.extract_strided_slice %496 {offsets = [0, 32], sizes = [1, 32], strides = [1, 1]} : vector<1x128xf32> to vector<1x32xf32>
    %504 = arith.negf %503 : vector<1x32xf32>
    %505 = math.exp %504 : vector<1x32xf32>
    %cst_140 = arith.constant 1.000000e+00 : f32
    %506 = vector.broadcast %cst_140 : f32 to vector<1x32xf32>
    %507 = arith.addf %506, %505 : vector<1x32xf32>
    %508 = arith.divf %506, %507 : vector<1x32xf32>
    %509 = vector.extract_strided_slice %496 {offsets = [0, 64], sizes = [1, 32], strides = [1, 1]} : vector<1x128xf32> to vector<1x32xf32>
    %510 = vector.extract_strided_slice %496 {offsets = [0, 96], sizes = [1, 32], strides = [1, 1]} : vector<1x128xf32> to vector<1x32xf32>
    %511 = arith.mulf %502, %510 : vector<1x32xf32>
    %512 = arith.addf %509, %511 : vector<1x32xf32>
    %513 = math.tanh %512 : vector<1x32xf32>
    %cst_141 = arith.constant 1.000000e+00 : f32
    %514 = vector.broadcast %cst_141 : f32 to vector<1x32xf32>
    %515 = arith.subf %514, %508 : vector<1x32xf32>
    %516 = arith.mulf %515, %513 : vector<1x32xf32>
    %517 = arith.mulf %508, %439 : vector<1x32xf32>
    %518 = arith.addf %516, %517 : vector<1x32xf32>
    %c0_142 = arith.constant 0 : index
    %c0_143 = arith.constant 0 : index
    %519 = vector.load %arg3[%c0_142, %c0_143] : memref<65x32xf32, #tpu.memory_space<vmem>>, vector<32x32xf32>
    %cst_144 = arith.constant dense<0.000000e+00> : vector<1x32xf32>
    %520 = tpu.matmul %518, %519, %cst_144 {dimension_numbers = #tpu.dot_dimension_numbers<[1], [0], [0], [1], [0, 0, 1, 1], [], []>} : vector<1x32xf32>, vector<32x32xf32>, vector<1x32xf32> -> vector<1x32xf32>
    %c64_145 = arith.constant 64 : index
    %c0_146 = arith.constant 0 : index
    %521 = vector.load %arg3[%c64_145, %c0_146] : memref<65x32xf32, #tpu.memory_space<vmem>>, vector<1x32xf32>
    %522 = arith.addf %520, %521 : vector<1x32xf32>
    %cst_147 = arith.constant dense<0.000000e+00> : vector<1x8xf32>
    %523 = tpu.matmul %518, %326, %cst_147 {dimension_numbers = #tpu.dot_dimension_numbers<[1], [0], [0], [1], [0, 0, 1, 1], [], []>} : vector<1x32xf32>, vector<32x8xf32>, vector<1x8xf32> -> vector<1x8xf32>
    %cst_148 = arith.constant dense<0xFF800000> : vector<1xf32>
    %524 = vector.multi_reduction <maximumf>, %523, %cst_148 [1] : vector<1x8xf32> to vector<1xf32>
    %525 = vector.shape_cast %524 : vector<1xf32> to vector<1x1xf32>
    %526 = vector.broadcast %525 : vector<1x1xf32> to vector<1x8xf32>
    %527 = arith.subf %523, %526 : vector<1x8xf32>
    %528 = math.exp %527 : vector<1x8xf32>
    %cst_149 = arith.constant dense<0.000000e+00> : vector<1x32xf32>
    %529 = tpu.matmul %528, %325, %cst_149 {dimension_numbers = #tpu.dot_dimension_numbers<[1], [0], [0], [1], [0, 0, 1, 1], [], []>} : vector<1x8xf32>, vector<8x32xf32>, vector<1x32xf32> -> vector<1x32xf32>
    %cst_150 = arith.constant dense<0.000000e+00> : vector<1xf32>
    %530 = vector.multi_reduction <add>, %528, %cst_150 [1] : vector<1x8xf32> to vector<1xf32>
    %531 = vector.shape_cast %530 : vector<1xf32> to vector<1x1xf32>
    %532 = tpu.reciprocal %531 : vector<1x1xf32> -> vector<1x1xf32>
    %533 = vector.broadcast %532 : vector<1x1xf32> to vector<1x32xf32>
    %534 = arith.mulf %529, %533 : vector<1x32xf32>
    %c32_151 = arith.constant 32 : index
    %c0_152 = arith.constant 0 : index
    %535 = vector.load %arg3[%c32_151, %c0_152] : memref<65x32xf32, #tpu.memory_space<vmem>>, vector<32x32xf32>
    %cst_153 = arith.constant dense<0.000000e+00> : vector<1x32xf32>
    %536 = tpu.matmul %534, %535, %cst_153 {dimension_numbers = #tpu.dot_dimension_numbers<[1], [0], [0], [1], [0, 0, 1, 1], [], []>} : vector<1x32xf32>, vector<32x32xf32>, vector<1x32xf32> -> vector<1x32xf32>
    %537 = arith.addf %522, %536 : vector<1x32xf32>
    %538 = math.tanh %537 : vector<1x32xf32>
    %c0_154 = arith.constant 0 : index
    %c0_155 = arith.constant 0 : index
    %539 = vector.load %arg4[%c0_154, %c0_155] : memref<33x128xf32, #tpu.memory_space<vmem>>, vector<32x128xf32>
    %cst_156 = arith.constant dense<0.000000e+00> : vector<1x128xf32>
    %540 = tpu.matmul %538, %539, %cst_156 {dimension_numbers = #tpu.dot_dimension_numbers<[1], [0], [0], [1], [0, 0, 1, 1], [], []>} : vector<1x32xf32>, vector<32x128xf32>, vector<1x128xf32> -> vector<1x128xf32>
    %c32_157 = arith.constant 32 : index
    %c0_158 = arith.constant 0 : index
    %541 = vector.load %arg4[%c32_157, %c0_158] : memref<33x128xf32, #tpu.memory_space<vmem>>, vector<1x128xf32>
    %542 = arith.addf %540, %541 : vector<1x128xf32>
    %cst_159 = arith.constant dense<0xFF800000> : vector<1xf32>
    %543 = vector.multi_reduction <maximumf>, %542, %cst_159 [1] : vector<1x128xf32> to vector<1xf32>
    %544 = vector.shape_cast %543 : vector<1xf32> to vector<1x1xf32>
    %545 = vector.broadcast %544 : vector<1x1xf32> to vector<1x128xf32>
    %546 = arith.cmpf oeq, %542, %545 : vector<1x128xf32>
    %c128_i32_160 = arith.constant 128 : i32
    %547 = vector.broadcast %c128_i32_160 : i32 to vector<1x128xi32>
    %548 = arith.select %546, %1, %547 : vector<1x128xi1>, vector<1x128xi32>
    %cst_161 = arith.constant dense<2147483647> : vector<1xi32>
    %549 = vector.multi_reduction <minsi>, %548, %cst_161 [1] : vector<1x128xi32> to vector<1xi32>
    %550 = vector.shape_cast %549 : vector<1xi32> to vector<1x1xi32>
    %551 = vector.broadcast %544 : vector<1x1xf32> to vector<1x128xf32>
    %552 = arith.subf %542, %551 : vector<1x128xf32>
    %553 = math.exp %552 : vector<1x128xf32>
    %cst_162 = arith.constant dense<0.000000e+00> : vector<1xf32>
    %554 = vector.multi_reduction <add>, %553, %cst_162 [1] : vector<1x128xf32> to vector<1xf32>
    %555 = vector.shape_cast %554 : vector<1xf32> to vector<1x1xf32>
    %556 = tpu.reciprocal %555 {approx = true} : vector<1x1xf32> -> vector<1x1xf32>
    %c2_i32_163 = arith.constant 2 : i32
    %557 = vector.broadcast %c2_i32_163 : i32 to vector<1x6xi32>
    %558 = arith.cmpi eq, %2, %557 : vector<1x6xi32>
    %559 = vector.shape_cast %550 : vector<1x1xi32> to vector<1x1xi32>
    %560 = vector.broadcast %559 : vector<1x1xi32> to vector<1x6xi32>
    %561 = arith.select %558, %560, %482 : vector<1x6xi1>, vector<1x6xi32>
    %c2_i32_164 = arith.constant 2 : i32
    %562 = vector.broadcast %c2_i32_164 : i32 to vector<1x6xi32>
    %563 = arith.cmpi eq, %2, %562 : vector<1x6xi32>
    %564 = vector.shape_cast %556 : vector<1x1xf32> to vector<1x1xf32>
    %565 = vector.broadcast %564 : vector<1x1xf32> to vector<1x6xf32>
    %566 = arith.select %563, %565, %487 : vector<1x6xi1>, vector<1x6xf32>
    %567 = vector.broadcast %550 : vector<1x1xi32> to vector<1x64xi32>
    %568 = arith.cmpi eq, %0, %567 : vector<1x64xi32>
    %569 = arith.extui %568 : vector<1x64xi1> to vector<1x64xi32>
    %570 = arith.sitofp %569 : vector<1x64xi32> to vector<1x64xf32>
    %571 = tpu.concatenate %518, %570 in 1 : vector<1x32xf32>, vector<1x64xf32> -> vector<1x96xf32>
    %c0_165 = arith.constant 0 : index
    %c0_166 = arith.constant 0 : index
    %572 = vector.load %arg2[%c0_165, %c0_166] : memref<97x128xf32, #tpu.memory_space<vmem>>, vector<96x128xf32>
    %cst_167 = arith.constant dense<0.000000e+00> : vector<1x128xf32>
    %573 = tpu.matmul %571, %572, %cst_167 {dimension_numbers = #tpu.dot_dimension_numbers<[1], [0], [0], [1], [0, 0, 1, 1], [], []>} : vector<1x96xf32>, vector<96x128xf32>, vector<1x128xf32> -> vector<1x128xf32>
    %c96_168 = arith.constant 96 : index
    %c0_169 = arith.constant 0 : index
    %574 = vector.load %arg2[%c96_168, %c0_169] : memref<97x128xf32, #tpu.memory_space<vmem>>, vector<1x128xf32>
    %575 = arith.addf %573, %574 : vector<1x128xf32>
    %576 = vector.extract_strided_slice %575 {offsets = [0, 0], sizes = [1, 32], strides = [1, 1]} : vector<1x128xf32> to vector<1x32xf32>
    %577 = arith.negf %576 : vector<1x32xf32>
    %578 = math.exp %577 : vector<1x32xf32>
    %cst_170 = arith.constant 1.000000e+00 : f32
    %579 = vector.broadcast %cst_170 : f32 to vector<1x32xf32>
    %580 = arith.addf %579, %578 : vector<1x32xf32>
    %581 = arith.divf %579, %580 : vector<1x32xf32>
    %582 = vector.extract_strided_slice %575 {offsets = [0, 32], sizes = [1, 32], strides = [1, 1]} : vector<1x128xf32> to vector<1x32xf32>
    %583 = arith.negf %582 : vector<1x32xf32>
    %584 = math.exp %583 : vector<1x32xf32>
    %cst_171 = arith.constant 1.000000e+00 : f32
    %585 = vector.broadcast %cst_171 : f32 to vector<1x32xf32>
    %586 = arith.addf %585, %584 : vector<1x32xf32>
    %587 = arith.divf %585, %586 : vector<1x32xf32>
    %588 = vector.extract_strided_slice %575 {offsets = [0, 64], sizes = [1, 32], strides = [1, 1]} : vector<1x128xf32> to vector<1x32xf32>
    %589 = vector.extract_strided_slice %575 {offsets = [0, 96], sizes = [1, 32], strides = [1, 1]} : vector<1x128xf32> to vector<1x32xf32>
    %590 = arith.mulf %581, %589 : vector<1x32xf32>
    %591 = arith.addf %588, %590 : vector<1x32xf32>
    %592 = math.tanh %591 : vector<1x32xf32>
    %cst_172 = arith.constant 1.000000e+00 : f32
    %593 = vector.broadcast %cst_172 : f32 to vector<1x32xf32>
    %594 = arith.subf %593, %587 : vector<1x32xf32>
    %595 = arith.mulf %594, %592 : vector<1x32xf32>
    %596 = arith.mulf %587, %518 : vector<1x32xf32>
    %597 = arith.addf %595, %596 : vector<1x32xf32>
    %c0_173 = arith.constant 0 : index
    %c0_174 = arith.constant 0 : index
    %598 = vector.load %arg3[%c0_173, %c0_174] : memref<65x32xf32, #tpu.memory_space<vmem>>, vector<32x32xf32>
    %cst_175 = arith.constant dense<0.000000e+00> : vector<1x32xf32>
    %599 = tpu.matmul %597, %598, %cst_175 {dimension_numbers = #tpu.dot_dimension_numbers<[1], [0], [0], [1], [0, 0, 1, 1], [], []>} : vector<1x32xf32>, vector<32x32xf32>, vector<1x32xf32> -> vector<1x32xf32>
    %c64_176 = arith.constant 64 : index
    %c0_177 = arith.constant 0 : index
    %600 = vector.load %arg3[%c64_176, %c0_177] : memref<65x32xf32, #tpu.memory_space<vmem>>, vector<1x32xf32>
    %601 = arith.addf %599, %600 : vector<1x32xf32>
    %cst_178 = arith.constant dense<0.000000e+00> : vector<1x8xf32>
    %602 = tpu.matmul %597, %326, %cst_178 {dimension_numbers = #tpu.dot_dimension_numbers<[1], [0], [0], [1], [0, 0, 1, 1], [], []>} : vector<1x32xf32>, vector<32x8xf32>, vector<1x8xf32> -> vector<1x8xf32>
    %cst_179 = arith.constant dense<0xFF800000> : vector<1xf32>
    %603 = vector.multi_reduction <maximumf>, %602, %cst_179 [1] : vector<1x8xf32> to vector<1xf32>
    %604 = vector.shape_cast %603 : vector<1xf32> to vector<1x1xf32>
    %605 = vector.broadcast %604 : vector<1x1xf32> to vector<1x8xf32>
    %606 = arith.subf %602, %605 : vector<1x8xf32>
    %607 = math.exp %606 : vector<1x8xf32>
    %cst_180 = arith.constant dense<0.000000e+00> : vector<1x32xf32>
    %608 = tpu.matmul %607, %325, %cst_180 {dimension_numbers = #tpu.dot_dimension_numbers<[1], [0], [0], [1], [0, 0, 1, 1], [], []>} : vector<1x8xf32>, vector<8x32xf32>, vector<1x32xf32> -> vector<1x32xf32>
    %cst_181 = arith.constant dense<0.000000e+00> : vector<1xf32>
    %609 = vector.multi_reduction <add>, %607, %cst_181 [1] : vector<1x8xf32> to vector<1xf32>
    %610 = vector.shape_cast %609 : vector<1xf32> to vector<1x1xf32>
    %611 = tpu.reciprocal %610 : vector<1x1xf32> -> vector<1x1xf32>
    %612 = vector.broadcast %611 : vector<1x1xf32> to vector<1x32xf32>
    %613 = arith.mulf %608, %612 : vector<1x32xf32>
    %c32_182 = arith.constant 32 : index
    %c0_183 = arith.constant 0 : index
    %614 = vector.load %arg3[%c32_182, %c0_183] : memref<65x32xf32, #tpu.memory_space<vmem>>, vector<32x32xf32>
    %cst_184 = arith.constant dense<0.000000e+00> : vector<1x32xf32>
    %615 = tpu.matmul %613, %614, %cst_184 {dimension_numbers = #tpu.dot_dimension_numbers<[1], [0], [0], [1], [0, 0, 1, 1], [], []>} : vector<1x32xf32>, vector<32x32xf32>, vector<1x32xf32> -> vector<1x32xf32>
    %616 = arith.addf %601, %615 : vector<1x32xf32>
    %617 = math.tanh %616 : vector<1x32xf32>
    %c0_185 = arith.constant 0 : index
    %c0_186 = arith.constant 0 : index
    %618 = vector.load %arg4[%c0_185, %c0_186] : memref<33x128xf32, #tpu.memory_space<vmem>>, vector<32x128xf32>
    %cst_187 = arith.constant dense<0.000000e+00> : vector<1x128xf32>
    %619 = tpu.matmul %617, %618, %cst_187 {dimension_numbers = #tpu.dot_dimension_numbers<[1], [0], [0], [1], [0, 0, 1, 1], [], []>} : vector<1x32xf32>, vector<32x128xf32>, vector<1x128xf32> -> vector<1x128xf32>
    %c32_188 = arith.constant 32 : index
    %c0_189 = arith.constant 0 : index
    %620 = vector.load %arg4[%c32_188, %c0_189] : memref<33x128xf32, #tpu.memory_space<vmem>>, vector<1x128xf32>
    %621 = arith.addf %619, %620 : vector<1x128xf32>
    %cst_190 = arith.constant dense<0xFF800000> : vector<1xf32>
    %622 = vector.multi_reduction <maximumf>, %621, %cst_190 [1] : vector<1x128xf32> to vector<1xf32>
    %623 = vector.shape_cast %622 : vector<1xf32> to vector<1x1xf32>
    %624 = vector.broadcast %623 : vector<1x1xf32> to vector<1x128xf32>
    %625 = arith.cmpf oeq, %621, %624 : vector<1x128xf32>
    %c128_i32_191 = arith.constant 128 : i32
    %626 = vector.broadcast %c128_i32_191 : i32 to vector<1x128xi32>
    %627 = arith.select %625, %1, %626 : vector<1x128xi1>, vector<1x128xi32>
    %cst_192 = arith.constant dense<2147483647> : vector<1xi32>
    %628 = vector.multi_reduction <minsi>, %627, %cst_192 [1] : vector<1x128xi32> to vector<1xi32>
    %629 = vector.shape_cast %628 : vector<1xi32> to vector<1x1xi32>
    %630 = vector.broadcast %623 : vector<1x1xf32> to vector<1x128xf32>
    %631 = arith.subf %621, %630 : vector<1x128xf32>
    %632 = math.exp %631 : vector<1x128xf32>
    %cst_193 = arith.constant dense<0.000000e+00> : vector<1xf32>
    %633 = vector.multi_reduction <add>, %632, %cst_193 [1] : vector<1x128xf32> to vector<1xf32>
    %634 = vector.shape_cast %633 : vector<1xf32> to vector<1x1xf32>
    %635 = tpu.reciprocal %634 {approx = true} : vector<1x1xf32> -> vector<1x1xf32>
    %c3_i32_194 = arith.constant 3 : i32
    %636 = vector.broadcast %c3_i32_194 : i32 to vector<1x6xi32>
    %637 = arith.cmpi eq, %2, %636 : vector<1x6xi32>
    %638 = vector.shape_cast %629 : vector<1x1xi32> to vector<1x1xi32>
    %639 = vector.broadcast %638 : vector<1x1xi32> to vector<1x6xi32>
    %640 = arith.select %637, %639, %561 : vector<1x6xi1>, vector<1x6xi32>
    %c3_i32_195 = arith.constant 3 : i32
    %641 = vector.broadcast %c3_i32_195 : i32 to vector<1x6xi32>
    %642 = arith.cmpi eq, %2, %641 : vector<1x6xi32>
    %643 = vector.shape_cast %635 : vector<1x1xf32> to vector<1x1xf32>
    %644 = vector.broadcast %643 : vector<1x1xf32> to vector<1x6xf32>
    %645 = arith.select %642, %644, %566 : vector<1x6xi1>, vector<1x6xf32>
    %646 = vector.broadcast %629 : vector<1x1xi32> to vector<1x64xi32>
    %647 = arith.cmpi eq, %0, %646 : vector<1x64xi32>
    %648 = arith.extui %647 : vector<1x64xi1> to vector<1x64xi32>
    %649 = arith.sitofp %648 : vector<1x64xi32> to vector<1x64xf32>
    %650 = tpu.concatenate %597, %649 in 1 : vector<1x32xf32>, vector<1x64xf32> -> vector<1x96xf32>
    %c0_196 = arith.constant 0 : index
    %c0_197 = arith.constant 0 : index
    %651 = vector.load %arg2[%c0_196, %c0_197] : memref<97x128xf32, #tpu.memory_space<vmem>>, vector<96x128xf32>
    %cst_198 = arith.constant dense<0.000000e+00> : vector<1x128xf32>
    %652 = tpu.matmul %650, %651, %cst_198 {dimension_numbers = #tpu.dot_dimension_numbers<[1], [0], [0], [1], [0, 0, 1, 1], [], []>} : vector<1x96xf32>, vector<96x128xf32>, vector<1x128xf32> -> vector<1x128xf32>
    %c96_199 = arith.constant 96 : index
    %c0_200 = arith.constant 0 : index
    %653 = vector.load %arg2[%c96_199, %c0_200] : memref<97x128xf32, #tpu.memory_space<vmem>>, vector<1x128xf32>
    %654 = arith.addf %652, %653 : vector<1x128xf32>
    %655 = vector.extract_strided_slice %654 {offsets = [0, 0], sizes = [1, 32], strides = [1, 1]} : vector<1x128xf32> to vector<1x32xf32>
    %656 = arith.negf %655 : vector<1x32xf32>
    %657 = math.exp %656 : vector<1x32xf32>
    %cst_201 = arith.constant 1.000000e+00 : f32
    %658 = vector.broadcast %cst_201 : f32 to vector<1x32xf32>
    %659 = arith.addf %658, %657 : vector<1x32xf32>
    %660 = arith.divf %658, %659 : vector<1x32xf32>
    %661 = vector.extract_strided_slice %654 {offsets = [0, 32], sizes = [1, 32], strides = [1, 1]} : vector<1x128xf32> to vector<1x32xf32>
    %662 = arith.negf %661 : vector<1x32xf32>
    %663 = math.exp %662 : vector<1x32xf32>
    %cst_202 = arith.constant 1.000000e+00 : f32
    %664 = vector.broadcast %cst_202 : f32 to vector<1x32xf32>
    %665 = arith.addf %664, %663 : vector<1x32xf32>
    %666 = arith.divf %664, %665 : vector<1x32xf32>
    %667 = vector.extract_strided_slice %654 {offsets = [0, 64], sizes = [1, 32], strides = [1, 1]} : vector<1x128xf32> to vector<1x32xf32>
    %668 = vector.extract_strided_slice %654 {offsets = [0, 96], sizes = [1, 32], strides = [1, 1]} : vector<1x128xf32> to vector<1x32xf32>
    %669 = arith.mulf %660, %668 : vector<1x32xf32>
    %670 = arith.addf %667, %669 : vector<1x32xf32>
    %671 = math.tanh %670 : vector<1x32xf32>
    %cst_203 = arith.constant 1.000000e+00 : f32
    %672 = vector.broadcast %cst_203 : f32 to vector<1x32xf32>
    %673 = arith.subf %672, %666 : vector<1x32xf32>
    %674 = arith.mulf %673, %671 : vector<1x32xf32>
    %675 = arith.mulf %666, %597 : vector<1x32xf32>
    %676 = arith.addf %674, %675 : vector<1x32xf32>
    %c0_204 = arith.constant 0 : index
    %c0_205 = arith.constant 0 : index
    %677 = vector.load %arg3[%c0_204, %c0_205] : memref<65x32xf32, #tpu.memory_space<vmem>>, vector<32x32xf32>
    %cst_206 = arith.constant dense<0.000000e+00> : vector<1x32xf32>
    %678 = tpu.matmul %676, %677, %cst_206 {dimension_numbers = #tpu.dot_dimension_numbers<[1], [0], [0], [1], [0, 0, 1, 1], [], []>} : vector<1x32xf32>, vector<32x32xf32>, vector<1x32xf32> -> vector<1x32xf32>
    %c64_207 = arith.constant 64 : index
    %c0_208 = arith.constant 0 : index
    %679 = vector.load %arg3[%c64_207, %c0_208] : memref<65x32xf32, #tpu.memory_space<vmem>>, vector<1x32xf32>
    %680 = arith.addf %678, %679 : vector<1x32xf32>
    %cst_209 = arith.constant dense<0.000000e+00> : vector<1x8xf32>
    %681 = tpu.matmul %676, %326, %cst_209 {dimension_numbers = #tpu.dot_dimension_numbers<[1], [0], [0], [1], [0, 0, 1, 1], [], []>} : vector<1x32xf32>, vector<32x8xf32>, vector<1x8xf32> -> vector<1x8xf32>
    %cst_210 = arith.constant dense<0xFF800000> : vector<1xf32>
    %682 = vector.multi_reduction <maximumf>, %681, %cst_210 [1] : vector<1x8xf32> to vector<1xf32>
    %683 = vector.shape_cast %682 : vector<1xf32> to vector<1x1xf32>
    %684 = vector.broadcast %683 : vector<1x1xf32> to vector<1x8xf32>
    %685 = arith.subf %681, %684 : vector<1x8xf32>
    %686 = math.exp %685 : vector<1x8xf32>
    %cst_211 = arith.constant dense<0.000000e+00> : vector<1x32xf32>
    %687 = tpu.matmul %686, %325, %cst_211 {dimension_numbers = #tpu.dot_dimension_numbers<[1], [0], [0], [1], [0, 0, 1, 1], [], []>} : vector<1x8xf32>, vector<8x32xf32>, vector<1x32xf32> -> vector<1x32xf32>
    %cst_212 = arith.constant dense<0.000000e+00> : vector<1xf32>
    %688 = vector.multi_reduction <add>, %686, %cst_212 [1] : vector<1x8xf32> to vector<1xf32>
    %689 = vector.shape_cast %688 : vector<1xf32> to vector<1x1xf32>
    %690 = tpu.reciprocal %689 : vector<1x1xf32> -> vector<1x1xf32>
    %691 = vector.broadcast %690 : vector<1x1xf32> to vector<1x32xf32>
    %692 = arith.mulf %687, %691 : vector<1x32xf32>
    %c32_213 = arith.constant 32 : index
    %c0_214 = arith.constant 0 : index
    %693 = vector.load %arg3[%c32_213, %c0_214] : memref<65x32xf32, #tpu.memory_space<vmem>>, vector<32x32xf32>
    %cst_215 = arith.constant dense<0.000000e+00> : vector<1x32xf32>
    %694 = tpu.matmul %692, %693, %cst_215 {dimension_numbers = #tpu.dot_dimension_numbers<[1], [0], [0], [1], [0, 0, 1, 1], [], []>} : vector<1x32xf32>, vector<32x32xf32>, vector<1x32xf32> -> vector<1x32xf32>
    %695 = arith.addf %680, %694 : vector<1x32xf32>
    %696 = math.tanh %695 : vector<1x32xf32>
    %c0_216 = arith.constant 0 : index
    %c0_217 = arith.constant 0 : index
    %697 = vector.load %arg4[%c0_216, %c0_217] : memref<33x128xf32, #tpu.memory_space<vmem>>, vector<32x128xf32>
    %cst_218 = arith.constant dense<0.000000e+00> : vector<1x128xf32>
    %698 = tpu.matmul %696, %697, %cst_218 {dimension_numbers = #tpu.dot_dimension_numbers<[1], [0], [0], [1], [0, 0, 1, 1], [], []>} : vector<1x32xf32>, vector<32x128xf32>, vector<1x128xf32> -> vector<1x128xf32>
    %c32_219 = arith.constant 32 : index
    %c0_220 = arith.constant 0 : index
    %699 = vector.load %arg4[%c32_219, %c0_220] : memref<33x128xf32, #tpu.memory_space<vmem>>, vector<1x128xf32>
    %700 = arith.addf %698, %699 : vector<1x128xf32>
    %cst_221 = arith.constant dense<0xFF800000> : vector<1xf32>
    %701 = vector.multi_reduction <maximumf>, %700, %cst_221 [1] : vector<1x128xf32> to vector<1xf32>
    %702 = vector.shape_cast %701 : vector<1xf32> to vector<1x1xf32>
    %703 = vector.broadcast %702 : vector<1x1xf32> to vector<1x128xf32>
    %704 = arith.cmpf oeq, %700, %703 : vector<1x128xf32>
    %c128_i32_222 = arith.constant 128 : i32
    %705 = vector.broadcast %c128_i32_222 : i32 to vector<1x128xi32>
    %706 = arith.select %704, %1, %705 : vector<1x128xi1>, vector<1x128xi32>
    %cst_223 = arith.constant dense<2147483647> : vector<1xi32>
    %707 = vector.multi_reduction <minsi>, %706, %cst_223 [1] : vector<1x128xi32> to vector<1xi32>
    %708 = vector.shape_cast %707 : vector<1xi32> to vector<1x1xi32>
    %709 = vector.broadcast %702 : vector<1x1xf32> to vector<1x128xf32>
    %710 = arith.subf %700, %709 : vector<1x128xf32>
    %711 = math.exp %710 : vector<1x128xf32>
    %cst_224 = arith.constant dense<0.000000e+00> : vector<1xf32>
    %712 = vector.multi_reduction <add>, %711, %cst_224 [1] : vector<1x128xf32> to vector<1xf32>
    %713 = vector.shape_cast %712 : vector<1xf32> to vector<1x1xf32>
    %714 = tpu.reciprocal %713 {approx = true} : vector<1x1xf32> -> vector<1x1xf32>
    %c4_i32_225 = arith.constant 4 : i32
    %715 = vector.broadcast %c4_i32_225 : i32 to vector<1x6xi32>
    %716 = arith.cmpi eq, %2, %715 : vector<1x6xi32>
    %717 = vector.shape_cast %708 : vector<1x1xi32> to vector<1x1xi32>
    %718 = vector.broadcast %717 : vector<1x1xi32> to vector<1x6xi32>
    %719 = arith.select %716, %718, %640 : vector<1x6xi1>, vector<1x6xi32>
    %c4_i32_226 = arith.constant 4 : i32
    %720 = vector.broadcast %c4_i32_226 : i32 to vector<1x6xi32>
    %721 = arith.cmpi eq, %2, %720 : vector<1x6xi32>
    %722 = vector.shape_cast %714 : vector<1x1xf32> to vector<1x1xf32>
    %723 = vector.broadcast %722 : vector<1x1xf32> to vector<1x6xf32>
    %724 = arith.select %721, %723, %645 : vector<1x6xi1>, vector<1x6xf32>
    %725 = vector.broadcast %708 : vector<1x1xi32> to vector<1x64xi32>
    %726 = arith.cmpi eq, %0, %725 : vector<1x64xi32>
    %727 = arith.extui %726 : vector<1x64xi1> to vector<1x64xi32>
    %728 = arith.sitofp %727 : vector<1x64xi32> to vector<1x64xf32>
    %729 = tpu.concatenate %676, %728 in 1 : vector<1x32xf32>, vector<1x64xf32> -> vector<1x96xf32>
    %c0_227 = arith.constant 0 : index
    %c0_228 = arith.constant 0 : index
    %730 = vector.load %arg2[%c0_227, %c0_228] : memref<97x128xf32, #tpu.memory_space<vmem>>, vector<96x128xf32>
    %cst_229 = arith.constant dense<0.000000e+00> : vector<1x128xf32>
    %731 = tpu.matmul %729, %730, %cst_229 {dimension_numbers = #tpu.dot_dimension_numbers<[1], [0], [0], [1], [0, 0, 1, 1], [], []>} : vector<1x96xf32>, vector<96x128xf32>, vector<1x128xf32> -> vector<1x128xf32>
    %c96_230 = arith.constant 96 : index
    %c0_231 = arith.constant 0 : index
    %732 = vector.load %arg2[%c96_230, %c0_231] : memref<97x128xf32, #tpu.memory_space<vmem>>, vector<1x128xf32>
    %733 = arith.addf %731, %732 : vector<1x128xf32>
    %734 = vector.extract_strided_slice %733 {offsets = [0, 0], sizes = [1, 32], strides = [1, 1]} : vector<1x128xf32> to vector<1x32xf32>
    %735 = arith.negf %734 : vector<1x32xf32>
    %736 = math.exp %735 : vector<1x32xf32>
    %cst_232 = arith.constant 1.000000e+00 : f32
    %737 = vector.broadcast %cst_232 : f32 to vector<1x32xf32>
    %738 = arith.addf %737, %736 : vector<1x32xf32>
    %739 = arith.divf %737, %738 : vector<1x32xf32>
    %740 = vector.extract_strided_slice %733 {offsets = [0, 32], sizes = [1, 32], strides = [1, 1]} : vector<1x128xf32> to vector<1x32xf32>
    %741 = arith.negf %740 : vector<1x32xf32>
    %742 = math.exp %741 : vector<1x32xf32>
    %cst_233 = arith.constant 1.000000e+00 : f32
    %743 = vector.broadcast %cst_233 : f32 to vector<1x32xf32>
    %744 = arith.addf %743, %742 : vector<1x32xf32>
    %745 = arith.divf %743, %744 : vector<1x32xf32>
    %746 = vector.extract_strided_slice %733 {offsets = [0, 64], sizes = [1, 32], strides = [1, 1]} : vector<1x128xf32> to vector<1x32xf32>
    %747 = vector.extract_strided_slice %733 {offsets = [0, 96], sizes = [1, 32], strides = [1, 1]} : vector<1x128xf32> to vector<1x32xf32>
    %748 = arith.mulf %739, %747 : vector<1x32xf32>
    %749 = arith.addf %746, %748 : vector<1x32xf32>
    %750 = math.tanh %749 : vector<1x32xf32>
    %cst_234 = arith.constant 1.000000e+00 : f32
    %751 = vector.broadcast %cst_234 : f32 to vector<1x32xf32>
    %752 = arith.subf %751, %745 : vector<1x32xf32>
    %753 = arith.mulf %752, %750 : vector<1x32xf32>
    %754 = arith.mulf %745, %676 : vector<1x32xf32>
    %755 = arith.addf %753, %754 : vector<1x32xf32>
    %c0_235 = arith.constant 0 : index
    %c0_236 = arith.constant 0 : index
    %756 = vector.load %arg3[%c0_235, %c0_236] : memref<65x32xf32, #tpu.memory_space<vmem>>, vector<32x32xf32>
    %cst_237 = arith.constant dense<0.000000e+00> : vector<1x32xf32>
    %757 = tpu.matmul %755, %756, %cst_237 {dimension_numbers = #tpu.dot_dimension_numbers<[1], [0], [0], [1], [0, 0, 1, 1], [], []>} : vector<1x32xf32>, vector<32x32xf32>, vector<1x32xf32> -> vector<1x32xf32>
    %c64_238 = arith.constant 64 : index
    %c0_239 = arith.constant 0 : index
    %758 = vector.load %arg3[%c64_238, %c0_239] : memref<65x32xf32, #tpu.memory_space<vmem>>, vector<1x32xf32>
    %759 = arith.addf %757, %758 : vector<1x32xf32>
    %cst_240 = arith.constant dense<0.000000e+00> : vector<1x8xf32>
    %760 = tpu.matmul %755, %326, %cst_240 {dimension_numbers = #tpu.dot_dimension_numbers<[1], [0], [0], [1], [0, 0, 1, 1], [], []>} : vector<1x32xf32>, vector<32x8xf32>, vector<1x8xf32> -> vector<1x8xf32>
    %cst_241 = arith.constant dense<0xFF800000> : vector<1xf32>
    %761 = vector.multi_reduction <maximumf>, %760, %cst_241 [1] : vector<1x8xf32> to vector<1xf32>
    %762 = vector.shape_cast %761 : vector<1xf32> to vector<1x1xf32>
    %763 = vector.broadcast %762 : vector<1x1xf32> to vector<1x8xf32>
    %764 = arith.subf %760, %763 : vector<1x8xf32>
    %765 = math.exp %764 : vector<1x8xf32>
    %cst_242 = arith.constant dense<0.000000e+00> : vector<1x32xf32>
    %766 = tpu.matmul %765, %325, %cst_242 {dimension_numbers = #tpu.dot_dimension_numbers<[1], [0], [0], [1], [0, 0, 1, 1], [], []>} : vector<1x8xf32>, vector<8x32xf32>, vector<1x32xf32> -> vector<1x32xf32>
    %cst_243 = arith.constant dense<0.000000e+00> : vector<1xf32>
    %767 = vector.multi_reduction <add>, %765, %cst_243 [1] : vector<1x8xf32> to vector<1xf32>
    %768 = vector.shape_cast %767 : vector<1xf32> to vector<1x1xf32>
    %769 = tpu.reciprocal %768 : vector<1x1xf32> -> vector<1x1xf32>
    %770 = vector.broadcast %769 : vector<1x1xf32> to vector<1x32xf32>
    %771 = arith.mulf %766, %770 : vector<1x32xf32>
    %c32_244 = arith.constant 32 : index
    %c0_245 = arith.constant 0 : index
    %772 = vector.load %arg3[%c32_244, %c0_245] : memref<65x32xf32, #tpu.memory_space<vmem>>, vector<32x32xf32>
    %cst_246 = arith.constant dense<0.000000e+00> : vector<1x32xf32>
    %773 = tpu.matmul %771, %772, %cst_246 {dimension_numbers = #tpu.dot_dimension_numbers<[1], [0], [0], [1], [0, 0, 1, 1], [], []>} : vector<1x32xf32>, vector<32x32xf32>, vector<1x32xf32> -> vector<1x32xf32>
    %774 = arith.addf %759, %773 : vector<1x32xf32>
    %775 = math.tanh %774 : vector<1x32xf32>
    %c0_247 = arith.constant 0 : index
    %c0_248 = arith.constant 0 : index
    %776 = vector.load %arg4[%c0_247, %c0_248] : memref<33x128xf32, #tpu.memory_space<vmem>>, vector<32x128xf32>
    %cst_249 = arith.constant dense<0.000000e+00> : vector<1x128xf32>
    %777 = tpu.matmul %775, %776, %cst_249 {dimension_numbers = #tpu.dot_dimension_numbers<[1], [0], [0], [1], [0, 0, 1, 1], [], []>} : vector<1x32xf32>, vector<32x128xf32>, vector<1x128xf32> -> vector<1x128xf32>
    %c32_250 = arith.constant 32 : index
    %c0_251 = arith.constant 0 : index
    %778 = vector.load %arg4[%c32_250, %c0_251] : memref<33x128xf32, #tpu.memory_space<vmem>>, vector<1x128xf32>
    %779 = arith.addf %777, %778 : vector<1x128xf32>
    %cst_252 = arith.constant dense<0xFF800000> : vector<1xf32>
    %780 = vector.multi_reduction <maximumf>, %779, %cst_252 [1] : vector<1x128xf32> to vector<1xf32>
    %781 = vector.shape_cast %780 : vector<1xf32> to vector<1x1xf32>
    %782 = vector.broadcast %781 : vector<1x1xf32> to vector<1x128xf32>
    %783 = arith.cmpf oeq, %779, %782 : vector<1x128xf32>
    %c128_i32_253 = arith.constant 128 : i32
    %784 = vector.broadcast %c128_i32_253 : i32 to vector<1x128xi32>
    %785 = arith.select %783, %1, %784 : vector<1x128xi1>, vector<1x128xi32>
    %cst_254 = arith.constant dense<2147483647> : vector<1xi32>
    %786 = vector.multi_reduction <minsi>, %785, %cst_254 [1] : vector<1x128xi32> to vector<1xi32>
    %787 = vector.shape_cast %786 : vector<1xi32> to vector<1x1xi32>
    %788 = vector.broadcast %781 : vector<1x1xf32> to vector<1x128xf32>
    %789 = arith.subf %779, %788 : vector<1x128xf32>
    %790 = math.exp %789 : vector<1x128xf32>
    %cst_255 = arith.constant dense<0.000000e+00> : vector<1xf32>
    %791 = vector.multi_reduction <add>, %790, %cst_255 [1] : vector<1x128xf32> to vector<1xf32>
    %792 = vector.shape_cast %791 : vector<1xf32> to vector<1x1xf32>
    %793 = tpu.reciprocal %792 {approx = true} : vector<1x1xf32> -> vector<1x1xf32>
    %c5_i32_256 = arith.constant 5 : i32
    %794 = vector.broadcast %c5_i32_256 : i32 to vector<1x6xi32>
    %795 = arith.cmpi eq, %2, %794 : vector<1x6xi32>
    %796 = vector.shape_cast %787 : vector<1x1xi32> to vector<1x1xi32>
    %797 = vector.broadcast %796 : vector<1x1xi32> to vector<1x6xi32>
    %798 = arith.select %795, %797, %719 : vector<1x6xi1>, vector<1x6xi32>
    %c5_i32_257 = arith.constant 5 : i32
    %799 = vector.broadcast %c5_i32_257 : i32 to vector<1x6xi32>
    %800 = arith.cmpi eq, %2, %799 : vector<1x6xi32>
    %801 = vector.shape_cast %793 : vector<1x1xf32> to vector<1x1xf32>
    %802 = vector.broadcast %801 : vector<1x1xf32> to vector<1x6xf32>
    %803 = arith.select %800, %802, %724 : vector<1x6xi1>, vector<1x6xf32>
    %c0_258 = arith.constant 0 : index
    %c0_259 = arith.constant 0 : index
    %804 = vector.load %arg5[%c0_258, %c0_259] : memref<1x6xi32, #tpu.memory_space<vmem>>, vector<1x6xi32>
    tpu.vector_store %arg5[%c0_258, %c0_259], %798 {strides = array<i32>} : memref<1x6xi32, #tpu.memory_space<vmem>>, vector<1x6xi32>,
    %c0_260 = arith.constant 0 : index
    %c0_261 = arith.constant 0 : index
    %805 = vector.load %arg6[%c0_260, %c0_261] : memref<1x6xf32, #tpu.memory_space<vmem>>, vector<1x6xf32>
    tpu.vector_store %arg6[%c0_260, %c0_261], %803 {strides = array<i32>} : memref<1x6xf32, #tpu.memory_space<vmem>>, vector<1x6xf32>,
    return
  }
}

</mosaic_0001>

<bundles_post_ra>
// kernel: greedy_search.1
= control target key start
LH: loop header
LB: loop body
LE: loop exit
PB: predicated region body
PF: predicated region fallthrough
CT: control target
= control target key end

     0   :  { %12 = vsyncpa [#allocation4], 0  ;;  %s6364_s0 = inlined_call_operand.vmem [shape: s32[8], index: 0, kind: input, shape index: {}]   ;;  %s6365_s1 = inlined_call_operand.vmem [shape: f32[97,96], index: 1, kind: input, shape index: {}]   ;;  %s6366_s2 = inlined_call_operand.vmem [shape: f32[97,128], index: 2, kind: input, shape index: {}]   ;;  %s6367_s3 = inlined_call_operand.vmem [shape: f32[65,32], index: 3, kind: input, shape index: {}]   ;;  %s6368_s4 = inlined_call_operand.vmem [shape: f32[33,128], index: 4, kind: input, shape index: {}]   ;;  %s6369_s5 = inlined_call_operand.hbm [shape: s32[1,6], index: 5, kind: output, shape index: {0}]   ;;  %s6370_s6 = inlined_call_operand.hbm [shape: f32[1,6], index: 6, kind: output, shape index: {1}]  }
   0x1   :  { %13 = vsyncpa [#allocation3], 0 }
   0x2   :  { %14 = vsyncpa [#allocation7], 0  ;;  %s21_s23 = sshll.u32 %s6364_s0, 4  ;;  %s22_s23 = int_to_ptr.vmem [resolvable:$true] %s21_s23 }
   0x3   :  { %s5099_s24 = scalar_lea.vmem %s22_s23, 16  ;;  %p5104_p1 = scmp.lt.s32.totalorder %s22_s23, %s22_s23 }
   0x4   :  { %p5100_p0 = scmp.ne.s32.totalorder %s22_s23, %s5099_s24  ;;  %p5105_p2 = scmp.lt.s32.totalorder %s5099_s24, %s5099_s24 }
   0x6   :  { %p5106_p3 = por %p5105_p2, %p5104_p1 }
   0x8   :  { %p5107_p4 = pnand %p5106_p3, %p5100_p0 }
   0xa   :  { %5110 = shalt.err (!%p5107_p4)
}
   0xb   :  { %s5157_s25 = smov [#allocation2]  }
   0xc   :  { %24 = dma.vmem_to_smem %s22_s23, 16, %s5157_s25, [#allocation4]  }
   0xd   :  { %5151 = dma.done.wait [#allocation4], 16  }
   0xe   :  { %5152 = vsyncadd [#allocation4], 4294967280 }
   0xf   :  { %36 = sfence }
  0x10   :  { %v5206_v0 = vld [vmem:[%s6365_s1 + $0x58] sm:$0xff]  ;;  %v5158_v1 = vmov 0.0   ;;  %v5212_v2 = vld [vmem:[%s6365_s1 + $0x50] sm:$0xff]  ;;  %vm5159_vm0 = vmmov 0   ;;  %v5222_v3 = vld [vmem:[%s6365_s1 + $0x48] sm:$0xff]  ;;  %s5160_s11 = smov 64  }
  0x11   :  { %4412 = vmatprep.subr.mxu0 %v5158_v1  ;;  %4420 = vmatprep.mubr.msk.f32.mxu0 %vm5159_vm0, %v5158_v1  ;;  %v5231_v4 = vld [vmem:[%s6365_s1 + $0x40] sm:$0xff]  ;;  %s41_s12 = sld [smem:[#allocation2]]  ;;  %s5161_s16 = smov 96   ;;  %vm49_vm1 = vcmask 261120   ;;  %vm966_vm3 = vcmask 785408   ;;  %vm1220_vm12 = vcmask 57344  }
  0x12   :  { %4413 = vmatpush3.msra.mxu0 %v5206_v0  ;;  %4423 = vmatprep.subr.mxu1 %v5158_v1  ;;  %v5259_v5 = vld [vmem:[%s6365_s1 + $0x60] sm:$0x1]  ;;  %s4105_s17 = sld [smem:[#allocation2 + $0x1]]  ;;  %vm1228_vm13 = vcmask 64512   ;;  %vm1464_vm14 = vcmask 1040384  }
  0x13   :  { %4414 = vmatprep.subr.mxu0 %v5158_v1  ;;  %4424 = vmatpush3.msra.mxu1 %v5206_v0  ;;  %s4108_s21 = sld [smem:[#allocation2 + $0x2]] }
  0x14   :  { %4415 = vmatpush3.msra.mxu0 %v5212_v2  ;;  %4425 = vmatprep.subr.mxu1 %v5158_v1  ;;  %s4111_s25 = sld [smem:[#allocation2 + $0x3]] }
  0x15   :  { %4416 = vmatprep.subr.mxu0 %v5158_v1  ;;  %4426 = vmatpush3.msra.mxu1 %v5212_v2  ;;  %s4114_s28 = sld [smem:[#allocation2 + $0x4]] }
  0x16   :  { %4417 = vmatpush3.msra.mxu0 %v5222_v3  ;;  %4427 = vmatprep.subr.mxu1 %v5158_v1  ;;  %s4117_s8 = sld [smem:[#allocation2 + $0x5]] }
  0x17   :  { %4418 = vmatprep.subr.mxu0 %v5158_v1  ;;  %4428 = vmatpush3.msra.mxu1 %v5222_v3  ;;  %s42_s15 = scalar_lea.vmem %s6365_s1, %s41_s12  ;;  %s4120_s13 = sld [smem:[#allocation2 + $0x6]] }
  0x18   :  { %4419 = vmatpush3.msra.mxu0 %v5231_v4  ;;  %4429 = vmatprep.subr.mxu1 %v5158_v1  ;;  %v43_v9 = vld [vmem:[%s42_s15] sm:$0x1]  ;;  %s158_s20 = scalar_lea.vmem %s6365_s1, %s4105_s17  ;;  %s4123_s18 = sld [smem:[#allocation2 + $0x7]] }
  0x19   :  { %4421 = vmatmul.mubr.f32.vlgmr.msra.gmra.mxu0 %v5158_v1  ;;  %4430 = vmatpush3.msra.mxu1 %v5231_v4  ;;  %v159_v29 = vld [vmem:[%s158_s20] sm:$0x1]  ;;  %s270_s24 = scalar_lea.vmem %s6365_s1, %s4108_s21 }
  0x1a   :  { %4431 = vmatprep.mubr.msk.f32.mxu1 %vm5159_vm0, %v5158_v1  ;;  %4434 = vmatprep.subr.mxu0 %v5158_v1  ;;  %v271_v49 = vld [vmem:[%s270_s24] sm:$0x1]  ;;  %s382_s0 = scalar_lea.vmem %s6365_s1, %s4111_s25 }
  0x1b   :  { %4435 = vmatpush3.msra.mxu0 %v5206_v0  ;;  %4442 = vmatprep.mubr.msk.f32.mxu0 %vm5159_vm0, %v5158_v1  ;;  %s494_s7 = scalar_lea.vmem %s6365_s1, %s4114_s28 }
  0x1c   :  { %4436 = vmatprep.subr.mxu0 %v5158_v1  ;;  %4445 = vmatprep.subr.mxu1 %v5158_v1  ;;  %s606_s12 = scalar_lea.vmem %s6365_s1, %s4117_s8 }
  0x1d   :  { %4437 = vmatpush3.msra.mxu0 %v5212_v2  ;;  %s718_s17 = scalar_lea.vmem %s6365_s1, %s4120_s13  ;;  %s5162_s13 = smov 32  }
  0x1e   :  { %4438 = vmatprep.subr.mxu0 %v5158_v1  ;;  %s830_s21 = scalar_lea.vmem %s6365_s1, %s4123_s18 }
  0x1f   :  { %4439 = vmatpush3.msra.mxu0 %v5222_v3 }
  0x20   :  { %4440 = vmatprep.subr.mxu0 %v5158_v1 }
  0x21   :  { %4441 = vmatpush3.msra.mxu0 %v5231_v4 }
  0x22   :  { %4456 = vmatprep.subr.mxu0 %v5158_v1 }
  0xd9   :  { %v119_v6 = vpop.f32.mrf.mxu0 }
  0xda   :  { %v120_v7 = vadd.f32 %v119_v6, %v5259_v5 }
  0xdb   :  { %v4422_v8 = vpop.f32.mrf.mxu0 }
  0xdc   :  { %131 = vrot.lane.b32.xlu0 %v120_v7, %s5160_s11  ;;  %v123_v10 = vadd.f32 %v120_v7, %v43_v9 }
  0xde   :  { %v4104_v11 = vmul.f32 -1.442695, %v123_v10 }
  0xe0   :  { %4928 = vpow2.f32 %v4104_v11  ;;  %v383_v11 = vld [vmem:[%s382_s0] sm:$0x1] }
  0xed   :  { %v4929_v12 = vpop.eup %4928 }
  0xee   :  { %v127_v13 = vadd.f32 1.0, %v4929_v12 }
  0xf0   :  { %4930 = vrcp.f32 %v127_v13 }
  0xfd   :  { %v4931_v14 = vpop.eup %4930 }
  0xfe   :  { %v141_v20 = vsub.f32 1.0, %v4931_v14  ;;  %v147_v22 = vmul.f32 0.0, %v4931_v14 }
 0x14e   :  { %v132_v15 = vpop.permute.xlu0 %131 }
 0x14f   :  { %v134_v16 = vmul.f32 %v4931_v14, %v132_v15 }
 0x151   :  { %136 = vrot.lane.b32.xlu0 %v134_v16, %s5160_s11 }
 0x1c3   :  { %v137_v17 = vpop.permute.xlu0 %136 }
 0x1c4   :  { %v139_v18 = vadd.f32 %v137_v17, %v43_v9 }
 0x1c6   :  { %4932 = vtanh.f32 %v139_v18 }
 0x1d3   :  { %v4933_v19 = vpop.eup %4932 }
 0x1d4   :  { %143 = vrot.lane.b32.xlu1 %v4933_v19, %s5161_s16 }
 0x246   :  { %v144_v21 = vpop.permute.xlu1 %143 }
 0x247   :  { %v146_v23 = vmul.f32 %v144_v21, %v141_v20 }
 0x249   :  { %v5268_v24 = vadd.f32 %v147_v22, %v146_v23 }
 0x24b   :  { %161 = vrot.lane.b32.xlu1 %v5268_v24, %s5161_s16 }
 0x2bd   :  { %v162_v25 = vpop.permute.xlu1 %161 }
 0x2be   :  { %4432 = vmatmul.mubr.msk.f32.vlgmr.msra.gmra.mxu1 %vm49_vm1, %v162_v25 }
 0x2bf   :  { %4446 = vmatpush3.msra.mxu1 %v5206_v0  ;;  %4453 = vmatprep.mubr.msk.f32.mxu1 %vm5159_vm0, %v5158_v1 }
 0x2c0   :  { %4447 = vmatprep.subr.mxu1 %v5158_v1 }
 0x2c1   :  { %4448 = vmatpush3.msra.mxu1 %v5212_v2 }
 0x2c2   :  { %4449 = vmatprep.subr.mxu1 %v5158_v1 }
 0x2c3   :  { %4450 = vmatpush3.msra.mxu1 %v5222_v3 }
 0x2c4   :  { %4451 = vmatprep.subr.mxu1 %v5158_v1 }
 0x2c5   :  { %4452 = vmatpush3.msra.mxu1 %v5231_v4 }
 0x2c6   :  { %4467 = vmatprep.subr.mxu1 %v5158_v1 }
 0x37e   :  { %v231_v26 = vpop.f32.mrf.mxu1 }
 0x37f   :  { %v232_v27 = vadd.f32 %v231_v26, %v5259_v5 }
 0x380   :  { %v4433_v28 = vpop.f32.mrf.mxu1 }
 0x381   :  { %243 = vrot.lane.b32.xlu0 %v232_v27, %s5160_s11  ;;  %v235_v30 = vadd.f32 %v232_v27, %v159_v29 }
 0x383   :  { %v4107_v31 = vmul.f32 -1.442695, %v235_v30 }
 0x385   :  { %4934 = vpow2.f32 %v4107_v31 }
 0x392   :  { %v4935_v32 = vpop.eup %4934 }
 0x393   :  { %v239_v33 = vadd.f32 1.0, %v4935_v32  ;;  %v495_v32 = vld [vmem:[%s494_s7] sm:$0x1] }
 0x395   :  { %4936 = vrcp.f32 %v239_v33 }
 0x3a2   :  { %v4937_v34 = vpop.eup %4936 }
 0x3a3   :  { %v253_v40 = vsub.f32 1.0, %v4937_v34  ;;  %v259_v42 = vmul.f32 %v4937_v34, %v5268_v24 }
 0x3f3   :  { %v244_v35 = vpop.permute.xlu0 %243 }
 0x3f4   :  { %v246_v36 = vmul.f32 %v4937_v34, %v244_v35 }
 0x3f6   :  { %248 = vrot.lane.b32.xlu1 %v246_v36, %s5160_s11 }
 0x468   :  { %v249_v37 = vpop.permute.xlu1 %248 }
 0x469   :  { %v251_v38 = vadd.f32 %v249_v37, %v159_v29 }
 0x46b   :  { %4938 = vtanh.f32 %v251_v38 }
 0x478   :  { %v4939_v39 = vpop.eup %4938 }
 0x479   :  { %255 = vrot.lane.b32.xlu0 %v4939_v39, %s5161_s16 }
 0x4eb   :  { %v256_v41 = vpop.permute.xlu0 %255 }
 0x4ec   :  { %v258_v43 = vmul.f32 %v256_v41, %v253_v40 }
 0x4ee   :  { %v5291_v44 = vadd.f32 %v259_v42, %v258_v43 }
 0x4f0   :  { %273 = vrot.lane.b32.xlu1 %v5291_v44, %s5161_s16 }
 0x562   :  { %v274_v45 = vpop.permute.xlu1 %273 }
 0x563   :  { %4443 = vmatmul.mubr.msk.f32.vlgmr.msra.gmra.mxu0 %vm49_vm1, %v274_v45 }
 0x564   :  { %4457 = vmatpush3.msra.mxu0 %v5206_v0  ;;  %4464 = vmatprep.mubr.msk.f32.mxu0 %vm5159_vm0, %v5158_v1 }
 0x565   :  { %4458 = vmatprep.subr.mxu0 %v5158_v1 }
 0x566   :  { %4459 = vmatpush3.msra.mxu0 %v5212_v2 }
 0x567   :  { %4460 = vmatprep.subr.mxu0 %v5158_v1 }
 0x568   :  { %4461 = vmatpush3.msra.mxu0 %v5222_v3 }
 0x569   :  { %4462 = vmatprep.subr.mxu0 %v5158_v1 }
 0x56a   :  { %4463 = vmatpush3.msra.mxu0 %v5231_v4 }
 0x56b   :  { %4478 = vmatprep.subr.mxu0 %v5158_v1 }
 0x623   :  { %v343_v46 = vpop.f32.mrf.mxu0 }
 0x624   :  { %v344_v47 = vadd.f32 %v343_v46, %v5259_v5 }
 0x625   :  { %v4444_v48 = vpop.f32.mrf.mxu0 }
 0x626   :  { %355 = vrot.lane.b32.xlu0 %v344_v47, %s5160_s11  ;;  %v347_v50 = vadd.f32 %v344_v47, %v271_v49 }
 0x628   :  { %v4110_v51 = vmul.f32 -1.442695, %v347_v50 }
 0x62a   :  { %4940 = vpow2.f32 %v4110_v51 }
 0x637   :  { %v4941_v52 = vpop.eup %4940 }
 0x638   :  { %v351_v53 = vadd.f32 1.0, %v4941_v52 }
 0x63a   :  { %4942 = vrcp.f32 %v351_v53 }
 0x647   :  { %v4943_v54 = vpop.eup %4942 }
 0x648   :  { %v365_v60 = vsub.f32 1.0, %v4943_v54  ;;  %v371_v62 = vmul.f32 %v4943_v54, %v5291_v44 }
 0x698   :  { %v356_v55 = vpop.permute.xlu0 %355 }
 0x699   :  { %v358_v56 = vmul.f32 %v4943_v54, %v356_v55 }
 0x69b   :  { %360 = vrot.lane.b32.xlu1 %v358_v56, %s5160_s11 }
 0x70d   :  { %v361_v57 = vpop.permute.xlu1 %360 }
 0x70e   :  { %v363_v58 = vadd.f32 %v361_v57, %v271_v49 }
 0x710   :  { %4944 = vtanh.f32 %v363_v58 }
 0x71d   :  { %v4945_v59 = vpop.eup %4944 }
 0x71e   :  { %367 = vrot.lane.b32.xlu0 %v4945_v59, %s5161_s16 }
 0x790   :  { %v368_v61 = vpop.permute.xlu0 %367 }
 0x791   :  { %v370_v63 = vmul.f32 %v368_v61, %v365_v60 }
 0x793   :  { %v5314_v6 = vadd.f32 %v371_v62, %v370_v63 }
 0x795   :  { %385 = vrot.lane.b32.xlu1 %v5314_v6, %s5161_s16 }
 0x807   :  { %v386_v7 = vpop.permute.xlu1 %385 }
 0x808   :  { %4454 = vmatmul.mubr.msk.f32.vlgmr.msra.gmra.mxu1 %vm49_vm1, %v386_v7 }
 0x809   :  { %4468 = vmatpush3.msra.mxu1 %v5206_v0  ;;  %4475 = vmatprep.mubr.msk.f32.mxu1 %vm5159_vm0, %v5158_v1 }
 0x80a   :  { %4469 = vmatprep.subr.mxu1 %v5158_v1 }
 0x80b   :  { %4470 = vmatpush3.msra.mxu1 %v5212_v2 }
 0x80c   :  { %4471 = vmatprep.subr.mxu1 %v5158_v1 }
 0x80d   :  { %4472 = vmatpush3.msra.mxu1 %v5222_v3 }
 0x80e   :  { %4473 = vmatprep.subr.mxu1 %v5158_v1 }
 0x80f   :  { %4474 = vmatpush3.msra.mxu1 %v5231_v4 }
 0x810   :  { %4489 = vmatprep.subr.mxu1 %v5158_v1 }
 0x8c8   :  { %v455_v8 = vpop.f32.mrf.mxu1 }
 0x8c9   :  { %v456_v9 = vadd.f32 %v455_v8, %v5259_v5 }
 0x8ca   :  { %v4455_v10 = vpop.f32.mrf.mxu1 }
 0x8cb   :  { %467 = vrot.lane.b32.xlu0 %v456_v9, %s5160_s11  ;;  %v459_v12 = vadd.f32 %v456_v9, %v383_v11 }
 0x8cd   :  { %v4113_v13 = vmul.f32 -1.442695, %v459_v12  ;;  %v719_v12 = vld [vmem:[%s718_s17] sm:$0x1] }
 0x8cf   :  { %4946 = vpow2.f32 %v4113_v13 }
 0x8dc   :  { %v4947_v14 = vpop.eup %4946 }
 0x8dd   :  { %v463_v15 = vadd.f32 1.0, %v4947_v14 }
 0x8df   :  { %4948 = vrcp.f32 %v463_v15 }
 0x8ec   :  { %v4949_v16 = vpop.eup %4948 }
 0x8ed   :  { %v477_v22 = vsub.f32 1.0, %v4949_v16  ;;  %v483_v25 = vmul.f32 %v4949_v16, %v5314_v6 }
 0x93d   :  { %v468_v17 = vpop.permute.xlu0 %467 }
 0x93e   :  { %v470_v18 = vmul.f32 %v4949_v16, %v468_v17 }
 0x940   :  { %472 = vrot.lane.b32.xlu1 %v470_v18, %s5160_s11 }
 0x9b2   :  { %v473_v19 = vpop.permute.xlu1 %472 }
 0x9b3   :  { %v475_v20 = vadd.f32 %v473_v19, %v383_v11 }
 0x9b5   :  { %4950 = vtanh.f32 %v475_v20 }
 0x9c2   :  { %v4951_v21 = vpop.eup %4950 }
 0x9c3   :  { %479 = vrot.lane.b32.xlu0 %v4951_v21, %s5161_s16 }
 0xa35   :  { %v480_v23 = vpop.permute.xlu0 %479 }
 0xa36   :  { %v482_v26 = vmul.f32 %v480_v23, %v477_v22 }
 0xa38   :  { %v5337_v27 = vadd.f32 %v483_v25, %v482_v26 }
 0xa3a   :  { %497 = vrot.lane.b32.xlu1 %v5337_v27, %s5161_s16 }
 0xaac   :  { %v498_v28 = vpop.permute.xlu1 %497 }
 0xaad   :  { %4465 = vmatmul.mubr.msk.f32.vlgmr.msra.gmra.mxu0 %vm49_vm1, %v498_v28 }
 0xaae   :  { %4479 = vmatpush3.msra.mxu0 %v5206_v0  ;;  %4486 = vmatprep.mubr.msk.f32.mxu0 %vm5159_vm0, %v5158_v1 }
 0xaaf   :  { %4480 = vmatprep.subr.mxu0 %v5158_v1 }
 0xab0   :  { %4481 = vmatpush3.msra.mxu0 %v5212_v2 }
 0xab1   :  { %4482 = vmatprep.subr.mxu0 %v5158_v1 }
 0xab2   :  { %4483 = vmatpush3.msra.mxu0 %v5222_v3 }
 0xab3   :  { %4484 = vmatprep.subr.mxu0 %v5158_v1 }
 0xab4   :  { %4485 = vmatpush3.msra.mxu0 %v5231_v4 }
 0xab5   :  { %4500 = vmatprep.subr.mxu0 %v5158_v1 }
 0xb6d   :  { %v567_v29 = vpop.f32.mrf.mxu0 }
 0xb6e   :  { %v568_v30 = vadd.f32 %v567_v29, %v5259_v5 }
 0xb6f   :  { %v4466_v31 = vpop.f32.mrf.mxu0 }
 0xb70   :  { %579 = vrot.lane.b32.xlu0 %v568_v30, %s5160_s11  ;;  %v571_v33 = vadd.f32 %v568_v30, %v495_v32 }
 0xb72   :  { %v4116_v34 = vmul.f32 -1.442695, %v571_v33 }
 0xb74   :  { %4952 = vpow2.f32 %v4116_v34  ;;  %v831_v34 = vld [vmem:[%s830_s21] sm:$0x1] }
 0xb81   :  { %v4953_v35 = vpop.eup %4952 }
 0xb82   :  { %v575_v36 = vadd.f32 1.0, %v4953_v35 }
 0xb84   :  { %4954 = vrcp.f32 %v575_v36 }
 0xb91   :  { %v4955_v37 = vpop.eup %4954 }
 0xb92   :  { %v589_v43 = vsub.f32 1.0, %v4955_v37  ;;  %v595_v46 = vmul.f32 %v4955_v37, %v5337_v27 }
 0xbe2   :  { %v580_v38 = vpop.permute.xlu0 %579 }
 0xbe3   :  { %v582_v39 = vmul.f32 %v4955_v37, %v580_v38 }
 0xbe5   :  { %584 = vrot.lane.b32.xlu1 %v582_v39, %s5160_s11 }
 0xc57   :  { %v585_v40 = vpop.permute.xlu1 %584 }
 0xc58   :  { %v587_v41 = vadd.f32 %v585_v40, %v495_v32 }
 0xc5a   :  { %4956 = vtanh.f32 %v587_v41 }
 0xc67   :  { %v4957_v42 = vpop.eup %4956 }
 0xc68   :  { %591 = vrot.lane.b32.xlu0 %v4957_v42, %s5161_s16 }
 0xcda   :  { %v592_v45 = vpop.permute.xlu0 %591 }
 0xcdb   :  { %v594_v47 = vmul.f32 %v592_v45, %v589_v43  ;;  %v5414_v43 = vld [vmem:[%s6366_s2 + $0x58] sm:$0xff]  ;;  %v5419_v45 = vld [vmem:[%s6366_s2 + $0x50] sm:$0xff] }
 0xcdd   :  { %v5360_v48 = vadd.f32 %v595_v46, %v594_v47  ;;  %v37_v46 = vlaneseq  ;;  %v5426_v47 = vld [vmem:[%s6366_s2 + $0x48] sm:$0xff] }
 0xcdf   :  { %609 = vrot.lane.b32.xlu1 %v5360_v48, %s5161_s16 }
 0xd51   :  { %v610_v49 = vpop.permute.xlu1 %609 }
 0xd52   :  { %4476 = vmatmul.mubr.msk.f32.vlgmr.msra.gmra.mxu1 %vm49_vm1, %v610_v49  ;;  %v5429_v49 = vand.u32 127, %v37_v46 }
 0xd53   :  { %4490 = vmatpush3.msra.mxu1 %v5206_v0  ;;  %4497 = vmatprep.mubr.msk.f32.mxu1 %vm5159_vm0, %v5158_v1 }
 0xd54   :  { %4491 = vmatprep.subr.mxu1 %v5158_v1  ;;  %vm941_vm2 = vcmp.eq.s32.totalorder %v5429_v49, 1 }
 0xd55   :  { %4492 = vmatpush3.msra.mxu1 %v5212_v2  ;;  %v607_v2 = vld [vmem:[%s606_s12] sm:$0x1] }
 0xd56   :  { %4493 = vmatprep.subr.mxu1 %v5158_v1 }
 0xd57   :  { %4494 = vmatpush3.msra.mxu1 %v5222_v3 }
 0xd58   :  { %4495 = vmatprep.subr.mxu1 %v5158_v1 }
 0xd59   :  { %4496 = vmatpush3.msra.mxu1 %v5231_v4 }
 0xd5a   :  { %4527 = vmatprep.subr.mxu1 %v5158_v1 }
 0xe12   :  { %v679_v50 = vpop.f32.mrf.mxu1 }
 0xe13   :  { %v680_v0 = vadd.f32 %v679_v50, %v5259_v5  ;;  %v5436_v50 = vld [vmem:[%s6366_s2 + $0x40] sm:$0xff] }
 0xe14   :  { %v4477_v51 = vpop.f32.mrf.mxu1 }
 0xe15   :  { %691 = vrot.lane.b32.xlu0 %v680_v0, %s5160_s11  ;;  %v683_v52 = vadd.f32 %v680_v0, %v607_v2  ;;  %v5443_v0 = vld [vmem:[%s6366_s2 + $0x38] sm:$0xff] }
 0xe17   :  { %v4119_v3 = vmul.f32 -1.442695, %v683_v52  ;;  %v4126_v52 = vsel %vm941_vm2, 1.0, %v5158_v1 }
 0xe19   :  { %4958 = vpow2.f32 %v4119_v3  ;;  %v5462_v3 = vld [vmem:[%s6366_s2 + $0x28] sm:$0xff] }
 0xe26   :  { %v4959_v53 = vpop.eup %4958 }
 0xe27   :  { %v687_v54 = vadd.f32 1.0, %v4959_v53  ;;  %v5469_v53 = vld [vmem:[%s6366_s2 + $0x20] sm:$0xff] }
 0xe29   :  { %4960 = vrcp.f32 %v687_v54  ;;  %v5477_v54 = vld [vmem:[%s6366_s2 + $0x18] sm:$0xff] }
 0xe36   :  { %v4961_v4 = vpop.eup %4960 }
 0xe37   :  { %v701_v60 = vsub.f32 1.0, %v4961_v4  ;;  %v707_v62 = vmul.f32 %v4961_v4, %v5360_v48 }
 0xe87   :  { %v692_v55 = vpop.permute.xlu0 %691 }
 0xe88   :  { %v694_v56 = vmul.f32 %v4961_v4, %v692_v55  ;;  %v5484_v4 = vld [vmem:[%s6366_s2 + $0x10] sm:$0xff]  ;;  %v5491_v55 = vld [vmem:[%s6366_s2 + $0x8] sm:$0xff] }
 0xe8a   :  { %696 = vrot.lane.b32.xlu1 %v694_v56, %s5160_s11  ;;  %v5500_v56 = vld [vmem:[%s6366_s2] sm:$0xff] }
 0xefc   :  { %v697_v57 = vpop.permute.xlu1 %696 }
 0xefd   :  { %v699_v58 = vadd.f32 %v697_v57, %v607_v2  ;;  %v5451_v2 = vld [vmem:[%s6366_s2 + $0x30] sm:$0xff] }
 0xeff   :  { %4962 = vtanh.f32 %v699_v58 }
 0xf0c   :  { %v4963_v59 = vpop.eup %4962 }
 0xf0d   :  { %703 = vrot.lane.b32.xlu0 %v4963_v59, %s5161_s16 }
 0xf7f   :  { %v704_v61 = vpop.permute.xlu0 %703 }
 0xf80   :  { %v706_v63 = vmul.f32 %v704_v61, %v701_v60 }
 0xf82   :  { %v5383_v7 = vadd.f32 %v707_v62, %v706_v63 }
 0xf84   :  { %721 = vrot.lane.b32.xlu1 %v5383_v7, %s5161_s16 }
 0xff6   :  { %v722_v8 = vpop.permute.xlu1 %721 }
 0xff7   :  { %4487 = vmatmul.mubr.msk.f32.vlgmr.msra.gmra.mxu0 %vm49_vm1, %v722_v8 }
 0xff8   :  { %4524 = vmatprep.mubr.msk.f32.mxu0 %vm5159_vm0, %v5158_v1  ;;  %4501 = vmatpush3.msra.mxu0 %v5414_v43 }
 0xff9   :  { %4502 = vmatprep.subr.mxu0 %v5158_v1 }
 0xffa   :  { %4503 = vmatpush3.msra.mxu0 %v5419_v45 }
 0xffb   :  { %4504 = vmatprep.subr.mxu0 %v5158_v1 }
 0xffc   :  { %4505 = vmatpush3.msra.mxu0 %v5426_v47 }
 0xffd   :  { %4506 = vmatprep.subr.mxu0 %v5158_v1 }
 0xffe   :  { %4507 = vmatpush3.msra.mxu0 %v5436_v50 }
 0xfff   :  { %4508 = vmatprep.subr.mxu0 %v5158_v1 }
0x1000   :  { %4509 = vmatpush3.msra.mxu0 %v5443_v0 }
0x1001   :  { %4510 = vmatprep.subr.mxu0 %v5158_v1 }
0x1002   :  { %4511 = vmatpush3.msra.mxu0 %v5451_v2 }
0x1003   :  { %4512 = vmatprep.subr.mxu0 %v5158_v1 }
0x1004   :  { %4513 = vmatpush3.msra.mxu0 %v5462_v3 }
0x1005   :  { %4514 = vmatprep.subr.mxu0 %v5158_v1 }
0x1006   :  { %4515 = vmatpush3.msra.mxu0 %v5469_v53 }
0x1007   :  { %4516 = vmatprep.subr.mxu0 %v5158_v1 }
0x1008   :  { %4517 = vmatpush3.msra.mxu0 %v5477_v54 }
0x1009   :  { %4518 = vmatprep.subr.mxu0 %v5158_v1 }
0x100a   :  { %4519 = vmatpush3.msra.mxu0 %v5484_v4 }
0x100b   :  { %4520 = vmatprep.subr.mxu0 %v5158_v1 }
0x100c   :  { %4521 = vmatpush3.msra.mxu0 %v5491_v55 }
0x100d   :  { %4522 = vmatprep.subr.mxu0 %v5158_v1 }
0x100e   :  { %4523 = vmatpush3.msra.mxu0 %v5500_v56 }
0x100f   :  { %4559 = vmatprep.subr.mxu0 %v5158_v1 }
0x10b7   :  { %v791_v9 = vpop.f32.mrf.mxu0 }
0x10b8   :  { %v792_v10 = vadd.f32 %v791_v9, %v5259_v5  ;;  %v5516_v9 = vld [vmem:[%s6366_s2 + $0x60] sm:$0x1] }
0x10b9   :  { %v4488_v11 = vpop.f32.mrf.mxu0 }
0x10ba   :  { %803 = vrot.lane.b32.xlu0 %v792_v10, %s5160_s11  ;;  %v795_v13 = vadd.f32 %v792_v10, %v719_v12 }
0x10bc   :  { %v4122_v14 = vmul.f32 -1.442695, %v795_v13 }
0x10be   :  { %4964 = vpow2.f32 %v4122_v14 }
0x10cb   :  { %v4965_v15 = vpop.eup %4964 }
0x10cc   :  { %v799_v16 = vadd.f32 1.0, %v4965_v15 }
0x10ce   :  { %4966 = vrcp.f32 %v799_v16 }
0x10db   :  { %v4967_v17 = vpop.eup %4966 }
0x10dc   :  { %v813_v23 = vsub.f32 1.0, %v4967_v17  ;;  %v819_v26 = vmul.f32 %v4967_v17, %v5383_v7 }
0x112c   :  { %v804_v18 = vpop.permute.xlu0 %803 }
0x112d   :  { %v806_v19 = vmul.f32 %v4967_v17, %v804_v18 }
0x112f   :  { %808 = vrot.lane.b32.xlu1 %v806_v19, %s5160_s11 }
0x11a1   :  { %v809_v20 = vpop.permute.xlu1 %808 }
0x11a2   :  { %v811_v21 = vadd.f32 %v809_v20, %v719_v12  ;;  %v40_v20 = vshrl.u32 %v37_v46, 7 }
0x11a4   :  { %4968 = vtanh.f32 %v811_v21  ;;  %vm149_vm4 = vcmp.eq.s32.totalorder %v40_v20, 0  ;;  %vm261_vm5 = vcmp.eq.s32.totalorder %v40_v20, 1  ;;  %vm373_vm6 = vcmp.eq.s32.totalorder %v40_v20, 2 }
0x11a5   :  { %vm485_vm7 = vcmp.eq.s32.totalorder %v40_v20, 3  ;;  %vm597_vm8 = vcmp.eq.s32.totalorder %v40_v20, 4  ;;  %vm709_vm9 = vcmp.eq.s32.totalorder %v40_v20, 5  ;;  %vm821_vm10 = vcmp.eq.s32.totalorder %v40_v20, 6 }
0x11a6   :  { %vm933_vm11 = vcmp.eq.s32.totalorder %v40_v20, 7 }
0x11b1   :  { %v4969_v22 = vpop.eup %4968 }
0x11b2   :  { %815 = vrot.lane.b32.xlu0 %v4969_v22, %s5161_s16  ;;  %v154_v22 = vsub.s32 0, %v40_v20 }
0x1224   :  { %v816_v25 = vpop.permute.xlu0 %815 }
0x1225   :  { %v818_v28 = vmul.f32 %v816_v25, %v813_v23  ;;  %v5525_v23 = vld [vmem:[%s6367_s3 + $0x18] sm:$0xff]  ;;  %v5530_v25 = vld [vmem:[%s6367_s3 + $0x10] sm:$0xff] }
0x1227   :  { %v5398_v29 = vadd.f32 %v819_v26, %v818_v28  ;;  %v155_v26 = vrot.slane %v5268_v24, %v154_v22  ;;  %v267_v28 = vrot.slane %v5291_v44, %v154_v22  ;;  %v491_v24 = vrot.slane %v5337_v27, %v154_v22  ;;  %v5548_v44 = vld [vmem:[%s6367_s3] sm:$0xff] }
0x1229   :  { %833 = vrot.lane.b32.xlu1 %v5398_v29, %s5161_s16 }
0x129b   :  { %v834_v30 = vpop.permute.xlu1 %833 }
0x129c   :  { %4498 = vmatmul.mubr.msk.f32.vlgmr.msra.gmra.mxu1 %vm49_vm1, %v834_v30  ;;  %v5539_v30 = vld [vmem:[%s6367_s3 + $0x8] sm:$0xff] }
0x129d   :  { %4535 = vmatprep.mubr.msk.f32.mxu1 %vm5159_vm0, %v5158_v1  ;;  %4528 = vmatpush3.msra.mxu1 %v5525_v23 }
0x129e   :  { %4529 = vmatprep.subr.mxu1 %v5158_v1 }
0x129f   :  { %4530 = vmatpush3.msra.mxu1 %v5530_v25 }
0x12a0   :  { %4531 = vmatprep.subr.mxu1 %v5158_v1 }
0x12a1   :  { %4532 = vmatpush3.msra.mxu1 %v5539_v30 }
0x12a2   :  { %4533 = vmatprep.subr.mxu1 %v5158_v1 }
0x12a3   :  { %4534 = vmatpush3.msra.mxu1 %v5548_v44 }
0x12a4   :  { %4538 = vmatprep.subr.mxu1 %v5158_v1 }
0x135c   :  { %v903_v31 = vpop.f32.mrf.mxu1 }
0x135d   :  { %v904_v32 = vadd.f32 %v903_v31, %v5259_v5  ;;  %v379_v31 = vrot.slane %v5314_v6, %v154_v22  ;;  %v715_v6 = vrot.slane %v5383_v7, %v154_v22 }
0x135e   :  { %v4499_v33 = vpop.f32.mrf.mxu1 }
0x135f   :  { %915 = vrot.lane.b32.xlu0 %v904_v32, %s5160_s11  ;;  %v907_v35 = vadd.f32 %v904_v32, %v831_v34  ;;  %v156_v32 = vsel %vm149_vm4, %v155_v26, 0.0  ;;  %v603_v33 = vrot.slane %v5360_v48, %v154_v22  ;;  %v5659_v26 = vld [vmem:[%s6368_s4 + $0x8] sm:$0xff] }
0x1361   :  { %v4125_v36 = vmul.f32 -1.442695, %v907_v35  ;;  %v827_v35 = vrot.slane %v5398_v29, %v154_v22 }
0x1363   :  { %4970 = vpow2.f32 %v4125_v36 }
0x1370   :  { %v4971_v37 = vpop.eup %4970 }
0x1371   :  { %v911_v38 = vadd.f32 1.0, %v4971_v37 }
0x1373   :  { %4972 = vrcp.f32 %v911_v38 }
0x1380   :  { %v4973_v39 = vpop.eup %4972 }
0x1381   :  { %v925_v57 = vsub.f32 1.0, %v4973_v39  ;;  %v931_v59 = vmul.f32 %v4973_v39, %v5398_v29 }
0x13d1   :  { %v916_v40 = vpop.permute.xlu0 %915 }
0x13d2   :  { %v918_v41 = vmul.f32 %v4973_v39, %v916_v40 }
0x13d4   :  { %920 = vrot.lane.b32.xlu1 %v918_v41, %s5160_s11 }
0x1446   :  { %v921_v5 = vpop.permute.xlu1 %920 }
0x1447   :  { %v923_v42 = vadd.f32 %v921_v5, %v831_v34  ;;  %v268_v34 = vsel %vm261_vm5, %v267_v28, %v156_v32  ;;  %v5666_v28 = vld [vmem:[%s6368_s4] sm:$0xff] }
0x1448   :  { %v380_v27 = vsel %vm373_vm6, %v379_v31, %v268_v34  ;;  %v5675_v31 = vld [vmem:[%s6367_s3 + $0x40] sm:$0x1] }
0x1449   :  { %4974 = vtanh.f32 %v923_v42  ;;  %v492_v37 = vsel %vm485_vm7, %v491_v24, %v380_v27  ;;  %v5693_v27 = vld [vmem:[%s6368_s4 + $0x20] sm:$0x1] }
0x144a   :  { %v604_v38 = vsel %vm597_vm8, %v603_v33, %v492_v37  ;;  %vm1492_vm8 = vcmp.eq.s32.totalorder %v5429_v49, 0 }
0x144b   :  { %v716_v7 = vsel %vm709_vm9, %v715_v6, %v604_v38 }
0x144c   :  { %v828_v39 = vsel %vm821_vm10, %v827_v35, %v716_v7 }
0x1456   :  { %v4975_v51 = vpop.eup %4974 }
0x1457   :  { %927 = vrot.lane.b32.xlu0 %v4975_v51, %s5161_s16 }
0x145b   :  { %949 = vrot.lane.b32.xlu0 %v4126_v52, %s5162_s13 }
0x14c9   :  { %v928_v58 = vpop.permute.xlu0 %927 }
0x14ca   :  { %v930_v60 = vmul.f32 %v928_v58, %v925_v57 }
0x14cc   :  { %v5505_v61 = vadd.f32 %v931_v59, %v930_v60 }
0x14cd   :  { %v950_v62 = vpop.permute.xlu0 %949 }
0x14ce   :  { %945 = vrot.lane.b32.xlu1 %v5505_v61, %s5161_s16  ;;  %v939_v48 = vrot.slane %v5505_v61, %v154_v22  ;;  %v5652_v22 = vld [vmem:[%s6368_s4 + $0x10] sm:$0xff] }
0x14d0   :  { %v940_v40 = vsel %vm933_vm11, %v939_v48, %v828_v39 }
0x1540   :  { %v946_v63 = vpop.permute.xlu1 %945 }
0x1541   :  { %v952_v8 = vsel %vm49_vm1, %v946_v63, %v950_v62 }
0x1542   :  { %4525 = vmatmul.mubr.msk.f32.vlgmr.msra.gmra.mxu0 %vm966_vm3, %v952_v8 }
0x1543   :  { %4567 = vmatprep.mubr.msk.f32.mxu0 %vm5159_vm0, %v5158_v1 }
0x1602   :  { %v1036_v10 = vpop.f32.mrf.mxu0 }
0x1603   :  { %v1037_v11 = vadd.f32 %v1036_v10, %v5516_v9 }
0x1604   :  { %v4526_v12 = vpop.f32.mrf.mxu0 }
0x1605   :  { %1047 = vrot.lane.b32.xlu1 %v1037_v11, %s5162_s13  ;;  %v4128_v13 = vmul.f32 -1.442695, %v1037_v11  ;;  %v5592_v12 = vld [vmem:[%s6367_s3 + $0x38] sm:$0xff] }
0x1607   :  { %4976 = vpow2.f32 %v4128_v13  ;;  %v5597_v13 = vld [vmem:[%s6367_s3 + $0x30] sm:$0xff] }
0x1614   :  { %v4977_v14 = vpop.eup %4976 }
0x1615   :  { %v1043_v15 = vadd.f32 1.0, %v4977_v14  ;;  %v5606_v14 = vld [vmem:[%s6367_s3 + $0x28] sm:$0xff] }
0x1617   :  { %4978 = vrcp.f32 %v1043_v15  ;;  %v5613_v15 = vld [vmem:[%s6367_s3 + $0x20] sm:$0xff] }
0x1624   :  { %v4979_v16 = vpop.eup %4978 }
0x1625   :  { %v1057_v29 = vsub.f32 1.0, %v4979_v16  ;;  %v1063_v5 = vmul.f32 %v4979_v16, %v5505_v61 }
0x1677   :  { %v1048_v17 = vpop.permute.xlu1 %1047 }
0x1678   :  { %v1050_v18 = vmul.f32 %v4979_v16, %v1048_v17 }
0x167a   :  { %1052 = vrot.lane.b32.xlu0 %v1050_v18, %s5160_s11 }
0x16ec   :  { %v1053_v19 = vpop.permute.xlu0 %1052 }
0x16ed   :  { %v1055_v21 = vadd.f32 %v1053_v19, %v1037_v11 }
0x16ef   :  { %4980 = vtanh.f32 %v1055_v21  ;;  %v5647_v21 = vld [vmem:[%s6368_s4 + $0x18] sm:$0xff] }
0x16f0   :  { %4560 = vmatpush3.msra.mxu0 %v5647_v21 }
0x16f1   :  { %4561 = vmatprep.subr.mxu0 %v5158_v1 }
0x16f2   :  { %4562 = vmatpush3.msra.mxu0 %v5652_v22 }
0x16f3   :  { %4563 = vmatprep.subr.mxu0 %v5158_v1 }
0x16f4   :  { %4564 = vmatpush3.msra.mxu0 %v5659_v26 }
0x16f5   :  { %4565 = vmatprep.subr.mxu0 %v5158_v1 }
0x16f6   :  { %4566 = vmatpush3.msra.mxu0 %v5666_v28 }
0x16f7   :  { %4597 = vmatprep.subr.mxu0 %v5158_v1 }
0x16fc   :  { %v4981_v36 = vpop.eup %4980 }
0x16fd   :  { %1059 = vrot.lane.b32.xlu1 %v4981_v36, %s5161_s16 }
0x1701   :  { %1146 = vrot.lane.b32.xlu1 %v940_v40, %s5161_s16 }
0x176f   :  { %v1060_v41 = vpop.permute.xlu1 %1059 }
0x1770   :  { %v1062_v42 = vmul.f32 %v1060_v41, %v1057_v29 }
0x1772   :  { %v5561_v46 = vadd.f32 %v1063_v5, %v1062_v42 }
0x1773   :  { %v5567_v52 = vpop.permute.xlu1 %1146 }
0x1774   :  { %1071 = vrot.lane.b32.xlu0 %v5561_v46, %s5161_s16 }
0x17e6   :  { %v5565_v51 = vpop.permute.xlu0 %1071 }
0x17e7   :  { %4536 = vmatmul.mubr.msk.f32.vlgmr.msra.gmra.mxu1 %vm49_vm1, %v5565_v51 }
0x17e8   :  { %4539 = vmatpush3.xpose.msk.msra.mxu1 %vm49_vm1, %v5567_v52  ;;  %4540 = vmatprep.mubr.msk.f32.mxu1 %vm5159_vm0, %v5158_v1 }
0x17e9   :  { %4543 = vmatprep.subr.mxu1 %v5158_v1 }
0x17eb   :  { %4541 = vmatmul.mubr.msk.f32.vlgmr.msra.gmra.mxu1 %vm49_vm1, %v5565_v51 }
0x17ec   :  { %4544 = vmatpush3.msra.mxu1 %v5567_v52  ;;  %4545 = vmatprep.mubr.msk.f32.mxu1 %vm5159_vm0, %v5158_v1 }
0x17ed   :  { %4548 = vmatprep.subr.mxu1 %v5158_v1 }
0x18a7   :  { %v5582_v57 = vpop.f32.mrf.mxu1 }
0x18a8   :  { %v1142_v24 = vadd.f32 %v5582_v57, %v5675_v31 }
0x18a9   :  { %v4537_v58 = vpop.f32.mrf.mxu1 }
0x18ab   :  { %v1216_v59 = vpop.f32.mrf.mxu1 }
0x18ac   :  { %v1221_v60 = vsel %vm1220_vm12, %v1216_v59, -inf }
0x18ad   :  { %1222 = vmax.xlane.f32.xlu0 %v1221_v60  ;;  %v4542_v61 = vpop.f32.mrf.mxu1 }
0x1936   :  { %v1223_v62 = vpop.xlane.xlu0 %1222 }
0x1937   :  { %v1224_v63 = vsub.f32 %v1216_v59, %v1223_v62 }
0x1939   :  { %v1225_v8 = vmul.f32 1.442695, %v1224_v63 }
0x193b   :  { %4982 = vpow2.f32 %v1225_v8 }
0x1948   :  { %v4983_v10 = vpop.eup %4982 }
0x1949   :  { %4546 = vmatmul.mubr.msk.f32.vlgmr.msra.gmra.mxu1 %vm1228_vm13, %v4983_v10  ;;  %v1302_v11 = vsel %vm1220_vm12, %v4983_v10, 0.0 }
0x194a   :  { %1303 = vadd.xlane.f32.xlu1 %v1302_v11  ;;  %4556 = vmatprep.mubr.msk.f32.mxu1 %vm5159_vm0, %v5158_v1 }
0x194b   :  { %4549 = vmatpush3.msra.mxu1 %v5592_v12 }
0x194c   :  { %4550 = vmatprep.subr.mxu1 %v5158_v1 }
0x194d   :  { %4551 = vmatpush3.msra.mxu1 %v5597_v13 }
0x194e   :  { %4552 = vmatprep.subr.mxu1 %v5158_v1 }
0x194f   :  { %4553 = vmatpush3.msra.mxu1 %v5606_v14 }
0x1950   :  { %4554 = vmatprep.subr.mxu1 %v5158_v1 }
0x1951   :  { %4555 = vmatpush3.msra.mxu1 %v5613_v15 }
0x1952   :  { %4570 = vmatprep.subr.mxu1 %v5158_v1 }
0x19d3   :  { %v1304_v16 = vpop.xlane.xlu1 %1303 }
0x19d4   :  { %4984 = vrcp.f32 %v1304_v16 }
0x19e1   :  { %v4985_v17 = vpop.eup %4984 }
0x1a09   :  { %v1298_v18 = vpop.f32.mrf.mxu1 }
0x1a0a   :  { %v1306_v19 = vmul.f32 %v4985_v17, %v1298_v18 }
0x1a0b   :  { %v4547_v20 = vpop.f32.mrf.mxu1 }
0x1a0c   :  { %4557 = vmatmul.mubr.msk.f32.vlgmr.msra.gmra.mxu1 %vm49_vm1, %v1306_v19 }
0x1a0d   :  { %4571 = vmatpush3.msra.mxu1 %v5414_v43  ;;  %4594 = vmatprep.mubr.msk.f32.mxu1 %vm5159_vm0, %v5158_v1 }
0x1a0e   :  { %4572 = vmatprep.subr.mxu1 %v5158_v1 }
0x1a0f   :  { %4573 = vmatpush3.msra.mxu1 %v5419_v45 }
0x1a10   :  { %4574 = vmatprep.subr.mxu1 %v5158_v1 }
0x1a11   :  { %4575 = vmatpush3.msra.mxu1 %v5426_v47 }
0x1a12   :  { %4576 = vmatprep.subr.mxu1 %v5158_v1 }
0x1a13   :  { %4577 = vmatpush3.msra.mxu1 %v5436_v50 }
0x1a14   :  { %4578 = vmatprep.subr.mxu1 %v5158_v1 }
0x1a15   :  { %4579 = vmatpush3.msra.mxu1 %v5443_v0 }
0x1a16   :  { %4580 = vmatprep.subr.mxu1 %v5158_v1 }
0x1a17   :  { %4581 = vmatpush3.msra.mxu1 %v5451_v2 }
0x1a18   :  { %4582 = vmatprep.subr.mxu1 %v5158_v1 }
0x1a19   :  { %4583 = vmatpush3.msra.mxu1 %v5462_v3 }
0x1a1a   :  { %4584 = vmatprep.subr.mxu1 %v5158_v1 }
0x1a1b   :  { %4585 = vmatpush3.msra.mxu1 %v5469_v53 }
0x1a1c   :  { %4586 = vmatprep.subr.mxu1 %v5158_v1 }
0x1a1d   :  { %4587 = vmatpush3.msra.mxu1 %v5477_v54 }
0x1a1e   :  { %4588 = vmatprep.subr.mxu1 %v5158_v1 }
0x1a1f   :  { %4589 = vmatpush3.msra.mxu1 %v5484_v4 }
0x1a20   :  { %4590 = vmatprep.subr.mxu1 %v5158_v1 }
0x1a21   :  { %4591 = vmatpush3.msra.mxu1 %v5491_v55 }
0x1a22   :  { %4592 = vmatprep.subr.mxu1 %v5158_v1 }
0x1a23   :  { %4593 = vmatpush3.msra.mxu1 %v5500_v56 }
0x1a24   :  { %4629 = vmatprep.subr.mxu1 %v5158_v1 }
0x1acc   :  { %v1380_v32 = vpop.f32.mrf.mxu1 }
0x1acd   :  { %v1384_v33 = vadd.f32 %v1380_v32, %v1142_v24 }
0x1ace   :  { %v4558_v34 = vpop.f32.mrf.mxu1 }
0x1acf   :  { %4986 = vtanh.f32 %v1384_v33 }
0x1adc   :  { %v4987_v6 = vpop.eup %4986 }
0x1add   :  { %4568 = vmatmul.mubr.msk.f32.vlgmr.msra.gmra.mxu0 %vm49_vm1, %v4987_v6 }
0x1ade   :  { %4598 = vmatpush3.msra.mxu0 %v5525_v23  ;;  %4605 = vmatprep.mubr.msk.f32.mxu0 %vm5159_vm0, %v5158_v1 }
0x1adf   :  { %4599 = vmatprep.subr.mxu0 %v5158_v1 }
0x1ae0   :  { %4600 = vmatpush3.msra.mxu0 %v5530_v25 }
0x1ae1   :  { %4601 = vmatprep.subr.mxu0 %v5158_v1 }
0x1ae2   :  { %4602 = vmatpush3.msra.mxu0 %v5539_v30 }
0x1ae3   :  { %4603 = vmatprep.subr.mxu0 %v5158_v1 }
0x1ae4   :  { %4604 = vmatpush3.msra.mxu0 %v5548_v44 }
0x1ae5   :  { %4608 = vmatprep.subr.mxu0 %v5158_v1 }
0x1b9d   :  { %v1460_v35 = vpop.f32.mrf.mxu0 }
0x1b9e   :  { %v5696_v36 = vadd.f32 %v1460_v35, %v5693_v27 }
0x1b9f   :  { %v4569_v37 = vpop.f32.mrf.mxu0 }
0x1ba0   :  { %v1465_v48 = vsel %vm1464_vm14, %v5696_v36, -inf }
0x1ba1   :  { %1466 = vmax.xlane.f32.xlu0 %v1465_v48 }
0x1c2a   :  { %v5700_v38 = vpop.xlane.xlu0 %1466 }
0x1c2b   :  { %vm1468_vm15 = vcmp.eq.f32.partialorder %v5696_v36, %v5700_v38 }
0x1c2c   :  { %v1469_v7 = vsel %vm1468_vm15, %v5429_v49, 128  ;;  %vm2519_vm15 = vcmp.eq.s32.totalorder %v5429_v49, 2 }
0x1c2d   :  { %v1470_v39 = vsel %vm1464_vm14, %v1469_v7, 2147483647 }
0x1c2e   :  { %v1472_v40 = vshra.s32 %v1470_v39, 16  ;;  %v1471_v41 = vand.u32 65535, %v1470_v39 }
0x1c30   :  { %v1474_v29 = vcvt.s32.f32 %v1472_v40  ;;  %v1473_v42 = vcvt.s32.f32 %v1471_v41 }
0x1c32   :  { %1475 = vmin.xlane.f32.xlu0 %v1474_v29 }
0x1cbb   :  { %v1476_v5 = vpop.xlane.xlu0 %1475 }
0x1cbc   :  { %vm1477_vm4 = vcmp.eq.f32.partialorder %v1474_v29, %v1476_v5  ;;  %v1482_v58 = vcvt.f32.s32 %v1476_v5 }
0x1cbd   :  { %v1478_v57 = vsel %vm1477_vm4, %v1473_v42, inf }
0x1cbe   :  { %1479 = vmin.xlane.f32.xlu1 %v1478_v57  ;;  %v1483_v60 = vshll.u32 %v1482_v58, 16 }
0x1d47   :  { %v1480_v59 = vpop.xlane.xlu1 %1479 }
0x1d48   :  { %v1481_v61 = vcvt.f32.s32 %v1480_v59 }
0x1d4a   :  { %v5706_v62 = vadd.s32 %v1483_v60, %v1481_v61 }
0x1d4c   :  { %vm1495_vm5 = vcmp.eq.s32.totalorder %v5429_v49, %v5706_v62 }
0x1d4d   :  { %v4135_v63 = vsel %vm1495_vm5, 1.0, %v5158_v1 }
0x1d4e   :  { %1500 = vrot.lane.b32.xlu0 %v4135_v63, %s5162_s13 }
0x1dc0   :  { %v1501_v8 = vpop.permute.xlu0 %1500 }
0x1dc1   :  { %v1503_v10 = vsel %vm49_vm1, %v5565_v51, %v1501_v8 }
0x1dc2   :  { %4595 = vmatmul.mubr.msk.f32.vlgmr.msra.gmra.mxu1 %vm966_vm3, %v1503_v10 }
0x1dc3   :  { %4630 = vmatpush3.msra.mxu1 %v5647_v21  ;;  %4637 = vmatprep.mubr.msk.f32.mxu1 %vm5159_vm0, %v5158_v1 }
0x1dc4   :  { %4631 = vmatprep.subr.mxu1 %v5158_v1 }
0x1dc5   :  { %4632 = vmatpush3.msra.mxu1 %v5652_v22 }
0x1dc6   :  { %4633 = vmatprep.subr.mxu1 %v5158_v1 }
0x1dc7   :  { %4634 = vmatpush3.msra.mxu1 %v5659_v26 }
0x1dc8   :  { %4635 = vmatprep.subr.mxu1 %v5158_v1 }
0x1dc9   :  { %4636 = vmatpush3.msra.mxu1 %v5666_v28 }
0x1dca   :  { %4667 = vmatprep.subr.mxu1 %v5158_v1 }
0x1e82   :  { %v1573_v51 = vpop.f32.mrf.mxu1 }
0x1e83   :  { %v1574_v11 = vadd.f32 %v1573_v51, %v5516_v9 }
0x1e84   :  { %v4596_v16 = vpop.f32.mrf.mxu1 }
0x1e85   :  { %1584 = vrot.lane.b32.xlu1 %v1574_v11, %s5162_s13  ;;  %v4137_v17 = vmul.f32 -1.442695, %v1574_v11 }
0x1e87   :  { %4988 = vpow2.f32 %v4137_v17 }
0x1e94   :  { %v4989_v18 = vpop.eup %4988 }
0x1e95   :  { %v1580_v19 = vadd.f32 1.0, %v4989_v18 }
0x1e97   :  { %4990 = vrcp.f32 %v1580_v19 }
0x1ea4   :  { %v4991_v20 = vpop.eup %4990 }
0x1ea5   :  { %v1594_v35 = vsub.f32 1.0, %v4991_v20  ;;  %v1600_v48 = vmul.f32 %v4991_v20, %v5561_v46 }
0x1ef7   :  { %v1585_v24 = vpop.permute.xlu1 %1584 }
0x1ef8   :  { %v1587_v32 = vmul.f32 %v4991_v20, %v1585_v24 }
0x1efa   :  { %1589 = vrot.lane.b32.xlu1 %v1587_v32, %s5160_s11 }
0x1f6c   :  { %v1590_v33 = vpop.permute.xlu1 %1589 }
0x1f6d   :  { %v1592_v34 = vadd.f32 %v1590_v33, %v1574_v11 }
0x1f6f   :  { %4992 = vtanh.f32 %v1592_v34 }
0x1f7c   :  { %v4993_v6 = vpop.eup %4992 }
0x1f7d   :  { %1596 = vrot.lane.b32.xlu0 %v4993_v6, %s5161_s16 }
0x1fef   :  { %v1597_v37 = vpop.permute.xlu0 %1596 }
0x1ff0   :  { %v1599_v7 = vmul.f32 %v1597_v37, %v1594_v35 }
0x1ff2   :  { %v5730_v39 = vadd.f32 %v1600_v48, %v1599_v7 }
0x1ff4   :  { %1603 = vrot.lane.b32.xlu1 %v5730_v39, %s5161_s16 }
0x2066   :  { %v5734_v40 = vpop.permute.xlu1 %1603 }
0x2067   :  { %4606 = vmatmul.mubr.msk.f32.vlgmr.msra.gmra.mxu0 %vm49_vm1, %v5734_v40 }
0x2068   :  { %4609 = vmatpush3.xpose.msk.msra.mxu0 %vm49_vm1, %v5567_v52  ;;  %4610 = vmatprep.mubr.msk.f32.mxu0 %vm5159_vm0, %v5158_v1 }
0x2069   :  { %4613 = vmatprep.subr.mxu0 %v5158_v1 }
0x206b   :  { %4611 = vmatmul.mubr.msk.f32.vlgmr.msra.gmra.mxu0 %vm49_vm1, %v5734_v40 }
0x206c   :  { %4614 = vmatpush3.msra.mxu0 %v5567_v52  ;;  %4615 = vmatprep.mubr.msk.f32.mxu0 %vm5159_vm0, %v5158_v1 }
0x206d   :  { %4618 = vmatprep.subr.mxu0 %v5158_v1 }
0x2127   :  { %v1673_v46 = vpop.f32.mrf.mxu0 }
0x2128   :  { %v1674_v16 = vadd.f32 %v1673_v46, %v5675_v31 }
0x2129   :  { %v4607_v29 = vpop.f32.mrf.mxu0 }
0x212b   :  { %v1743_v41 = vpop.f32.mrf.mxu0 }
0x212c   :  { %v1747_v5 = vsel %vm1220_vm12, %v1743_v41, -inf }
0x212d   :  { %1748 = vmax.xlane.f32.xlu0 %v1747_v5  ;;  %v4612_v42 = vpop.f32.mrf.mxu0 }
0x21b6   :  { %v1749_v57 = vpop.xlane.xlu0 %1748 }
0x21b7   :  { %v1750_v58 = vsub.f32 %v1743_v41, %v1749_v57 }
0x21b9   :  { %v1751_v59 = vmul.f32 1.442695, %v1750_v58 }
0x21bb   :  { %4994 = vpow2.f32 %v1751_v59 }
0x21c8   :  { %v4995_v60 = vpop.eup %4994 }
0x21c9   :  { %4616 = vmatmul.mubr.msk.f32.vlgmr.msra.gmra.mxu0 %vm1228_vm13, %v4995_v60  ;;  %v1826_v61 = vsel %vm1220_vm12, %v4995_v60, 0.0 }
0x21ca   :  { %1827 = vadd.xlane.f32.xlu1 %v1826_v61  ;;  %4619 = vmatpush3.msra.mxu0 %v5592_v12  ;;  %v1493_v61 = vsel %vm1492_vm8, %v5706_v62, 0 }
0x21cb   :  { %4620 = vmatprep.subr.mxu0 %v5158_v1  ;;  %4626 = vmatprep.mubr.msk.f32.mxu0 %vm5159_vm0, %v5158_v1 }
0x21cc   :  { %4621 = vmatpush3.msra.mxu0 %v5597_v13 }
0x21cd   :  { %4622 = vmatprep.subr.mxu0 %v5158_v1 }
0x21ce   :  { %4623 = vmatpush3.msra.mxu0 %v5606_v14 }
0x21cf   :  { %4624 = vmatprep.subr.mxu0 %v5158_v1 }
0x21d0   :  { %4625 = vmatpush3.msra.mxu0 %v5613_v15 }
0x21d1   :  { %4640 = vmatprep.subr.mxu0 %v5158_v1 }
0x2253   :  { %v1828_v63 = vpop.xlane.xlu1 %1827 }
0x2254   :  { %4996 = vrcp.f32 %v1828_v63 }
0x2261   :  { %v4997_v8 = vpop.eup %4996 }
0x2289   :  { %v1822_v10 = vpop.f32.mrf.mxu0 }
0x228a   :  { %v1830_v51 = vmul.f32 %v4997_v8, %v1822_v10 }
0x228b   :  { %v4617_v11 = vpop.f32.mrf.mxu0 }
0x228c   :  { %4627 = vmatmul.mubr.msk.f32.vlgmr.msra.gmra.mxu0 %vm49_vm1, %v1830_v51 }
0x228d   :  { %4641 = vmatpush3.msra.mxu0 %v5414_v43  ;;  %4664 = vmatprep.mubr.msk.f32.mxu0 %vm5159_vm0, %v5158_v1 }
0x228e   :  { %4642 = vmatprep.subr.mxu0 %v5158_v1 }
0x228f   :  { %4643 = vmatpush3.msra.mxu0 %v5419_v45 }
0x2290   :  { %4644 = vmatprep.subr.mxu0 %v5158_v1 }
0x2291   :  { %4645 = vmatpush3.msra.mxu0 %v5426_v47 }
0x2292   :  { %4646 = vmatprep.subr.mxu0 %v5158_v1 }
0x2293   :  { %4647 = vmatpush3.msra.mxu0 %v5436_v50 }
0x2294   :  { %4648 = vmatprep.subr.mxu0 %v5158_v1 }
0x2295   :  { %4649 = vmatpush3.msra.mxu0 %v5443_v0 }
0x2296   :  { %4650 = vmatprep.subr.mxu0 %v5158_v1 }
0x2297   :  { %4651 = vmatpush3.msra.mxu0 %v5451_v2 }
0x2298   :  { %4652 = vmatprep.subr.mxu0 %v5158_v1 }
0x2299   :  { %4653 = vmatpush3.msra.mxu0 %v5462_v3 }
0x229a   :  { %4654 = vmatprep.subr.mxu0 %v5158_v1 }
0x229b   :  { %4655 = vmatpush3.msra.mxu0 %v5469_v53 }
0x229c   :  { %4656 = vmatprep.subr.mxu0 %v5158_v1 }
0x229d   :  { %4657 = vmatpush3.msra.mxu0 %v5477_v54 }
0x229e   :  { %4658 = vmatprep.subr.mxu0 %v5158_v1 }
0x229f   :  { %4659 = vmatpush3.msra.mxu0 %v5484_v4 }
0x22a0   :  { %4660 = vmatprep.subr.mxu0 %v5158_v1 }
0x22a1   :  { %4661 = vmatpush3.msra.mxu0 %v5491_v55 }
0x22a2   :  { %4662 = vmatprep.subr.mxu0 %v5158_v1 }
0x22a3   :  { %4663 = vmatpush3.msra.mxu0 %v5500_v56 }
0x22a4   :  { %4699 = vmatprep.subr.mxu0 %v5158_v1 }
0x234c   :  { %v1900_v17 = vpop.f32.mrf.mxu0 }
0x234d   :  { %v1904_v18 = vadd.f32 %v1900_v17, %v1674_v16 }
0x234e   :  { %v4628_v19 = vpop.f32.mrf.mxu0 }
0x234f   :  { %4998 = vtanh.f32 %v1904_v18 }
0x235c   :  { %v4999_v20 = vpop.eup %4998 }
0x235d   :  { %4638 = vmatmul.mubr.msk.f32.vlgmr.msra.gmra.mxu1 %vm49_vm1, %v4999_v20 }
0x235e   :  { %4668 = vmatpush3.msra.mxu1 %v5525_v23  ;;  %4675 = vmatprep.mubr.msk.f32.mxu1 %vm5159_vm0, %v5158_v1 }
0x235f   :  { %4669 = vmatprep.subr.mxu1 %v5158_v1 }
0x2360   :  { %4670 = vmatpush3.msra.mxu1 %v5530_v25 }
0x2361   :  { %4671 = vmatprep.subr.mxu1 %v5158_v1 }
0x2362   :  { %4672 = vmatpush3.msra.mxu1 %v5539_v30 }
0x2363   :  { %4673 = vmatprep.subr.mxu1 %v5158_v1 }
0x2364   :  { %4674 = vmatpush3.msra.mxu1 %v5548_v44 }
0x2365   :  { %4678 = vmatprep.subr.mxu1 %v5158_v1 }
0x241d   :  { %v1975_v24 = vpop.f32.mrf.mxu1 }
0x241e   :  { %v5802_v32 = vadd.f32 %v1975_v24, %v5693_v27 }
0x241f   :  { %v4639_v33 = vpop.f32.mrf.mxu1 }
0x2420   :  { %v1979_v34 = vsel %vm1464_vm14, %v5802_v32, -inf }
0x2421   :  { %1980 = vmax.xlane.f32.xlu0 %v1979_v34 }
0x24aa   :  { %v5806_v6 = vpop.xlane.xlu0 %1980 }
0x24ab   :  { %vm1982_vm6 = vcmp.eq.f32.partialorder %v5802_v32, %v5806_v6 }
0x24ac   :  { %v1983_v35 = vsel %vm1982_vm6, %v5429_v49, 128 }
0x24ad   :  { %v1984_v37 = vsel %vm1464_vm14, %v1983_v35, 2147483647 }
0x24ae   :  { %v1986_v48 = vshra.s32 %v1984_v37, 16  ;;  %v1985_v46 = vand.u32 65535, %v1984_v37 }
0x24b0   :  { %v1988_v7 = vcvt.s32.f32 %v1986_v48  ;;  %v1987_v41 = vcvt.s32.f32 %v1985_v46 }
0x24b2   :  { %1989 = vmin.xlane.f32.xlu0 %v1988_v7 }
0x253b   :  { %v1990_v29 = vpop.xlane.xlu0 %1989 }
0x253c   :  { %vm1991_vm7 = vcmp.eq.f32.partialorder %v1988_v7, %v1990_v29  ;;  %v1996_v42 = vcvt.f32.s32 %v1990_v29 }
0x253d   :  { %v1992_v5 = vsel %vm1991_vm7, %v1987_v41, inf  ;;  %vm3033_vm7 = vcmp.eq.s32.totalorder %v5429_v49, 3 }
0x253e   :  { %1993 = vmin.xlane.f32.xlu1 %v1992_v5  ;;  %v1997_v58 = vshll.u32 %v1996_v42, 16 }
0x25c7   :  { %v1994_v57 = vpop.xlane.xlu1 %1993 }
0x25c8   :  { %v1995_v59 = vcvt.f32.s32 %v1994_v57 }
0x25ca   :  { %v1998_v60 = vadd.s32 %v1997_v58, %v1995_v59 }
0x25cc   :  { %v5818_v63 = vsel %vm941_vm2, %v1998_v60, %v1493_v61  ;;  %vm2008_vm9 = vcmp.eq.s32.totalorder %v5429_v49, %v1998_v60 }
0x25cd   :  { %v4144_v8 = vsel %vm2008_vm9, 1.0, %v5158_v1 }
0x25ce   :  { %2013 = vrot.lane.b32.xlu0 %v4144_v8, %s5162_s13 }
0x2640   :  { %v2014_v10 = vpop.permute.xlu0 %2013 }
0x2641   :  { %v2016_v51 = vsel %vm49_vm1, %v5734_v40, %v2014_v10 }
0x2642   :  { %4665 = vmatmul.mubr.msk.f32.vlgmr.msra.gmra.mxu0 %vm966_vm3, %v2016_v51 }
0x2643   :  { %4700 = vmatpush3.msra.mxu0 %v5647_v21  ;;  %4707 = vmatprep.mubr.msk.f32.mxu0 %vm5159_vm0, %v5158_v1 }
0x2644   :  { %4701 = vmatprep.subr.mxu0 %v5158_v1 }
0x2645   :  { %4702 = vmatpush3.msra.mxu0 %v5652_v22 }
0x2646   :  { %4703 = vmatprep.subr.mxu0 %v5158_v1 }
0x2647   :  { %4704 = vmatpush3.msra.mxu0 %v5659_v26 }
0x2648   :  { %4705 = vmatprep.subr.mxu0 %v5158_v1 }
0x2649   :  { %4706 = vmatpush3.msra.mxu0 %v5666_v28 }
0x264a   :  { %4737 = vmatprep.subr.mxu0 %v5158_v1 }
0x2702   :  { %v2086_v62 = vpop.f32.mrf.mxu0 }
0x2703   :  { %v2087_v40 = vadd.f32 %v2086_v62, %v5516_v9 }
0x2704   :  { %v4666_v11 = vpop.f32.mrf.mxu0 }
0x2705   :  { %2097 = vrot.lane.b32.xlu1 %v2087_v40, %s5162_s13  ;;  %v4146_v16 = vmul.f32 -1.442695, %v2087_v40 }
0x2707   :  { %5000 = vpow2.f32 %v4146_v16 }
0x2714   :  { %v5001_v17 = vpop.eup %5000 }
0x2715   :  { %v2093_v18 = vadd.f32 1.0, %v5001_v17 }
0x2717   :  { %5002 = vrcp.f32 %v2093_v18 }
0x2724   :  { %v5003_v19 = vpop.eup %5002 }
0x2725   :  { %v2107_v37 = vsub.f32 1.0, %v5003_v19  ;;  %v2113_v7 = vmul.f32 %v5003_v19, %v5730_v39 }
0x2777   :  { %v2098_v20 = vpop.permute.xlu1 %2097 }
0x2778   :  { %v2100_v24 = vmul.f32 %v5003_v19, %v2098_v20 }
0x277a   :  { %2102 = vrot.lane.b32.xlu1 %v2100_v24, %s5160_s11 }
0x27ec   :  { %v2103_v33 = vpop.permute.xlu1 %2102 }
0x27ed   :  { %v2105_v34 = vadd.f32 %v2103_v33, %v2087_v40 }
0x27ef   :  { %5004 = vtanh.f32 %v2105_v34 }
0x27fc   :  { %v5005_v35 = vpop.eup %5004 }
0x27fd   :  { %2109 = vrot.lane.b32.xlu0 %v5005_v35, %s5161_s16 }
0x286f   :  { %v2110_v48 = vpop.permute.xlu0 %2109 }
0x2870   :  { %v2112_v46 = vmul.f32 %v2110_v48, %v2107_v37 }
0x2872   :  { %v5841_v29 = vadd.f32 %v2113_v7, %v2112_v46 }
0x2874   :  { %2116 = vrot.lane.b32.xlu1 %v5841_v29, %s5161_s16 }
0x28e6   :  { %v5845_v41 = vpop.permute.xlu1 %2116 }
0x28e7   :  { %4676 = vmatmul.mubr.msk.f32.vlgmr.msra.gmra.mxu1 %vm49_vm1, %v5845_v41 }
0x28e8   :  { %4679 = vmatpush3.xpose.msk.msra.mxu1 %vm49_vm1, %v5567_v52  ;;  %4680 = vmatprep.mubr.msk.f32.mxu1 %vm5159_vm0, %v5158_v1 }
0x28e9   :  { %4683 = vmatprep.subr.mxu1 %v5158_v1 }
0x28eb   :  { %4681 = vmatmul.mubr.msk.f32.vlgmr.msra.gmra.mxu1 %vm49_vm1, %v5845_v41 }
0x28ec   :  { %4684 = vmatpush3.msra.mxu1 %v5567_v52  ;;  %4685 = vmatprep.mubr.msk.f32.mxu1 %vm5159_vm0, %v5158_v1 }
0x28ed   :  { %4688 = vmatprep.subr.mxu1 %v5158_v1 }
0x29a7   :  { %v2186_v39 = vpop.f32.mrf.mxu1 }
0x29a9   :  { %v4677_v5 = vpop.f32.mrf.mxu1 }
0x29ab   :  { %v2256_v42 = vpop.f32.mrf.mxu1 }
0x29ac   :  { %v2260_v57 = vsel %vm1220_vm12, %v2256_v42, -inf }
0x29ad   :  { %2261 = vmax.xlane.f32.xlu0 %v2260_v57  ;;  %v4682_v58 = vpop.f32.mrf.mxu1 }
0x2a36   :  { %v2262_v59 = vpop.xlane.xlu0 %2261 }
0x2a37   :  { %v2263_v60 = vsub.f32 %v2256_v42, %v2262_v59 }
0x2a39   :  { %v2264_v61 = vmul.f32 1.442695, %v2263_v60 }
0x2a3b   :  { %5006 = vpow2.f32 %v2264_v61 }
0x2a48   :  { %v5007_v8 = vpop.eup %5006 }
0x2a49   :  { %4686 = vmatmul.mubr.msk.f32.vlgmr.msra.gmra.mxu1 %vm1228_vm13, %v5007_v8  ;;  %v2339_v10 = vsel %vm1220_vm12, %v5007_v8, 0.0 }
0x2a4a   :  { %2340 = vadd.xlane.f32.xlu1 %v2339_v10  ;;  %4689 = vmatpush3.msra.mxu1 %v5592_v12 }
0x2a4b   :  { %4690 = vmatprep.subr.mxu1 %v5158_v1  ;;  %4696 = vmatprep.mubr.msk.f32.mxu1 %vm5159_vm0, %v5158_v1 }
0x2a4c   :  { %4691 = vmatpush3.msra.mxu1 %v5597_v13 }
0x2a4d   :  { %4692 = vmatprep.subr.mxu1 %v5158_v1 }
0x2a4e   :  { %4693 = vmatpush3.msra.mxu1 %v5606_v14 }
0x2a4f   :  { %4694 = vmatprep.subr.mxu1 %v5158_v1 }
0x2a50   :  { %4695 = vmatpush3.msra.mxu1 %v5613_v15 }
0x2a51   :  { %4710 = vmatprep.subr.mxu1 %v5158_v1 }
0x2ad3   :  { %v2341_v51 = vpop.xlane.xlu1 %2340 }
0x2ad4   :  { %5008 = vrcp.f32 %v2341_v51 }
0x2ae1   :  { %v5009_v62 = vpop.eup %5008 }
0x2b09   :  { %v2335_v40 = vpop.f32.mrf.mxu1 }
0x2b0a   :  { %v2343_v11 = vmul.f32 %v5009_v62, %v2335_v40 }
0x2b0b   :  { %v4687_v16 = vpop.f32.mrf.mxu1 }
0x2b0c   :  { %4697 = vmatmul.mubr.msk.f32.vlgmr.msra.gmra.mxu1 %vm49_vm1, %v2343_v11 }
0x2b0d   :  { %4711 = vmatpush3.msra.mxu1 %v5414_v43  ;;  %4734 = vmatprep.mubr.msk.f32.mxu1 %vm5159_vm0, %v5158_v1  ;;  %v2187_v43 = vadd.f32 %v2186_v39, %v5675_v31 }
0x2b0e   :  { %4712 = vmatprep.subr.mxu1 %v5158_v1 }
0x2b0f   :  { %4713 = vmatpush3.msra.mxu1 %v5419_v45 }
0x2b10   :  { %4714 = vmatprep.subr.mxu1 %v5158_v1 }
0x2b11   :  { %4715 = vmatpush3.msra.mxu1 %v5426_v47 }
0x2b12   :  { %4716 = vmatprep.subr.mxu1 %v5158_v1 }
0x2b13   :  { %4717 = vmatpush3.msra.mxu1 %v5436_v50 }
0x2b14   :  { %4718 = vmatprep.subr.mxu1 %v5158_v1 }
0x2b15   :  { %4719 = vmatpush3.msra.mxu1 %v5443_v0 }
0x2b16   :  { %4720 = vmatprep.subr.mxu1 %v5158_v1 }
0x2b17   :  { %4721 = vmatpush3.msra.mxu1 %v5451_v2 }
0x2b18   :  { %4722 = vmatprep.subr.mxu1 %v5158_v1 }
0x2b19   :  { %4723 = vmatpush3.msra.mxu1 %v5462_v3 }
0x2b1a   :  { %4724 = vmatprep.subr.mxu1 %v5158_v1 }
0x2b1b   :  { %4725 = vmatpush3.msra.mxu1 %v5469_v53 }
0x2b1c   :  { %4726 = vmatprep.subr.mxu1 %v5158_v1 }
0x2b1d   :  { %4727 = vmatpush3.msra.mxu1 %v5477_v54 }
0x2b1e   :  { %4728 = vmatprep.subr.mxu1 %v5158_v1 }
0x2b1f   :  { %4729 = vmatpush3.msra.mxu1 %v5484_v4 }
0x2b20   :  { %4730 = vmatprep.subr.mxu1 %v5158_v1 }
0x2b21   :  { %4731 = vmatpush3.msra.mxu1 %v5491_v55 }
0x2b22   :  { %4732 = vmatprep.subr.mxu1 %v5158_v1 }
0x2b23   :  { %4733 = vmatpush3.msra.mxu1 %v5500_v56 }
0x2b24   :  { %4769 = vmatprep.subr.mxu1 %v5158_v1 }
0x2bcc   :  { %v2413_v45 = vpop.f32.mrf.mxu1 }
0x2bcd   :  { %v2417_v47 = vadd.f32 %v2413_v45, %v2187_v43 }
0x2bce   :  { %v4698_v50 = vpop.f32.mrf.mxu1 }
0x2bcf   :  { %5010 = vtanh.f32 %v2417_v47 }
0x2bdc   :  { %v5011_v0 = vpop.eup %5010 }
0x2bdd   :  { %4708 = vmatmul.mubr.msk.f32.vlgmr.msra.gmra.mxu0 %vm49_vm1, %v5011_v0 }
0x2bde   :  { %4738 = vmatpush3.msra.mxu0 %v5525_v23  ;;  %4745 = vmatprep.mubr.msk.f32.mxu0 %vm5159_vm0, %v5158_v1 }
0x2bdf   :  { %4739 = vmatprep.subr.mxu0 %v5158_v1 }
0x2be0   :  { %4740 = vmatpush3.msra.mxu0 %v5530_v25 }
0x2be1   :  { %4741 = vmatprep.subr.mxu0 %v5158_v1 }
0x2be2   :  { %4742 = vmatpush3.msra.mxu0 %v5539_v30 }
0x2be3   :  { %4743 = vmatprep.subr.mxu0 %v5158_v1 }
0x2be4   :  { %4744 = vmatpush3.msra.mxu0 %v5548_v44 }
0x2be5   :  { %4748 = vmatprep.subr.mxu0 %v5158_v1 }
0x2c9d   :  { %v2488_v2 = vpop.f32.mrf.mxu0 }
0x2c9e   :  { %v5913_v3 = vadd.f32 %v2488_v2, %v5693_v27 }
0x2c9f   :  { %v4709_v53 = vpop.f32.mrf.mxu0 }
0x2ca0   :  { %v2492_v54 = vsel %vm1464_vm14, %v5913_v3, -inf }
0x2ca1   :  { %2493 = vmax.xlane.f32.xlu0 %v2492_v54 }
0x2d2a   :  { %v5917_v4 = vpop.xlane.xlu0 %2493 }
0x2d2b   :  { %vm2495_vm10 = vcmp.eq.f32.partialorder %v5913_v3, %v5917_v4 }
0x2d2c   :  { %v2496_v55 = vsel %vm2495_vm10, %v5429_v49, 128 }
0x2d2d   :  { %v2497_v56 = vsel %vm1464_vm14, %v2496_v55, 2147483647 }
0x2d2e   :  { %v2499_v23 = vshra.s32 %v2497_v56, 16  ;;  %v2498_v30 = vand.u32 65535, %v2497_v56 }
0x2d30   :  { %v2501_v25 = vcvt.s32.f32 %v2499_v23  ;;  %v2500_v17 = vcvt.s32.f32 %v2498_v30  ;;  %v6011_v30 = vld [vmem:[%s6366_s2 + $0x40] sm:$0xff] }
0x2d32   :  { %2502 = vmin.xlane.f32.xlu0 %v2501_v25 }
0x2dbb   :  { %v2503_v44 = vpop.xlane.xlu0 %2502 }
0x2dbc   :  { %vm2504_vm11 = vcmp.eq.f32.partialorder %v2501_v25, %v2503_v44  ;;  %v2509_v19 = vcvt.f32.s32 %v2503_v44  ;;  %v6018_v44 = vld [vmem:[%s6366_s2 + $0x38] sm:$0xff] }
0x2dbd   :  { %v2505_v18 = vsel %vm2504_vm11, %v2500_v17, inf  ;;  %v6025_v17 = vld [vmem:[%s6366_s2 + $0x30] sm:$0xff] }
0x2dbe   :  { %2506 = vmin.xlane.f32.xlu1 %v2505_v18  ;;  %v2510_v24 = vshll.u32 %v2509_v19, 16  ;;  %v6032_v18 = vld [vmem:[%s6366_s2 + $0x28] sm:$0xff]  ;;  %v6039_v19 = vld [vmem:[%s6366_s2 + $0x20] sm:$0xff] }
0x2e47   :  { %v2507_v20 = vpop.xlane.xlu1 %2506 }
0x2e48   :  { %v2508_v33 = vcvt.f32.s32 %v2507_v20  ;;  %v6046_v20 = vld [vmem:[%s6366_s2 + $0x18] sm:$0xff] }
0x2e4a   :  { %v2511_v34 = vadd.s32 %v2510_v24, %v2508_v33  ;;  %v6053_v24 = vld [vmem:[%s6366_s2 + $0x10] sm:$0xff]  ;;  %v6060_v33 = vld [vmem:[%s6366_s2 + $0x8] sm:$0xff] }
0x2e4c   :  { %v5927_v35 = vsel %vm2519_vm15, %v2511_v34, %v5818_v63  ;;  %vm2522_vm4 = vcmp.eq.s32.totalorder %v5429_v49, %v2511_v34  ;;  %v6067_v34 = vld [vmem:[%s6366_s2] sm:$0xff] }
0x2e4d   :  { %v4153_v37 = vsel %vm2522_vm4, 1.0, %v5158_v1  ;;  %vm3547_vm4 = vcmp.eq.s32.totalorder %v5429_v49, 4 }
0x2e4e   :  { %2527 = vrot.lane.b32.xlu0 %v4153_v37, %s5162_s13 }
0x2ec0   :  { %v2528_v48 = vpop.permute.xlu0 %2527 }
0x2ec1   :  { %v2530_v7 = vsel %vm49_vm1, %v5845_v41, %v2528_v48 }
0x2ec2   :  { %4735 = vmatmul.mubr.msk.f32.vlgmr.msra.gmra.mxu1 %vm966_vm3, %v2530_v7 }
0x2ec3   :  { %4770 = vmatpush3.msra.mxu1 %v5647_v21  ;;  %4777 = vmatprep.mubr.msk.f32.mxu1 %vm5159_vm0, %v5158_v1 }
0x2ec4   :  { %4771 = vmatprep.subr.mxu1 %v5158_v1 }
0x2ec5   :  { %4772 = vmatpush3.msra.mxu1 %v5652_v22 }
0x2ec6   :  { %4773 = vmatprep.subr.mxu1 %v5158_v1 }
0x2ec7   :  { %4774 = vmatpush3.msra.mxu1 %v5659_v26 }
0x2ec8   :  { %4775 = vmatprep.subr.mxu1 %v5158_v1 }
0x2ec9   :  { %4776 = vmatpush3.msra.mxu1 %v5666_v28 }
0x2eca   :  { %4807 = vmatprep.subr.mxu1 %v5158_v1 }
0x2f82   :  { %v2600_v63 = vpop.f32.mrf.mxu1 }
0x2f83   :  { %v2601_v46 = vadd.f32 %v2600_v63, %v5516_v9 }
0x2f84   :  { %v4736_v41 = vpop.f32.mrf.mxu1 }
0x2f85   :  { %2611 = vrot.lane.b32.xlu1 %v2601_v46, %s5162_s13  ;;  %v4155_v39 = vmul.f32 -1.442695, %v2601_v46  ;;  %v6077_v41 = vld [vmem:[%s6367_s3 + $0x18] sm:$0xff] }
0x2f87   :  { %5012 = vpow2.f32 %v4155_v39  ;;  %v6093_v39 = vld [vmem:[%s6367_s3 + $0x8] sm:$0xff] }
0x2f94   :  { %v5013_v5 = vpop.eup %5012 }
0x2f95   :  { %v2607_v42 = vadd.f32 1.0, %v5013_v5  ;;  %v6100_v5 = vld [vmem:[%s6367_s3] sm:$0xff] }
0x2f97   :  { %5014 = vrcp.f32 %v2607_v42 }
0x2fa4   :  { %v5015_v57 = vpop.eup %5014 }
0x2fa5   :  { %v2621_v9 = vsub.f32 1.0, %v5015_v57  ;;  %v2627_v51 = vmul.f32 %v5015_v57, %v5841_v29 }
0x2ff7   :  { %v2612_v58 = vpop.permute.xlu1 %2611 }
0x2ff8   :  { %v2614_v59 = vmul.f32 %v5015_v57, %v2612_v58 }
0x2ffa   :  { %2616 = vrot.lane.b32.xlu1 %v2614_v59, %s5160_s11 }
0x306c   :  { %v2617_v60 = vpop.permute.xlu1 %2616 }
0x306d   :  { %v2619_v61 = vadd.f32 %v2617_v60, %v2601_v46 }
0x306f   :  { %5016 = vtanh.f32 %v2619_v61 }
0x307c   :  { %v5017_v8 = vpop.eup %5016 }
0x307d   :  { %2623 = vrot.lane.b32.xlu0 %v5017_v8, %s5161_s16 }
0x30ef   :  { %v2624_v10 = vpop.permute.xlu0 %2623 }
0x30f0   :  { %v2626_v62 = vmul.f32 %v2624_v10, %v2621_v9 }
0x30f2   :  { %v5950_v40 = vadd.f32 %v2627_v51, %v2626_v62 }
0x30f4   :  { %2630 = vrot.lane.b32.xlu1 %v5950_v40, %s5161_s16 }
0x3166   :  { %v5954_v11 = vpop.permute.xlu1 %2630 }
0x3167   :  { %4746 = vmatmul.mubr.msk.f32.vlgmr.msra.gmra.mxu0 %vm49_vm1, %v5954_v11 }
0x3168   :  { %4749 = vmatpush3.xpose.msk.msra.mxu0 %vm49_vm1, %v5567_v52  ;;  %4750 = vmatprep.mubr.msk.f32.mxu0 %vm5159_vm0, %v5158_v1 }
0x3169   :  { %4753 = vmatprep.subr.mxu0 %v5158_v1 }
0x316b   :  { %4751 = vmatmul.mubr.msk.f32.vlgmr.msra.gmra.mxu0 %vm49_vm1, %v5954_v11 }
0x316c   :  { %4754 = vmatpush3.msra.mxu0 %v5567_v52  ;;  %4755 = vmatprep.mubr.msk.f32.mxu0 %vm5159_vm0, %v5158_v1 }
0x316d   :  { %4758 = vmatprep.subr.mxu0 %v5158_v1 }
0x3227   :  { %v5969_v29 = vpop.f32.mrf.mxu0 }
0x3228   :  { %v2701_v37 = vadd.f32 %v5969_v29, %v5675_v31  ;;  %v6086_v31 = vld [vmem:[%s6367_s3 + $0x10] sm:$0xff] }
0x3229   :  { %v4747_v16 = vpop.f32.mrf.mxu0 }
0x322b   :  { %v2770_v43 = vpop.f32.mrf.mxu0 }
0x322c   :  { %v2774_v45 = vsel %vm1220_vm12, %v2770_v43, -inf }
0x322d   :  { %2775 = vmax.xlane.f32.xlu0 %v2774_v45  ;;  %v4752_v47 = vpop.f32.mrf.mxu0 }
0x32b6   :  { %v2776_v50 = vpop.xlane.xlu0 %2775 }
0x32b7   :  { %v2777_v0 = vsub.f32 %v2770_v43, %v2776_v50 }
0x32b9   :  { %v2778_v2 = vmul.f32 1.442695, %v2777_v0 }
0x32bb   :  { %5018 = vpow2.f32 %v2778_v2 }
0x32c8   :  { %v5019_v53 = vpop.eup %5018 }
0x32c9   :  { %4756 = vmatmul.mubr.msk.f32.vlgmr.msra.gmra.mxu0 %vm1228_vm13, %v5019_v53  ;;  %v2853_v54 = vsel %vm1220_vm12, %v5019_v53, 0.0 }
0x32ca   :  { %2854 = vadd.xlane.f32.xlu1 %v2853_v54  ;;  %4759 = vmatpush3.msra.mxu0 %v5592_v12 }
0x32cb   :  { %4760 = vmatprep.subr.mxu0 %v5158_v1  ;;  %4766 = vmatprep.mubr.msk.f32.mxu0 %vm5159_vm0, %v5158_v1 }
0x32cc   :  { %4761 = vmatpush3.msra.mxu0 %v5597_v13  ;;  %v5988_v13 = vld [vmem:[%s6366_s2 + $0x58] sm:$0xff] }
0x32cd   :  { %4762 = vmatprep.subr.mxu0 %v5158_v1 }
0x32ce   :  { %4763 = vmatpush3.msra.mxu0 %v5606_v14  ;;  %v5997_v14 = vld [vmem:[%s6366_s2 + $0x50] sm:$0xff] }
0x32cf   :  { %4764 = vmatprep.subr.mxu0 %v5158_v1 }
0x32d0   :  { %4765 = vmatpush3.msra.mxu0 %v5613_v15  ;;  %v6004_v15 = vld [vmem:[%s6366_s2 + $0x48] sm:$0xff] }
0x32d1   :  { %4780 = vmatprep.subr.mxu0 %v5158_v1 }
0x3353   :  { %v2855_v55 = vpop.xlane.xlu1 %2854 }
0x3354   :  { %5020 = vrcp.f32 %v2855_v55 }
0x3361   :  { %v5021_v12 = vpop.eup %5020 }
0x3389   :  { %v2849_v56 = vpop.f32.mrf.mxu0 }
0x338a   :  { %v2857_v23 = vmul.f32 %v5021_v12, %v2849_v56 }
0x338b   :  { %v4757_v25 = vpop.f32.mrf.mxu0 }
0x338c   :  { %4767 = vmatmul.mubr.msk.f32.vlgmr.msra.gmra.mxu0 %vm49_vm1, %v2857_v23 }
0x338d   :  { %4781 = vmatpush3.msra.mxu0 %v5988_v13  ;;  %4804 = vmatprep.mubr.msk.f32.mxu0 %vm5159_vm0, %v5158_v1 }
0x338e   :  { %4782 = vmatprep.subr.mxu0 %v5158_v1 }
0x338f   :  { %4783 = vmatpush3.msra.mxu0 %v5997_v14 }
0x3390   :  { %4784 = vmatprep.subr.mxu0 %v5158_v1 }
0x3391   :  { %4785 = vmatpush3.msra.mxu0 %v6004_v15 }
0x3392   :  { %4786 = vmatprep.subr.mxu0 %v5158_v1 }
0x3393   :  { %4787 = vmatpush3.msra.mxu0 %v6011_v30 }
0x3394   :  { %4788 = vmatprep.subr.mxu0 %v5158_v1 }
0x3395   :  { %4789 = vmatpush3.msra.mxu0 %v6018_v44 }
0x3396   :  { %4790 = vmatprep.subr.mxu0 %v5158_v1 }
0x3397   :  { %4791 = vmatpush3.msra.mxu0 %v6025_v17 }
0x3398   :  { %4792 = vmatprep.subr.mxu0 %v5158_v1 }
0x3399   :  { %4793 = vmatpush3.msra.mxu0 %v6032_v18 }
0x339a   :  { %4794 = vmatprep.subr.mxu0 %v5158_v1 }
0x339b   :  { %4795 = vmatpush3.msra.mxu0 %v6039_v19 }
0x339c   :  { %4796 = vmatprep.subr.mxu0 %v5158_v1 }
0x339d   :  { %4797 = vmatpush3.msra.mxu0 %v6046_v20 }
0x339e   :  { %4798 = vmatprep.subr.mxu0 %v5158_v1 }
0x339f   :  { %4799 = vmatpush3.msra.mxu0 %v6053_v24 }
0x33a0   :  { %4800 = vmatprep.subr.mxu0 %v5158_v1 }
0x33a1   :  { %4801 = vmatpush3.msra.mxu0 %v6060_v33 }
0x33a2   :  { %4802 = vmatprep.subr.mxu0 %v5158_v1 }
0x33a3   :  { %4803 = vmatpush3.msra.mxu0 %v6067_v34 }
0x33a4   :  { %4839 = vmatprep.subr.mxu0 %v5158_v1 }
0x344c   :  { %v2927_v48 = vpop.f32.mrf.mxu0 }
0x344d   :  { %v2931_v7 = vadd.f32 %v2927_v48, %v2701_v37 }
0x344e   :  { %v4768_v63 = vpop.f32.mrf.mxu0 }
0x344f   :  { %5022 = vtanh.f32 %v2931_v7 }
0x345c   :  { %v5023_v46 = vpop.eup %5022 }
0x345d   :  { %4778 = vmatmul.mubr.msk.f32.vlgmr.msra.gmra.mxu1 %vm49_vm1, %v5023_v46 }
0x345e   :  { %4808 = vmatpush3.msra.mxu1 %v6077_v41  ;;  %4815 = vmatprep.mubr.msk.f32.mxu1 %vm5159_vm0, %v5158_v1 }
0x345f   :  { %4809 = vmatprep.subr.mxu1 %v5158_v1 }
0x3460   :  { %4810 = vmatpush3.msra.mxu1 %v6086_v31 }
0x3461   :  { %4811 = vmatprep.subr.mxu1 %v5158_v1 }
0x3462   :  { %4812 = vmatpush3.msra.mxu1 %v6093_v39 }
0x3463   :  { %4813 = vmatprep.subr.mxu1 %v5158_v1 }
0x3464   :  { %4814 = vmatpush3.msra.mxu1 %v6100_v5 }
0x3465   :  { %4818 = vmatprep.subr.mxu1 %v5158_v1 }
0x351d   :  { %v3002_v42 = vpop.f32.mrf.mxu1 }
0x351e   :  { %v6105_v57 = vadd.f32 %v3002_v42, %v5693_v27 }
0x351f   :  { %v4779_v58 = vpop.f32.mrf.mxu1 }
0x3520   :  { %v3006_v59 = vsel %vm1464_vm14, %v6105_v57, -inf }
0x3521   :  { %3007 = vmax.xlane.f32.xlu0 %v3006_v59 }
0x35aa   :  { %v6109_v60 = vpop.xlane.xlu0 %3007 }
0x35ab   :  { %vm3009_vm5 = vcmp.eq.f32.partialorder %v6105_v57, %v6109_v60 }
0x35ac   :  { %v3010_v61 = vsel %vm3009_vm5, %v5429_v49, 128 }
0x35ad   :  { %v3011_v8 = vsel %vm1464_vm14, %v3010_v61, 2147483647 }
0x35ae   :  { %v3013_v9 = vshra.s32 %v3011_v8, 16  ;;  %v3012_v51 = vand.u32 65535, %v3011_v8 }
0x35b0   :  { %v3015_v10 = vcvt.s32.f32 %v3013_v9  ;;  %v3014_v62 = vcvt.s32.f32 %v3012_v51 }
0x35b2   :  { %3016 = vmin.xlane.f32.xlu0 %v3015_v10 }
0x363b   :  { %v3017_v27 = vpop.xlane.xlu0 %3016 }
0x363c   :  { %vm3018_vm6 = vcmp.eq.f32.partialorder %v3015_v10, %v3017_v27  ;;  %v3023_v16 = vcvt.f32.s32 %v3017_v27 }
0x363d   :  { %v3019_v29 = vsel %vm3018_vm6, %v3014_v62, inf }
0x363e   :  { %3020 = vmin.xlane.f32.xlu1 %v3019_v29  ;;  %v3024_v45 = vshll.u32 %v3023_v16, 16 }
0x36c7   :  { %v3021_v43 = vpop.xlane.xlu1 %3020 }
0x36c8   :  { %v3022_v47 = vcvt.f32.s32 %v3021_v43  ;;  %v6172_v43 = vld [vmem:[%s6367_s3 + $0x38] sm:$0xff] }
0x36ca   :  { %v3025_v50 = vadd.s32 %v3024_v45, %v3022_v47  ;;  %v6181_v45 = vld [vmem:[%s6367_s3 + $0x30] sm:$0xff]  ;;  %v6188_v47 = vld [vmem:[%s6367_s3 + $0x28] sm:$0xff] }
0x36cc   :  { %vm3036_vm9 = vcmp.eq.s32.totalorder %v5429_v49, %v3025_v50  ;;  %v6120_v0 = vsel %vm3033_vm7, %v3025_v50, %v5927_v35  ;;  %v6195_v50 = vld [vmem:[%s6367_s3 + $0x20] sm:$0xff] }
0x36cd   :  { %v4162_v2 = vsel %vm3036_vm9, 1.0, %v5158_v1 }
0x36ce   :  { %3041 = vrot.lane.b32.xlu0 %v4162_v2, %s5162_s13 }
0x3740   :  { %v3042_v53 = vpop.permute.xlu0 %3041 }
0x3741   :  { %v3044_v54 = vsel %vm49_vm1, %v5954_v11, %v3042_v53 }
0x3742   :  { %4805 = vmatmul.mubr.msk.f32.vlgmr.msra.gmra.mxu0 %vm966_vm3, %v3044_v54 }
0x3743   :  { %4840 = vmatpush3.msra.mxu0 %v5647_v21  ;;  %4847 = vmatprep.mubr.msk.f32.mxu0 %vm5159_vm0, %v5158_v1  ;;  %v6140_v21 = vld [vmem:[%s6366_s2 + $0x60] sm:$0x1] }
0x3744   :  { %4841 = vmatprep.subr.mxu0 %v5158_v1 }
0x3745   :  { %4842 = vmatpush3.msra.mxu0 %v5652_v22 }
0x3746   :  { %4843 = vmatprep.subr.mxu0 %v5158_v1 }
0x3747   :  { %4844 = vmatpush3.msra.mxu0 %v5659_v26 }
0x3748   :  { %4845 = vmatprep.subr.mxu0 %v5158_v1 }
0x3749   :  { %4846 = vmatpush3.msra.mxu0 %v5666_v28 }
0x374a   :  { %4877 = vmatprep.subr.mxu0 %v5158_v1 }
0x3802   :  { %v3114_v35 = vpop.f32.mrf.mxu0 }
0x3803   :  { %v3115_v11 = vadd.f32 %v6140_v21, %v3114_v35 }
0x3804   :  { %v4806_v55 = vpop.f32.mrf.mxu0 }
0x3805   :  { %3125 = vrot.lane.b32.xlu1 %v3115_v11, %s5162_s13  ;;  %v4164_v22 = vmul.f32 -1.442695, %v3115_v11 }
0x3807   :  { %5024 = vpow2.f32 %v4164_v22 }
0x3814   :  { %v5025_v26 = vpop.eup %5024 }
0x3815   :  { %v3121_v12 = vadd.f32 1.0, %v5025_v26 }
0x3817   :  { %5026 = vrcp.f32 %v3121_v12 }
0x3824   :  { %v5027_v56 = vpop.eup %5026 }
0x3825   :  { %v3135_v7 = vsub.f32 1.0, %v5027_v56  ;;  %v3141_v46 = vmul.f32 %v5027_v56, %v5950_v40 }
0x3877   :  { %v3126_v28 = vpop.permute.xlu1 %3125 }
0x3878   :  { %v3128_v23 = vmul.f32 %v5027_v56, %v3126_v28 }
0x387a   :  { %3130 = vrot.lane.b32.xlu1 %v3128_v23, %s5160_s11 }
0x38ec   :  { %v3131_v25 = vpop.permute.xlu1 %3130 }
0x38ed   :  { %v3133_v37 = vadd.f32 %v3131_v25, %v3115_v11 }
0x38ef   :  { %5028 = vtanh.f32 %v3133_v37 }
0x38fc   :  { %v5029_v48 = vpop.eup %5028 }
0x38fd   :  { %3137 = vrot.lane.b32.xlu0 %v5029_v48, %s5161_s16 }
0x396f   :  { %v3138_v63 = vpop.permute.xlu0 %3137 }
0x3970   :  { %v3140_v42 = vmul.f32 %v3138_v63, %v3135_v7 }
0x3972   :  { %v6147_v58 = vadd.f32 %v3141_v46, %v3140_v42  ;;  %v5095_v42 = vld [vmem:[%s6368_s4 + $0x18] sm:$0xff] }
0x3974   :  { %3144 = vrot.lane.b32.xlu1 %v6147_v58, %s5161_s16 }
0x39e6   :  { %v6151_v59 = vpop.permute.xlu1 %3144 }
0x39e7   :  { %4816 = vmatmul.mubr.msk.f32.vlgmr.msra.gmra.mxu1 %vm49_vm1, %v6151_v59 }
0x39e8   :  { %4819 = vmatpush3.xpose.msk.msra.mxu1 %vm49_vm1, %v5567_v52  ;;  %4820 = vmatprep.mubr.msk.f32.mxu1 %vm5159_vm0, %v5158_v1 }
0x39e9   :  { %4823 = vmatprep.subr.mxu1 %v5158_v1 }
0x39eb   :  { %4821 = vmatmul.mubr.msk.f32.vlgmr.msra.gmra.mxu1 %vm49_vm1, %v6151_v59 }
0x39ec   :  { %4824 = vmatpush3.msra.mxu1 %v5567_v52  ;;  %4825 = vmatprep.mubr.msk.f32.mxu1 %vm5159_vm0, %v5158_v1 }
0x39ed   :  { %4828 = vmatprep.subr.mxu1 %v5158_v1 }
0x3aa7   :  { %v3214_v40 = vpop.f32.mrf.mxu1 }
0x3aa9   :  { %v4817_v61 = vpop.f32.mrf.mxu1 }
0x3aab   :  { %v3284_v8 = vpop.f32.mrf.mxu1 }
0x3aac   :  { %v3288_v9 = vsel %vm1220_vm12, %v3284_v8, -inf }
0x3aad   :  { %3289 = vmax.xlane.f32.xlu0 %v3288_v9  ;;  %v4822_v10 = vpop.f32.mrf.mxu1 }
0x3b36   :  { %v3290_v51 = vpop.xlane.xlu0 %3289 }
0x3b37   :  { %v3291_v27 = vsub.f32 %v3284_v8, %v3290_v51 }
0x3b39   :  { %v3292_v62 = vmul.f32 1.442695, %v3291_v27 }
0x3b3b   :  { %5030 = vpow2.f32 %v3292_v62 }
0x3b48   :  { %v5031_v29 = vpop.eup %5030 }
0x3b49   :  { %4826 = vmatmul.mubr.msk.f32.vlgmr.msra.gmra.mxu1 %vm1228_vm13, %v5031_v29  ;;  %v3367_v16 = vsel %vm1220_vm12, %v5031_v29, 0.0 }
0x3b4a   :  { %3368 = vadd.xlane.f32.xlu1 %v3367_v16  ;;  %4829 = vmatpush3.msra.mxu1 %v6172_v43 }
0x3b4b   :  { %4830 = vmatprep.subr.mxu1 %v5158_v1  ;;  %4836 = vmatprep.mubr.msk.f32.mxu1 %vm5159_vm0, %v5158_v1 }
0x3b4c   :  { %4831 = vmatpush3.msra.mxu1 %v6181_v45 }
0x3b4d   :  { %4832 = vmatprep.subr.mxu1 %v5158_v1 }
0x3b4e   :  { %4833 = vmatpush3.msra.mxu1 %v6188_v47 }
0x3b4f   :  { %4834 = vmatprep.subr.mxu1 %v5158_v1 }
0x3b50   :  { %4835 = vmatpush3.msra.mxu1 %v6195_v50 }
0x3b51   :  { %4850 = vmatprep.subr.mxu1 %v5158_v1 }
0x3bd3   :  { %v3369_v2 = vpop.xlane.xlu1 %3368 }
0x3bd4   :  { %5032 = vrcp.f32 %v3369_v2 }
0x3be1   :  { %v5033_v53 = vpop.eup %5032 }
0x3c09   :  { %v3363_v54 = vpop.f32.mrf.mxu1 }
0x3c0a   :  { %v3371_v35 = vmul.f32 %v5033_v53, %v3363_v54 }
0x3c0b   :  { %v4827_v11 = vpop.f32.mrf.mxu1 }
0x3c0c   :  { %4837 = vmatmul.mubr.msk.f32.vlgmr.msra.gmra.mxu1 %vm49_vm1, %v3371_v35 }
0x3c0d   :  { %4851 = vmatpush3.msra.mxu1 %v5988_v13  ;;  %4874 = vmatprep.mubr.msk.f32.mxu1 %vm5159_vm0, %v5158_v1  ;;  %v6229_v13 = vld [vmem:[%s6367_s3 + $0x40] sm:$0x1] }
0x3c0e   :  { %4852 = vmatprep.subr.mxu1 %v5158_v1 }
0x3c0f   :  { %4853 = vmatpush3.msra.mxu1 %v5997_v14  ;;  %v3215_v14 = vadd.f32 %v6229_v13, %v3214_v40  ;;  %v5098_v40 = vld [vmem:[%s6368_s4] sm:$0xff] }
0x3c10   :  { %4854 = vmatprep.subr.mxu1 %v5158_v1 }
0x3c11   :  { %4855 = vmatpush3.msra.mxu1 %v6004_v15 }
0x3c12   :  { %4856 = vmatprep.subr.mxu1 %v5158_v1 }
0x3c13   :  { %4857 = vmatpush3.msra.mxu1 %v6011_v30 }
0x3c14   :  { %4858 = vmatprep.subr.mxu1 %v5158_v1 }
0x3c15   :  { %4859 = vmatpush3.msra.mxu1 %v6018_v44 }
0x3c16   :  { %4860 = vmatprep.subr.mxu1 %v5158_v1 }
0x3c17   :  { %4861 = vmatpush3.msra.mxu1 %v6025_v17 }
0x3c18   :  { %4862 = vmatprep.subr.mxu1 %v5158_v1 }
0x3c19   :  { %4863 = vmatpush3.msra.mxu1 %v6032_v18 }
0x3c1a   :  { %4864 = vmatprep.subr.mxu1 %v5158_v1 }
0x3c1b   :  { %4865 = vmatpush3.msra.mxu1 %v6039_v19  ;;  %v6246_v19 = vld [vmem:[%s6368_s4 + $0x20] sm:$0x1] }
0x3c1c   :  { %4866 = vmatprep.subr.mxu1 %v5158_v1 }
0x3c1d   :  { %4867 = vmatpush3.msra.mxu1 %v6046_v20 }
0x3c1e   :  { %4868 = vmatprep.subr.mxu1 %v5158_v1 }
0x3c1f   :  { %4869 = vmatpush3.msra.mxu1 %v6053_v24 }
0x3c20   :  { %4870 = vmatprep.subr.mxu1 %v5158_v1 }
0x3c21   :  { %4871 = vmatpush3.msra.mxu1 %v6060_v33 }
0x3c22   :  { %4872 = vmatprep.subr.mxu1 %v5158_v1 }
0x3c23   :  { %4873 = vmatpush3.msra.mxu1 %v6067_v34 }
0x3c24   :  { %4909 = vmatprep.subr.mxu1 %v5158_v1 }
0x3ccc   :  { %v3441_v15 = vpop.f32.mrf.mxu1 }
0x3ccd   :  { %v3445_v30 = vadd.f32 %v3441_v15, %v3215_v14 }
0x3cce   :  { %v4838_v44 = vpop.f32.mrf.mxu1 }
0x3ccf   :  { %5034 = vtanh.f32 %v3445_v30 }
0x3cdc   :  { %v5035_v17 = vpop.eup %5034 }
0x3cdd   :  { %4848 = vmatmul.mubr.msk.f32.vlgmr.msra.gmra.mxu0 %vm49_vm1, %v5035_v17 }
0x3cde   :  { %4878 = vmatpush3.msra.mxu0 %v6077_v41  ;;  %4885 = vmatprep.mubr.msk.f32.mxu0 %vm5159_vm0, %v5158_v1 }
0x3cdf   :  { %4879 = vmatprep.subr.mxu0 %v5158_v1 }
0x3ce0   :  { %4880 = vmatpush3.msra.mxu0 %v6086_v31 }
0x3ce1   :  { %4881 = vmatprep.subr.mxu0 %v5158_v1 }
0x3ce2   :  { %4882 = vmatpush3.msra.mxu0 %v6093_v39 }
0x3ce3   :  { %4883 = vmatprep.subr.mxu0 %v5158_v1 }
0x3ce4   :  { %4884 = vmatpush3.msra.mxu0 %v6100_v5 }
0x3ce5   :  { %4888 = vmatprep.subr.mxu0 %v5158_v1 }
0x3d9d   :  { %v3516_v18 = vpop.f32.mrf.mxu0 }
0x3d9e   :  { %v6249_v20 = vadd.f32 %v6246_v19, %v3516_v18 }
0x3d9f   :  { %v4849_v24 = vpop.f32.mrf.mxu0 }
0x3da0   :  { %v3520_v33 = vsel %vm1464_vm14, %v6249_v20, -inf }
0x3da1   :  { %3521 = vmax.xlane.f32.xlu0 %v3520_v33  ;;  %v1485_v33 = vsub.f32 %v5696_v36, %v5700_v38 }
0x3e2a   :  { %v6253_v34 = vpop.xlane.xlu0 %3521 }
0x3e2b   :  { %vm3523_vm10 = vcmp.eq.f32.partialorder %v6249_v20, %v6253_v34 }
0x3e2c   :  { %v3524_v41 = vsel %vm3523_vm10, %v5429_v49, 128 }
0x3e2d   :  { %v3525_v31 = vsel %vm1464_vm14, %v3524_v41, 2147483647 }
0x3e2e   :  { %v3527_v39 = vshra.s32 %v3525_v31, 16  ;;  %v3526_v55 = vand.u32 65535, %v3525_v31 }
0x3e30   :  { %v3529_v5 = vcvt.s32.f32 %v3527_v39  ;;  %v3528_v26 = vcvt.s32.f32 %v3526_v55  ;;  %v1486_v39 = vmul.f32 1.442695, %v1485_v33 }
0x3e32   :  { %3530 = vmin.xlane.f32.xlu0 %v3529_v5 }
0x3ebb   :  { %v3531_v22 = vpop.xlane.xlu0 %3530 }
0x3ebc   :  { %vm3532_vm11 = vcmp.eq.f32.partialorder %v3529_v5, %v3531_v22  ;;  %v3537_v56 = vcvt.f32.s32 %v3531_v22  ;;  %v3540_v22 = vsub.f32 %v6249_v20, %v6253_v34 }
0x3ebd   :  { %v3533_v12 = vsel %vm3532_vm11, %v3528_v26, inf }
0x3ebe   :  { %3534 = vmin.xlane.f32.xlu1 %v3533_v12  ;;  %v3538_v23 = vshll.u32 %v3537_v56, 16  ;;  %v3541_v26 = vmul.f32 1.442695, %v3540_v22 }
0x3f47   :  { %v3535_v28 = vpop.xlane.xlu1 %3534 }
0x3f48   :  { %v3536_v25 = vcvt.f32.s32 %v3535_v28 }
0x3f4a   :  { %v3539_v37 = vadd.s32 %v3538_v23, %v3536_v25 }
0x3f4c   :  { %vm3550_vm5 = vcmp.eq.s32.totalorder %v5429_v49, %v3539_v37  ;;  %v6264_v48 = vsel %vm3547_vm4, %v3539_v37, %v6120_v0  ;;  %v5096_v0 = vld [vmem:[%s6368_s4 + $0x10] sm:$0xff] }
0x3f4d   :  { %v4171_v7 = vsel %vm3550_vm5, 1.0, %v5158_v1 }
0x3f4e   :  { %3555 = vrot.lane.b32.xlu0 %v4171_v7, %s5162_s13 }
0x3fc0   :  { %v3556_v63 = vpop.permute.xlu0 %3555 }
0x3fc1   :  { %v3558_v46 = vsel %vm49_vm1, %v6151_v59, %v3556_v63  ;;  %v5097_v59 = vld [vmem:[%s6368_s4 + $0x8] sm:$0xff]  ;;  %s5163_s4 = smov [#allocation6]  }
0x3fc2   :  { %4875 = vmatmul.mubr.msk.f32.vlgmr.msra.gmra.mxu1 %vm966_vm3, %v3558_v46  ;;  %vm4061_vm3 = vcmp.eq.s32.totalorder %v5429_v49, 5 }
0x3fc3   :  { %4910 = vmatpush3.msra.mxu1 %v5095_v42  ;;  %4917 = vmatprep.mubr.msk.f32.mxu1 %vm5159_vm0, %v5158_v1 }
0x3fc4   :  { %4911 = vmatprep.subr.mxu1 %v5158_v1 }
0x3fc5   :  { %4912 = vmatpush3.msra.mxu1 %v5096_v0 }
0x3fc6   :  { %4913 = vmatprep.subr.mxu1 %v5158_v1 }
0x3fc7   :  { %4914 = vmatpush3.msra.mxu1 %v5097_v59  ;;  %v1999_v59 = vsub.f32 %v5802_v32, %v5806_v6 }
0x3fc8   :  { %4915 = vmatprep.subr.mxu1 %v5158_v1 }
0x3fc9   :  { %4916 = vmatpush3.msra.mxu1 %v5098_v40  ;;  %v2000_v40 = vmul.f32 1.442695, %v1999_v59 }
0x4082   :  { %v3628_v61 = vpop.f32.mrf.mxu1 }
0x4083   :  { %v3629_v8 = vadd.f32 %v6140_v21, %v3628_v61 }
0x4084   :  { %v4876_v9 = vpop.f32.mrf.mxu1 }
0x4085   :  { %3639 = vrot.lane.b32.xlu1 %v3629_v8, %s5162_s13  ;;  %v4173_v10 = vmul.f32 -1.442695, %v3629_v8 }
0x4087   :  { %5036 = vpow2.f32 %v4173_v10 }
0x4094   :  { %v5037_v51 = vpop.eup %5036 }
0x4095   :  { %v3635_v27 = vadd.f32 1.0, %v5037_v51 }
0x4097   :  { %5038 = vrcp.f32 %v3635_v27 }
0x40a4   :  { %v5039_v62 = vpop.eup %5038 }
0x40a5   :  { %v3649_v21 = vsub.f32 1.0, %v5039_v62  ;;  %v3655_v11 = vmul.f32 %v5039_v62, %v6147_v58 }
0x40f7   :  { %v3640_v29 = vpop.permute.xlu1 %3639 }
0x40f8   :  { %v3642_v16 = vmul.f32 %v5039_v62, %v3640_v29 }
0x40fa   :  { %3644 = vrot.lane.b32.xlu1 %v3642_v16, %s5160_s11  ;;  %s4083_s11 = sshll.u32 %s5163_s4, 4  ;;  %s4084_s11 = int_to_ptr.vmem [resolvable:$true] %s4083_s11 }
0x40fb   :  { %s5115_s13 = scalar_lea.vmem %s4084_s11, 32  ;;  %p5116_p6 = scmp.lt.s32.totalorder %s4084_s11, %s4084_s11 }
0x416c   :  { %v3645_v2 = vpop.permute.xlu1 %3644 }
0x416d   :  { %v3647_v53 = vadd.f32 %v3645_v2, %v3629_v8 }
0x416f   :  { %5040 = vtanh.f32 %v3647_v53 }
0x417c   :  { %v5041_v54 = vpop.eup %5040 }
0x417d   :  { %3651 = vrot.lane.b32.xlu0 %v5041_v54, %s5161_s16 }
0x41ef   :  { %v3652_v35 = vpop.permute.xlu0 %3651 }
0x41f0   :  { %v3654_v14 = vmul.f32 %v3652_v35, %v3649_v21 }
0x41f2   :  { %v3656_v15 = vadd.f32 %v3655_v11, %v3654_v14 }
0x41f4   :  { %3658 = vrot.lane.b32.xlu1 %v3656_v15, %s5161_s16  ;;  %s5111_s16 = scalar_lea.vmem %s4084_s11, 16 }
0x41f5   :  { %p5112_p5 = scmp.ne.s32.totalorder %s4084_s11, %s5111_s16  ;;  %p5117_p7 = scmp.lt.s32.totalorder %s5115_s13, %s5111_s16 }
0x41f7   :  { %p5118_p8 = por %p5117_p7, %p5116_p6 }
0x41f9   :  { %p5119_p9 = pnand %p5118_p8, %p5112_p5 }
0x4266   :  { %v3659_v30 = vpop.permute.xlu1 %3658 }
0x4267   :  { %4886 = vmatmul.mubr.msk.f32.vlgmr.msra.gmra.mxu0 %vm49_vm1, %v3659_v30 }
0x4268   :  { %4889 = vmatpush3.xpose.msk.msra.mxu0 %vm49_vm1, %v5567_v52  ;;  %4890 = vmatprep.mubr.msk.f32.mxu0 %vm5159_vm0, %v5158_v1 }
0x4269   :  { %4893 = vmatprep.subr.mxu0 %v5158_v1 }
0x426b   :  { %4891 = vmatmul.mubr.msk.f32.vlgmr.msra.gmra.mxu0 %vm49_vm1, %v3659_v30 }
0x426c   :  { %4894 = vmatpush3.msra.mxu0 %v5567_v52  ;;  %4895 = vmatprep.mubr.msk.f32.mxu0 %vm5159_vm0, %v5158_v1  ;;  %v2512_v52 = vsub.f32 %v5913_v3, %v5917_v4 }
0x426d   :  { %4898 = vmatprep.subr.mxu0 %v5158_v1 }
0x426e   :  { %v2513_v55 = vmul.f32 1.442695, %v2512_v52 }
0x4327   :  { %v3728_v58 = vpop.f32.mrf.mxu0 }
0x4329   :  { %v4887_v44 = vpop.f32.mrf.mxu0 }
0x432b   :  { %v3798_v17 = vpop.f32.mrf.mxu0 }
0x432c   :  { %v3802_v18 = vsel %vm1220_vm12, %v3798_v17, -inf }
0x432d   :  { %3803 = vmax.xlane.f32.xlu0 %v3802_v18  ;;  %v4892_v24 = vpop.f32.mrf.mxu0 }
0x43b6   :  { %v3804_v41 = vpop.xlane.xlu0 %3803 }
0x43b7   :  { %v3805_v31 = vsub.f32 %v3798_v17, %v3804_v41 }
0x43b9   :  { %v3806_v5 = vmul.f32 1.442695, %v3805_v31 }
0x43bb   :  { %5042 = vpow2.f32 %v3806_v5 }
0x43bc   :  { %5044 = vpow2.f32 %v1486_v39 }
0x43bd   :  { %5046 = vpow2.f32 %v2513_v55 }
0x43be   :  { %5048 = vpow2.f32 %v3541_v26 }
0x43c8   :  { %v5043_v12 = vpop.eup %5042 }
0x43c9   :  { %4896 = vmatmul.mubr.msk.f32.vlgmr.msra.gmra.mxu0 %vm1228_vm13, %v5043_v12  ;;  %v3881_v36 = vsel %vm1220_vm12, %v5043_v12, 0.0  ;;  %v5045_v38 = vpop.eup %5044  ;;  %vm4064_vm12 = vcmask 40960  }
0x43ca   :  { %3882 = vadd.xlane.f32.xlu1 %v3881_v36  ;;  %4899 = vmatpush3.msra.mxu0 %v6172_v43  ;;  %v1488_v3 = vsel %vm1464_vm14, %v5045_v38, 0.0  ;;  %v5047_v4 = vpop.eup %5046 }
0x43cb   :  { %4900 = vmatprep.subr.mxu0 %v5158_v1  ;;  %4906 = vmatprep.mubr.msk.f32.mxu0 %vm5159_vm0, %v5158_v1  ;;  %v2515_v43 = vsel %vm1464_vm14, %v5047_v4, 0.0  ;;  %v5049_v20 = vpop.eup %5048 }
0x43cc   :  { %4901 = vmatpush3.msra.mxu0 %v6181_v45  ;;  %v3543_v34 = vsel %vm1464_vm14, %v5049_v20, 0.0 }
0x43cd   :  { %4902 = vmatprep.subr.mxu0 %v5158_v1 }
0x43ce   :  { %1489 = vadd.xlane.f32.xlu1 %v1488_v3  ;;  %4903 = vmatpush3.msra.mxu0 %v6188_v47  ;;  %v3729_v47 = vadd.f32 %v6229_v13, %v3728_v58  ;;  %v3026_v13 = vsub.f32 %v6105_v57, %v6109_v60 }
0x43cf   :  { %4904 = vmatprep.subr.mxu0 %v5158_v1 }
0x43d0   :  { %4905 = vmatpush3.msra.mxu0 %v6195_v50  ;;  %v3027_v61 = vmul.f32 1.442695, %v3026_v13 }
0x43d2   :  { %2516 = vadd.xlane.f32.xlu1 %v2515_v43 }
0x43d6   :  { %3544 = vadd.xlane.f32.xlu1 %v3543_v34 }
0x4453   :  { %v3883_v45 = vpop.xlane.xlu1 %3882 }
0x4454   :  { %5050 = vrcp.f32 %v3883_v45 }
0x4457   :  { %v1490_v53 = vpop.xlane.xlu1 %1489 }
0x445b   :  { %v2517_v11 = vpop.xlane.xlu1 %2516 }
0x445f   :  { %v3545_v30 = vpop.xlane.xlu1 %3544 }
0x4461   :  { %v5051_v56 = vpop.eup %5050 }
0x4489   :  { %v3877_v28 = vpop.f32.mrf.mxu0 }
0x448a   :  { %v3885_v23 = vmul.f32 %v5051_v56, %v3877_v28 }
0x448b   :  { %v4897_v25 = vpop.f32.mrf.mxu0 }
0x448c   :  { %4907 = vmatmul.mubr.msk.f32.vlgmr.msra.gmra.mxu0 %vm49_vm1, %v3885_v23 }
0x454c   :  { %v3955_v1 = vpop.f32.mrf.mxu0 }
0x454d   :  { %v3959_v37 = vadd.f32 %v3955_v1, %v3729_v47 }
0x454e   :  { %v4908_v50 = vpop.f32.mrf.mxu0 }
0x454f   :  { %5052 = vtanh.f32 %v3959_v37 }
0x4550   :  { %5054 = vpow2.f32 %v2000_v40 }
0x4551   :  { %5056 = vpow2.f32 %v3027_v61 }
0x455c   :  { %v5053_v7 = vpop.eup %5052 }
0x455d   :  { %4918 = vmatmul.mubr.msk.f32.vlgmr.msra.gmra.mxu1 %vm49_vm1, %v5053_v7  ;;  %v5055_v29 = vpop.eup %5054 }
0x455e   :  { %v2002_v32 = vsel %vm1464_vm14, %v5055_v29, 0.0  ;;  %v5057_v6 = vpop.eup %5056 }
0x455f   :  { %v3029_v57 = vsel %vm1464_vm14, %v5057_v6, 0.0 }
0x461d   :  { %v4030_v63 = vpop.f32.mrf.mxu1 }
0x461e   :  { %v4031_v46 = vadd.f32 %v6246_v19, %v4030_v63 }
0x461f   :  { %v4919_v42 = vpop.f32.mrf.mxu1 }
0x4620   :  { %v4034_v0 = vsel %vm1464_vm14, %v4031_v46, -inf }
0x4621   :  { %4035 = vmax.xlane.f32.xlu0 %v4034_v0 }
0x46aa   :  { %v4036_v8 = vpop.xlane.xlu0 %4035 }
0x46ab   :  { %vm4037_vm0 = vcmp.eq.f32.partialorder %v4031_v46, %v4036_v8  ;;  %v4054_v9 = vsub.f32 %v4031_v46, %v4036_v8 }
0x46ac   :  { %v4038_v10 = vsel %vm4037_vm0, %v5429_v49, 128 }
0x46ad   :  { %v4055_v19 = vmul.f32 1.442695, %v4054_v9  ;;  %v4039_v51 = vsel %vm1464_vm14, %v4038_v10, 2147483647 }
0x46ae   :  { %v4041_v27 = vshra.s32 %v4039_v51, 16  ;;  %v4040_v2 = vand.u32 65535, %v4039_v51 }
0x46af   :  { %5058 = vpow2.f32 %v4055_v19 }
0x46b0   :  { %v4043_v62 = vcvt.s32.f32 %v4041_v27  ;;  %v4042_v21 = vcvt.s32.f32 %v4040_v2  ;;  %5060 = vrcp.f32 %v1490_v53 }
0x46b2   :  { %4044 = vmin.xlane.f32.xlu0 %v4043_v62 }
0x46b6   :  { %2003 = vadd.xlane.f32.xlu0 %v2002_v32 }
0x46ba   :  { %3030 = vadd.xlane.f32.xlu0 %v3029_v57 }
0x46bc   :  { %v5059_v60 = vpop.eup %5058 }
0x46bd   :  { %v4057_v16 = vsel %vm1464_vm14, %v5059_v60, 0.0  ;;  %v5061_v44 = vpop.eup %5060 }
0x46be   :  { %4058 = vadd.xlane.f32.xlu0 %v4057_v16  ;;  %v1494_v18 = vsel %vm1492_vm8, %v5061_v44, 0.0 }
0x473b   :  { %v4045_v54 = vpop.xlane.xlu0 %4044 }
0x473c   :  { %vm4046_vm1 = vcmp.eq.f32.partialorder %v4043_v62, %v4045_v54 }
0x473d   :  { %v4047_v35 = vsel %vm4046_vm1, %v4042_v21, inf }
0x473e   :  { %4048 = vmin.xlane.f32.xlu1 %v4047_v35 }
0x473f   :  { %v2004_v14 = vpop.xlane.xlu0 %2003 }
0x4740   :  { %5062 = vrcp.f32 %v2004_v14 }
0x4741   :  { %5064 = vrcp.f32 %v2517_v11 }
0x4743   :  { %v3031_v15 = vpop.xlane.xlu0 %3030 }
0x4744   :  { %5066 = vrcp.f32 %v3031_v15 }
0x4745   :  { %5068 = vrcp.f32 %v3545_v30 }
0x4747   :  { %v4059_v58 = vpop.xlane.xlu0 %4058 }
0x4748   :  { %5070 = vrcp.f32 %v4059_v58 }
0x474d   :  { %v5063_v17 = vpop.eup %5062 }
0x474e   :  { %v2007_v24 = vsel %vm941_vm2, %v5063_v17, %v1494_v18  ;;  %v5065_v33 = vpop.eup %5064 }
0x474f   :  { %v2521_v31 = vsel %vm2519_vm15, %v5065_v33, %v2007_v24 }
0x4751   :  { %v5067_v41 = vpop.eup %5066 }
0x4752   :  { %v3035_v39 = vsel %vm3033_vm7, %v5067_v41, %v2521_v31  ;;  %v5069_v52 = vpop.eup %5068 }
0x4753   :  { %v3549_v55 = vsel %vm3547_vm4, %v5069_v52, %v3035_v39 }
0x4755   :  { %v5071_v5 = vpop.eup %5070 }
0x4756   :  { %v4063_v22 = vsel %vm4061_vm3, %v5071_v5, %v3549_v55 }
0x4757   :  { %4066 = vst.msk [vmem:[#allocation6] sm:$0x1] %vm4064_vm12, %v4063_v22 }
0x4758   :  { %5122 = shalt.err (!%p5119_p9)
}
0x4759   :  { %4086 = dma.vmem_to_hbm [thread:$0]  %s4084_s11, 16, %s6370_s6, [#allocation7]   ;;  %v4051_v26 = vcvt.f32.s32 %v4045_v54 }
0x475a   :  { %s5164_s14 = smov [#allocation5]  }
0x475b   :  { %v4052_v36 = vshll.u32 %v4051_v26, 16  ;;  %s4073_s15 = sshll.u32 %s5164_s14, 4  ;;  %s4074_s15 = int_to_ptr.vmem [resolvable:$true] %s4073_s15 }
0x475c   :  { %s5131_s17 = scalar_lea.vmem %s4074_s15, 16  ;;  %s5135_s2 = scalar_lea.vmem %s4074_s15, 32 }
0x475d   :  { %p5132_p10 = scmp.ne.s32.totalorder %s4074_s15, %s5131_s17  ;;  %p5136_p11 = scmp.lt.s32.totalorder %s4074_s15, %s4074_s15 }
0x475e   :  { %p5137_p12 = scmp.lt.s32.totalorder %s5135_s2, %s5131_s17 }
0x4760   :  { %p5138_p13 = por %p5137_p12, %p5136_p11 }
0x4762   :  { %p5139_p0 = pnand %p5138_p13, %p5132_p10 }
0x47c7   :  { %v4049_v12 = vpop.xlane.xlu1 %4048 }
0x47c8   :  { %v4050_v38 = vcvt.f32.s32 %v4049_v12 }
0x47ca   :  { %v4053_v3 = vadd.s32 %v4052_v36, %v4050_v38 }
0x47cc   :  { %v4062_v4 = vsel %vm4061_vm3, %v4053_v3, %v6264_v48 }
0x47cd   :  { %4065 = vst.msk [vmem:[#allocation5] sm:$0x1] %vm4064_vm12, %v4062_v4 }
0x47ce   :  { %5142 = shalt.err (!%p5139_p0)
}
0x47cf   :  { %4076 = dma.vmem_to_hbm [thread:$0]  %s4074_s15, 16, %s6369_s5, [#allocation3]  }
0x47d0   :  { %5153 = dma.done.wait [#allocation3], 16  }
0x47d1   :  { %5154 = vsyncadd [#allocation3], 4294967280 }
0x47d2   :  { %5155 = dma.done.wait [#allocation7], 16  }
0x47d3   :  { %5156 = vsyncadd [#allocation7], 4294967280 }
0x47d4   :  { %4093 = vsyncpa [#allocation3], 1 }
0x47d5   :  { %4094 = vsyncpa [#allocation7], 1 }
0x47d6   :  { %4095 = vsyncpa [#allocation4], 1 }

</bundles_post_ra>
